<compile_context>
chip_gen: v7x
topology: tpu7x:2x2x1
jax: 0.10.0
libtpu: 0.0.40
codegen_flags: <defaults>
</compile_context>

<pallas_src>
import functools

import jax
import jax.numpy as jnp
from jax.experimental import pallas as pl
from jax.experimental.pallas import tpu as pltpu


# ----------------------------------------------------------------------------
# Helpers
# ----------------------------------------------------------------------------
def _row_tile(n):
    """Pick a row (points) tile that divides n."""
    for cand in (256, 128, 64, 32, 16, 8):
        if n % cand == 0:
            return cand
    # TODO(synk): pad the point axis to a multiple of 8 for awkward N instead of
    # falling back to a single whole-N block.
    return n


def _cparams(*sem):
    return pltpu.CompilerParams(
        dimension_semantics=sem,
        vmem_limit_bytes=32 * 1024 * 1024,
    )


# ----------------------------------------------------------------------------
# Pallas kernels
# ----------------------------------------------------------------------------
def _neg_sq_dist_kernel(xq_ref, xk_ref, o_ref):
    # o[i, j] = 2 * <x_i, x_j> - ||x_i||^2 - ||x_j||^2   (same formula as torch knn())
    xq = xq_ref[0].astype(jnp.float32)                              # (tn, C)
    xk = xk_ref[0].astype(jnp.float32)                              # (N,  C)
    sq_q = jnp.sum(xq * xq, axis=-1, keepdims=True)                 # (tn, 1)
    sq_k = jnp.sum(xk * xk, axis=-1, keepdims=True)                 # (N, 1)
    inner = jax.lax.dot_general(
        xq, xk, (((1,), (1,)), ((), ())), preferred_element_type=jnp.float32
    )                                                               # (tn, N)
    o_ref[0] = 2.0 * inner - sq_q - sq_k.T


def neg_sq_pairwise_dist(x, tn):
    """x: (B, N, C) -> (B, N, N) negative squared pairwise distances (f32)."""
    B, N, C = x.shape
    return pl.pallas_call(
        _neg_sq_dist_kernel,
        out_shape=jax.ShapeDtypeStruct((B, N, N), jnp.float32),
        grid_spec=pltpu.PrefetchScalarGridSpec(
            num_scalar_prefetch=0,
            grid=(B, N // tn),
            in_specs=[
                pl.BlockSpec((1, tn, C), lambda b, i: (b, i, 0)),   # query rows
                pl.BlockSpec((1, N, C), lambda b, i: (b, 0, 0)),    # all keys (resident)
            ],
            out_specs=pl.BlockSpec((1, tn, N), lambda b, i: (b, i, 0)),
        ),
        compiler_params=_cparams("parallel", "parallel"),
    )(x, x)


def _edgeconv_kernel(*refs, n_convs, k, neg_slope):
    # refs = (nbr_ref, ctr_ref, w_top, w_diff, scale0, bias0,
    #         [w, scale, bias] for each extra conv, o_ref)
    # nbr_ref: (1, K, tp, C) bf16 ; ctr_ref: (1, tp, C) bf16 ; o_ref: (1, tp, Cout)
    nbr_ref, ctr_ref = refs[0], refs[1]
    o_ref = refs[-1]
    lrefs = refs[2:-1]

    w_top = lrefs[0][...]                                   # (C, Cmid) bf16
    s0 = lrefs[2][...]                                      # (1, Cmid) f32
    b0 = lrefs[3][...]                                      # (1, Cmid) f32
    # Center contribution of conv #1 (computed once per tile, folded with BN bias):
    #   [nbr - ctr, ctr] @ [w_top; w_bot] = nbr @ w_top + ctr @ (w_bot - w_top)
    q = jnp.dot(ctr_ref[0], lrefs[1][...], preferred_element_type=jnp.float32)
    qsb = q * s0 + b0                                        # (tp, Cmid) f32

    # Pre-load remaining layers' weights/affines before the unrolled neighbor loop.
    extra = []
    for li in range(1, n_convs):
        base = 4 + 3 * (li - 1)
        extra.append((lrefs[base][...], lrefs[base + 1][...], lrefs[base + 2][...]))

    acc = None
    for j in range(k):                                       # static unroll over k
        m = jnp.dot(nbr_ref[0, j], w_top, preferred_element_type=jnp.float32)
        y = m * s0 + qsb                                     # BN affine (bias folded)
        y = jnp.where(y >= 0, y, neg_slope * y)
        for (w, s, b) in extra:
            y = jnp.dot(y.astype(jnp.bfloat16), w, preferred_element_type=jnp.float32)
            y = y * s + b
            y = jnp.where(y >= 0, y, neg_slope * y)
        acc = y if acc is None else jnp.maximum(acc, y)      # running max over neighbors
    o_ref[0] = acc.astype(o_ref.dtype)


def fused_edgeconv(nbr, ctr, layers, tp, *, neg_slope=0.2):
    """nbr: (B, K, N, C) bf16 gathered neighbor feats; ctr: (B, N, C) bf16 centers.

    layers: [(w, scale, bias), ...]; the first w is (2C, Cmid) (edge conv), the
    rest are plain (Cin, Cout).  Returns max-over-neighbors output (B, N, Cout) bf16.
    """
    B, K, N, C = nbr.shape
    Cout = layers[-1][0].shape[1]
    n_convs = len(layers)

    w1, s1, b1 = layers[0]
    assert w1.shape[0] == 2 * C
    cmid = w1.shape[1]
    w_top = w1[:C]
    w_diff = (w1[C:].astype(jnp.float32) - w1[:C].astype(jnp.float32)).astype(w1.dtype)

    kern = functools.partial(_edgeconv_kernel, n_convs=n_convs, k=K, neg_slope=neg_slope)
    in_specs = [
        pl.BlockSpec((1, K, tp, C), lambda b, i: (b, 0, i, 0)),
        pl.BlockSpec((1, tp, C), lambda b, i: (b, i, 0)),
        pl.BlockSpec((C, cmid), lambda b, i: (0, 0)),
        pl.BlockSpec((C, cmid), lambda b, i: (0, 0)),
        pl.BlockSpec((1, cmid), lambda b, i: (0, 0)),
        pl.BlockSpec((1, cmid), lambda b, i: (0, 0)),
    ]
    args = [nbr, ctr, w_top, w_diff, s1, b1]
    for (w, s, bi) in layers[1:]:
        cin, cout = w.shape
        in_specs += [
            pl.BlockSpec((cin, cout), lambda b, i: (0, 0)),
            pl.BlockSpec((1, cout), lambda b, i: (0, 0)),
            pl.BlockSpec((1, cout), lambda b, i: (0, 0)),
        ]
        args += [w, s, bi]
    return pl.pallas_call(
        kern,
        out_shape=jax.ShapeDtypeStruct((B, N, Cout), jnp.bfloat16),
        grid_spec=pltpu.PrefetchScalarGridSpec(
            num_scalar_prefetch=0,
            grid=(B, N // tp),
            in_specs=in_specs,
            out_specs=pl.BlockSpec((1, tp, Cout), lambda b, i: (b, i, 0)),
        ),
        compiler_params=_cparams("parallel", "parallel"),
    )(*args)


def _conv6_gmax_kernel(x1_ref, x2_ref, x3_ref, w_ref, s_ref, b_ref, gmax_ref,
                       *feat_refs, neg_slope):
    # conv6 on the (virtual) concat(x1, x2, x3) via partial matmuls, then running
    # global max over points accumulated in the resident gmax output block.
    y = jnp.dot(x1_ref[0], w_ref[0:64, :], preferred_element_type=jnp.float32)
    y = y + jnp.dot(x2_ref[0], w_ref[64:128, :], preferred_element_type=jnp.float32)
    y = y + jnp.dot(x3_ref[0], w_ref[128:192, :], preferred_element_type=jnp.float32)
    y = y * s_ref[...] + b_ref[...]
    y = jnp.where(y >= 0, y, neg_slope * y)                 # (tp, emb) f32
    if feat_refs:                                           # pretrain path only
        feat_refs[0][0] = y.astype(feat_refs[0].dtype)
    tmax = jnp.max(y, axis=0, keepdims=True)                # (1, emb)

    @pl.when(pl.program_id(1) == 0)
    def _():
        gmax_ref[0] = tmax

    @pl.when(pl.program_id(1) != 0)
    def _():
        gmax_ref[0] = jnp.maximum(gmax_ref[0], tmax)


def conv6_global_max(x1, x2, x3, w, scale, bias, tp, *, with_feat=False, neg_slope=0.2):
    """x1/x2/x3: (B, N, 64) -> gmax (B, 1, emb) f32 [, feat (B, N, emb) f32]."""
    B, N, _ = x1.shape
    emb = w.shape[1]
    kern = functools.partial(_conv6_gmax_kernel, neg_slope=neg_slope)
    gmax_shape = jax.ShapeDtypeStruct((B, 1, emb), jnp.float32)
    gmax_spec = pl.BlockSpec((1, 1, emb), lambda b, i: (b, 0, 0))
    if with_feat:
        out_shape = (gmax_shape, jax.ShapeDtypeStruct((B, N, emb), jnp.float32))
        out_specs = (gmax_spec, pl.BlockSpec((1, tp, emb), lambda b, i: (b, i, 0)))
    else:
        out_shape = gmax_shape
        out_specs = gmax_spec
    return pl.pallas_call(
        kern,
        out_shape=out_shape,
        grid_spec=pltpu.PrefetchScalarGridSpec(
            num_scalar_prefetch=0,
            grid=(B, N // tp),
            in_specs=[
                pl.BlockSpec((1, tp, 64), lambda b, i: (b, i, 0)),
                pl.BlockSpec((1, tp, 64), lambda b, i: (b, i, 0)),
                pl.BlockSpec((1, tp, 64), lambda b, i: (b, i, 0)),
                pl.BlockSpec((192, emb), lambda b, i: (0, 0)),
                pl.BlockSpec((1, emb), lambda b, i: (0, 0)),
                pl.BlockSpec((1, emb), lambda b, i: (0, 0)),
            ],
            out_specs=out_specs,
        ),
        compiler_params=_cparams("parallel", "arbitrary"),
    )(x1, x2, x3, w, scale, bias)


def _head_kernel(g_ref, x1_ref, x2_ref, x3_ref, w7_ref, s7_ref, b7_ref,
                 w8_ref, s8_ref, b8_ref, w9_ref, o_ref, *, emb, neg_slope):
    tp = x1_ref.shape[1]
    # conv7 on concat(repeat(gmax), x1, x2, x3) == sum of partial matmuls.
    g = g_ref[0].astype(jnp.bfloat16)                                      # (1, emb)
    yg = jnp.dot(g, w7_ref[0:emb, :], preferred_element_type=jnp.float32)  # (1, 512)
    y = jnp.dot(x1_ref[0], w7_ref[emb:emb + 64, :], preferred_element_type=jnp.float32)
    y = y + jnp.dot(x2_ref[0], w7_ref[emb + 64:emb + 128, :], preferred_element_type=jnp.float32)
    y = y + jnp.dot(x3_ref[0], w7_ref[emb + 128:emb + 192, :], preferred_element_type=jnp.float32)
    y = y + jnp.broadcast_to(yg, (tp, yg.shape[1]))
    y = y * s7_ref[...] + b7_ref[...]
    y = jnp.where(y >= 0, y, neg_slope * y)
    # conv8
    y = jnp.dot(y.astype(jnp.bfloat16), w8_ref[...], preferred_element_type=jnp.float32)
    y = y * s8_ref[...] + b8_ref[...]
    y = jnp.where(y >= 0, y, neg_slope * y)
    # TODO(synk): nn.Dropout(p=0.5) reproduced in eval mode (identity) only.
    # conv9 (weights pre-padded to a lane-dense 128-wide output; sliced outside)
    y = jnp.dot(y.astype(jnp.bfloat16), w9_ref[...], preferred_element_type=jnp.float32)
    o_ref[0] = y.astype(o_ref.dtype)


def head_classifier(gmax, x1, x2, x3, params, tp, *, neg_slope=0.2):
    """Fused conv7 + conv8 + dropout(eval) + conv9.  Returns (B, N, ncp) f32."""
    B, N, _ = x1.shape
    emb = gmax.shape[-1]
    ncp = params["w9"].shape[1]  # padded class count (multiple of 128)
    kern = functools.partial(_head_kernel, emb=emb, neg_slope=neg_slope)
    return pl.pallas_call(
        kern,
        out_shape=jax.ShapeDtypeStruct((B, N, ncp), jnp.float32),
        grid_spec=pltpu.PrefetchScalarGridSpec(
            num_scalar_prefetch=0,
            grid=(B, N // tp),
            in_specs=[
                pl.BlockSpec((1, 1, emb), lambda b, i: (b, 0, 0)),       # gmax
                pl.BlockSpec((1, tp, 64), lambda b, i: (b, i, 0)),       # x1
                pl.BlockSpec((1, tp, 64), lambda b, i: (b, i, 0)),       # x2
                pl.BlockSpec((1, tp, 64), lambda b, i: (b, i, 0)),       # x3
                pl.BlockSpec((emb + 192, 512), lambda b, i: (0, 0)),     # w7
                pl.BlockSpec((1, 512), lambda b, i: (0, 0)),
                pl.BlockSpec((1, 512), lambda b, i: (0, 0)),
                pl.BlockSpec((512, 256), lambda b, i: (0, 0)),           # w8
                pl.BlockSpec((1, 256), lambda b, i: (0, 0)),
                pl.BlockSpec((1, 256), lambda b, i: (0, 0)),
                pl.BlockSpec((256, ncp), lambda b, i: (0, 0)),           # w9 (padded)
            ],
            out_specs=pl.BlockSpec((1, tp, ncp), lambda b, i: (b, i, 0)),
        ),
        compiler_params=_cparams("parallel", "parallel"),
    )(gmax, x1, x2, x3,
      params["w7"], params["bn7_scale"], params["bn7_bias"],
      params["w8"], params["bn8_scale"], params["bn8_bias"],
      params["w9"])


# ----------------------------------------------------------------------------
# JAX glue: knn gather, parameters, full forward
# ----------------------------------------------------------------------------
def gather_neighbors(feats, knn_feats, k, tn):
    """knn on knn_feats, then gather neighbor rows of feats: -> (B, k, N, C).

    The edge-feature concat [neighbor - center, center] is NOT materialized;
    the fused EdgeConv kernel consumes (neighbors, centers) directly.
    """
    kf = knn_feats
    if kf.shape[-1] < 8:  # pad tiny channel counts (e.g. xyz=3) for nicer tiling
        kf = jnp.pad(kf, ((0, 0), (0, 0), (0, 8 - kf.shape[-1])))
    dist = neg_sq_pairwise_dist(kf, tn)                    # (B, N, N) f32, Pallas
    idx = jax.lax.top_k(dist, k)[1]                        # (B, N, k) nearest (incl. self)
    idx_t = jnp.transpose(idx, (0, 2, 1))                  # (B, k, N) — tiny int transpose
    # TODO(synk): fuse this XLA gather into the EdgeConv Pallas kernel
    # (scalar-prefetched idx + manual make_async_copy row gathers) to avoid
    # materializing the (B, k, N, C) neighbor tensor in HBM.
    nbr = jax.vmap(lambda p, i: p[i])(feats, idx_t)        # (B, k, N, C)
    return nbr


def init_params(key, num_channel=9, emb_dims=1024, num_class=40):
    conv_specs = {
        "w1": (2 * num_channel, 64),
        "w2": (64, 64),
        "w3": (128, 64),
        "w4": (64, 64),
        "w5": (128, 64),
        "w6": (192, emb_dims),
        "w7": (emb_dims + 192, 512),   # module hardcodes 1216 = 1024 + 192
        "w8": (512, 256),
        "w9": (256, num_class),
    }
    params = {}
    keys = jax.random.split(key, len(conv_specs))
    for (name, shp), kk in zip(conv_specs.items(), keys):
        w = jax.random.normal(kk, shp, jnp.float32) * jnp.sqrt(2.0 / shp[0])
        params[name] = w.astype(jnp.bfloat16)              # bf16 weights for the MXU
    # Lane-dense classifier: pad num_class up to a multiple of 128 (sliced outside).
    ncp = ((num_class + 127) // 128) * 128
    params["w9"] = jnp.pad(params["w9"], ((0, 0), (0, ncp - num_class)))
    # BatchNorm folded into (scale, bias): eval mode with PyTorch defaults
    # gamma=1, beta=0, running_mean=0, running_var=1, eps=1e-5.
    eps = 1e-5
    for name, c in [
        ("bn1", 64), ("bn2", 64), ("bn3", 64), ("bn4", 64), ("bn5", 64),
        ("bn6", emb_dims), ("bn7", 512), ("bn8", 256),
    ]:
        gamma = jnp.ones((c,), jnp.float32)
        beta = jnp.zeros((c,), jnp.float32)
        mean = jnp.zeros((c,), jnp.float32)
        var = jnp.ones((c,), jnp.float32)
        scale = gamma * jax.lax.rsqrt(var + eps)
        params[name + "_scale"] = scale.reshape(1, c)
        params[name + "_bias"] = (beta - mean * scale).reshape(1, c)
    return params


def dgcnn_semseg_forward(x, params, *, k, num_class, pretrain=False):
    """x: (B, 9, N) float32 (PyTorch NCL). Returns (B, num_class, N)."""
    B, _, N = x.shape
    emb = params["w6"].shape[1]
    pts = jnp.transpose(x, (0, 2, 1)).astype(jnp.float32)   # (B, N, 9)
    pts_bf = pts.astype(jnp.bfloat16)
    tp = _row_tile(N)

    def layers(*idx):
        return [(params[f"w{i}"], params[f"bn{i}_scale"], params[f"bn{i}_bias"]) for i in idx]

    # EdgeConv block 1 (knn on channels 6:9, extra_dim=True): conv1 -> conv2 -> max_k
    nbr = gather_neighbors(pts_bf, pts[..., 6:], k, tp)      # (B, k, N, 9) bf16
    x1 = fused_edgeconv(nbr, pts_bf, layers(1, 2), tp)       # (B, N, 64) bf16

    # EdgeConv block 2: conv3 -> conv4 -> max_k
    nbr = gather_neighbors(x1, x1, k, tp)                    # (B, k, N, 64)
    x2 = fused_edgeconv(nbr, x1, layers(3, 4), tp)

    # EdgeConv block 3: conv5 -> max_k
    nbr = gather_neighbors(x2, x2, k, tp)
    x3 = fused_edgeconv(nbr, x2, layers(5), tp)

    if pretrain:
        gmax, feat = conv6_global_max(
            x1, x2, x3, params["w6"], params["bn6_scale"], params["bn6_bias"],
            tp, with_feat=True)
        return gmax.reshape(B, emb), jnp.transpose(feat, (0, 2, 1))

    # conv6 fused with global max over points (feat map never hits HBM here)
    gmax = conv6_global_max(
        x1, x2, x3, params["w6"], params["bn6_scale"], params["bn6_bias"], tp)

    # conv7 + conv8 + dropout(eval) + conv9 fused, concat-free, lane-dense output
    out = head_classifier(gmax, x1, x2, x3, params, tp)      # (B, N, ncp) f32
    out = out[:, :, :num_class]
    return jnp.transpose(out, (0, 2, 1))                     # (B, num_class, N)


# ----------------------------------------------------------------------------
if __name__ == "__main__":
    key = jax.random.PRNGKey(0)
    pkey, xkey = jax.random.split(key)

    B, C, N, K = 2, 9, 16, 4          # small point cloud: 2 clouds x 16 points, 9 channels
    emb_dims, num_class = 1024, 40    # emb_dims=1024 so that conv7 input = 1216

    params = init_params(pkey, num_channel=C, emb_dims=emb_dims, num_class=num_class)
    x = jax.random.normal(xkey, (B, C, N), jnp.float32)

    fwd = jax.jit(functools.partial(dgcnn_semseg_forward, k=K, num_class=num_class))
    out = fwd(x, params)
    jax.block_until_ready(out)

    assert out.shape == (B, num_class, N), out.shape
    assert out.dtype == jnp.float32
    print("KERNEL_OK")
</pallas_src>

<mosaic_0001>
module attributes {stable_mosaic.version = 11 : i64} {
  func.func @_neg_sq_dist_kernel(%arg0: i32, %arg1: i32, %arg2: memref<1x16x8xf32, #tpu.memory_space<vmem>>, %arg3: memref<1x16x8xf32, #tpu.memory_space<vmem>>, %arg4: memref<1x16x16xf32, #tpu.memory_space<vmem>>) attributes {dimension_semantics = [#tpu.dimension_semantics<parallel>, #tpu.dimension_semantics<parallel>], iteration_bounds = array<i64: 2, 1>, scalar_prefetch = 0 : i64, scratch_operands = 0 : i64, tpu.core_type = #tpu.core_type<tc>, window_params = [{transform_indices = @transform_0, window_bounds = array<i64: 1, 16, 8>}, {transform_indices = @transform_1, window_bounds = array<i64: 1, 16, 8>}, {transform_indices = @transform_2, window_bounds = array<i64: 1, 16, 16>}]} {
    %c0 = arith.constant 0 : index
    %c0_0 = arith.constant 0 : index
    %c0_1 = arith.constant 0 : index
    %0 = vector.load %arg2[%c0, %c0_0, %c0_1] : memref<1x16x8xf32, #tpu.memory_space<vmem>>, vector<1x16x8xf32>
    %1 = vector.shape_cast %0 : vector<1x16x8xf32> to vector<16x8xf32>
    %c0_2 = arith.constant 0 : index
    %c0_3 = arith.constant 0 : index
    %c0_4 = arith.constant 0 : index
    %2 = vector.load %arg3[%c0_2, %c0_3, %c0_4] : memref<1x16x8xf32, #tpu.memory_space<vmem>>, vector<1x16x8xf32>
    %3 = vector.shape_cast %2 : vector<1x16x8xf32> to vector<16x8xf32>
    %4 = arith.mulf %1, %1 : vector<16x8xf32>
    %cst = arith.constant dense<0.000000e+00> : vector<16xf32>
    %5 = vector.multi_reduction <add>, %4, %cst [1] : vector<16x8xf32> to vector<16xf32>
    %6 = vector.shape_cast %5 : vector<16xf32> to vector<16x1xf32>
    %7 = arith.mulf %3, %3 : vector<16x8xf32>
    %cst_5 = arith.constant dense<0.000000e+00> : vector<16xf32>
    %8 = vector.multi_reduction <add>, %7, %cst_5 [1] : vector<16x8xf32> to vector<16xf32>
    %9 = vector.shape_cast %8 : vector<16xf32> to vector<16x1xf32>
    %cst_6 = arith.constant dense<0.000000e+00> : vector<16x16xf32>
    %10 = tpu.matmul %1, %3, %cst_6 {dimension_numbers = #tpu.dot_dimension_numbers<[1], [1], [0], [0], [0, 0, 1, 0], [], []>} : vector<16x8xf32>, vector<16x8xf32>, vector<16x16xf32> -> vector<16x16xf32>
    %cst_7 = arith.constant 2.000000e+00 : f32
    %11 = vector.broadcast %cst_7 : f32 to vector<16x16xf32>
    %12 = arith.mulf %11, %10 : vector<16x16xf32>
    %13 = vector.broadcast %6 : vector<16x1xf32> to vector<16x16xf32>
    %14 = arith.subf %12, %13 : vector<16x16xf32>
    %15 = tpu.transpose %9, [1, 0] : vector<16x1xf32> -> vector<1x16xf32>
    %16 = vector.broadcast %15 : vector<1x16xf32> to vector<16x16xf32>
    %17 = arith.subf %14, %16 : vector<16x16xf32>
    %c0_8 = arith.constant 0 : index
    %c0_9 = arith.constant 0 : index
    %c0_10 = arith.constant 0 : index
    %18 = vector.load %arg4[%c0_8, %c0_9, %c0_10] : memref<1x16x16xf32, #tpu.memory_space<vmem>>, vector<1x16x16xf32>
    %19 = vector.shape_cast %18 : vector<1x16x16xf32> to vector<16x16xf32>
    %20 = vector.shape_cast %17 : vector<16x16xf32> to vector<1x16x16xf32>
    tpu.vector_store %arg4[%c0_8, %c0_9, %c0_10], %20 {strides = array<i32>} : memref<1x16x16xf32, #tpu.memory_space<vmem>>, vector<1x16x16xf32>,
    return
  }
  func.func @transform_0(%arg0: i32, %arg1: i32) -> (i32, i32, i32) {
    %c0_i32 = arith.constant 0 : i32
    %c0_i32_0 = arith.constant 0 : i32
    return %arg0, %arg1, %c0_i32 : i32, i32, i32
  }
  func.func @transform_1(%arg0: i32, %arg1: i32) -> (i32, i32, i32) {
    %c0_i32 = arith.constant 0 : i32
    %c0_i32_0 = arith.constant 0 : i32
    %c0_i32_1 = arith.constant 0 : i32
    return %arg0, %c0_i32, %c0_i32_0 : i32, i32, i32
  }
  func.func @transform_2(%arg0: i32, %arg1: i32) -> (i32, i32, i32) {
    %c0_i32 = arith.constant 0 : i32
    %c0_i32_0 = arith.constant 0 : i32
    return %arg0, %arg1, %c0_i32 : i32, i32, i32
  }
}

module attributes {stable_mosaic.version = 11 : i64} {
  func.func @_edgeconv_kernel(%arg0: i32, %arg1: i32, %arg2: memref<1x4x16x9xbf16, #tpu.memory_space<vmem>>, %arg3: memref<1x16x9xbf16, #tpu.memory_space<vmem>>, %arg4: memref<9x64xbf16, #tpu.memory_space<vmem>>, %arg5: memref<9x64xbf16, #tpu.memory_space<vmem>>, %arg6: memref<1x64xf32, #tpu.memory_space<vmem>>, %arg7: memref<1x64xf32, #tpu.memory_space<vmem>>, %arg8: memref<64x64xbf16, #tpu.memory_space<vmem>>, %arg9: memref<1x64xf32, #tpu.memory_space<vmem>>, %arg10: memref<1x64xf32, #tpu.memory_space<vmem>>, %arg11: memref<1x16x64xbf16, #tpu.memory_space<vmem>>) attributes {dimension_semantics = [#tpu.dimension_semantics<parallel>, #tpu.dimension_semantics<parallel>], iteration_bounds = array<i64: 2, 1>, scalar_prefetch = 0 : i64, scratch_operands = 0 : i64, tpu.core_type = #tpu.core_type<tc>, window_params = [{transform_indices = @transform_0, window_bounds = array<i64: 1, 4, 16, 9>}, {transform_indices = @transform_1, window_bounds = array<i64: 1, 16, 9>}, {pipeline_mode = #tpu.pipeline_mode<synchronous>, transform_indices = @transform_2, window_bounds = array<i64: 9, 64>}, {pipeline_mode = #tpu.pipeline_mode<synchronous>, transform_indices = @transform_3, window_bounds = array<i64: 9, 64>}, {pipeline_mode = #tpu.pipeline_mode<synchronous>, transform_indices = @transform_4, window_bounds = array<i64: 1, 64>}, {pipeline_mode = #tpu.pipeline_mode<synchronous>, transform_indices = @transform_5, window_bounds = array<i64: 1, 64>}, {pipeline_mode = #tpu.pipeline_mode<synchronous>, transform_indices = @transform_6, window_bounds = array<i64: 64, 64>}, {pipeline_mode = #tpu.pipeline_mode<synchronous>, transform_indices = @transform_7, window_bounds = array<i64: 1, 64>}, {pipeline_mode = #tpu.pipeline_mode<synchronous>, transform_indices = @transform_8, window_bounds = array<i64: 1, 64>}, {transform_indices = @transform_9, window_bounds = array<i64: 1, 16, 64>}]} {
    %c0 = arith.constant 0 : index
    %c0_0 = arith.constant 0 : index
    %0 = vector.load %arg4[%c0, %c0_0] : memref<9x64xbf16, #tpu.memory_space<vmem>>, vector<9x64xbf16>
    %c0_1 = arith.constant 0 : index
    %c0_2 = arith.constant 0 : index
    %1 = vector.load %arg6[%c0_1, %c0_2] : memref<1x64xf32, #tpu.memory_space<vmem>>, vector<1x64xf32>
    %c0_3 = arith.constant 0 : index
    %c0_4 = arith.constant 0 : index
    %2 = vector.load %arg7[%c0_3, %c0_4] : memref<1x64xf32, #tpu.memory_space<vmem>>, vector<1x64xf32>
    %c0_5 = arith.constant 0 : index
    %c0_6 = arith.constant 0 : index
    %c0_7 = arith.constant 0 : index
    %3 = vector.load %arg3[%c0_5, %c0_6, %c0_7] : memref<1x16x9xbf16, #tpu.memory_space<vmem>>, vector<1x16x9xbf16>
    %4 = vector.shape_cast %3 : vector<1x16x9xbf16> to vector<16x9xbf16>
    %c0_8 = arith.constant 0 : index
    %c0_9 = arith.constant 0 : index
    %5 = vector.load %arg5[%c0_8, %c0_9] : memref<9x64xbf16, #tpu.memory_space<vmem>>, vector<9x64xbf16>
    %cst = arith.constant dense<0.000000e+00> : vector<16x64xf32>
    %6 = tpu.matmul %4, %5, %cst {dimension_numbers = #tpu.dot_dimension_numbers<[1], [0], [0], [1], [0, 0, 1, 1], [], []>} : vector<16x9xbf16>, vector<9x64xbf16>, vector<16x64xf32> -> vector<16x64xf32>
    %7 = vector.broadcast %1 : vector<1x64xf32> to vector<16x64xf32>
    %8 = arith.mulf %6, %7 : vector<16x64xf32>
    %9 = vector.broadcast %2 : vector<1x64xf32> to vector<16x64xf32>
    %10 = arith.addf %8, %9 : vector<16x64xf32>
    %c0_10 = arith.constant 0 : index
    %c0_11 = arith.constant 0 : index
    %11 = vector.load %arg8[%c0_10, %c0_11] : memref<64x64xbf16, #tpu.memory_space<vmem>>, vector<64x64xbf16>
    %c0_12 = arith.constant 0 : index
    %c0_13 = arith.constant 0 : index
    %12 = vector.load %arg9[%c0_12, %c0_13] : memref<1x64xf32, #tpu.memory_space<vmem>>, vector<1x64xf32>
    %c0_14 = arith.constant 0 : index
    %c0_15 = arith.constant 0 : index
    %13 = vector.load %arg10[%c0_14, %c0_15] : memref<1x64xf32, #tpu.memory_space<vmem>>, vector<1x64xf32>
    %c0_16 = arith.constant 0 : index
    %c0_17 = arith.constant 0 : index
    %c0_18 = arith.constant 0 : index
    %c0_19 = arith.constant 0 : index
    %14 = vector.load %arg2[%c0_16, %c0_17, %c0_18, %c0_19] : memref<1x4x16x9xbf16, #tpu.memory_space<vmem>>, vector<1x1x16x9xbf16>
    %15 = vector.shape_cast %14 : vector<1x1x16x9xbf16> to vector<16x9xbf16>
    %cst_20 = arith.constant dense<0.000000e+00> : vector<16x64xf32>
    %16 = tpu.matmul %15, %0, %cst_20 {dimension_numbers = #tpu.dot_dimension_numbers<[1], [0], [0], [1], [0, 0, 1, 1], [], []>} : vector<16x9xbf16>, vector<9x64xbf16>, vector<16x64xf32> -> vector<16x64xf32>
    %17 = vector.broadcast %1 : vector<1x64xf32> to vector<16x64xf32>
    %18 = arith.mulf %16, %17 : vector<16x64xf32>
    %19 = arith.addf %18, %10 : vector<16x64xf32>
    %cst_21 = arith.constant 0.000000e+00 : f32
    %20 = vector.broadcast %cst_21 : f32 to vector<16x64xf32>
    %21 = arith.cmpf oge, %19, %20 : vector<16x64xf32>
    %cst_22 = arith.constant 2.000000e-01 : f32
    %22 = vector.broadcast %cst_22 : f32 to vector<16x64xf32>
    %23 = arith.mulf %22, %19 : vector<16x64xf32>
    %24 = arith.select %21, %19, %23 : vector<16x64xi1>, vector<16x64xf32>
    %25 = arith.truncf %24 : vector<16x64xf32> to vector<16x64xbf16>
    %cst_23 = arith.constant dense<0.000000e+00> : vector<16x64xf32>
    %26 = tpu.matmul %25, %11, %cst_23 {dimension_numbers = #tpu.dot_dimension_numbers<[1], [0], [0], [1], [0, 0, 1, 1], [], []>} : vector<16x64xbf16>, vector<64x64xbf16>, vector<16x64xf32> -> vector<16x64xf32>
    %27 = vector.broadcast %12 : vector<1x64xf32> to vector<16x64xf32>
    %28 = arith.mulf %26, %27 : vector<16x64xf32>
    %29 = vector.broadcast %13 : vector<1x64xf32> to vector<16x64xf32>
    %30 = arith.addf %28, %29 : vector<16x64xf32>
    %cst_24 = arith.constant 0.000000e+00 : f32
    %31 = vector.broadcast %cst_24 : f32 to vector<16x64xf32>
    %32 = arith.cmpf oge, %30, %31 : vector<16x64xf32>
    %cst_25 = arith.constant 2.000000e-01 : f32
    %33 = vector.broadcast %cst_25 : f32 to vector<16x64xf32>
    %34 = arith.mulf %33, %30 : vector<16x64xf32>
    %35 = arith.select %32, %30, %34 : vector<16x64xi1>, vector<16x64xf32>
    %c0_26 = arith.constant 0 : index
    %c1 = arith.constant 1 : index
    %c0_27 = arith.constant 0 : index
    %c0_28 = arith.constant 0 : index
    %36 = vector.load %arg2[%c0_26, %c1, %c0_27, %c0_28] : memref<1x4x16x9xbf16, #tpu.memory_space<vmem>>, vector<1x1x16x9xbf16>
    %37 = vector.shape_cast %36 : vector<1x1x16x9xbf16> to vector<16x9xbf16>
    %cst_29 = arith.constant dense<0.000000e+00> : vector<16x64xf32>
    %38 = tpu.matmul %37, %0, %cst_29 {dimension_numbers = #tpu.dot_dimension_numbers<[1], [0], [0], [1], [0, 0, 1, 1], [], []>} : vector<16x9xbf16>, vector<9x64xbf16>, vector<16x64xf32> -> vector<16x64xf32>
    %39 = vector.broadcast %1 : vector<1x64xf32> to vector<16x64xf32>
    %40 = arith.mulf %38, %39 : vector<16x64xf32>
    %41 = arith.addf %40, %10 : vector<16x64xf32>
    %cst_30 = arith.constant 0.000000e+00 : f32
    %42 = vector.broadcast %cst_30 : f32 to vector<16x64xf32>
    %43 = arith.cmpf oge, %41, %42 : vector<16x64xf32>
    %cst_31 = arith.constant 2.000000e-01 : f32
    %44 = vector.broadcast %cst_31 : f32 to vector<16x64xf32>
    %45 = arith.mulf %44, %41 : vector<16x64xf32>
    %46 = arith.select %43, %41, %45 : vector<16x64xi1>, vector<16x64xf32>
    %47 = arith.truncf %46 : vector<16x64xf32> to vector<16x64xbf16>
    %cst_32 = arith.constant dense<0.000000e+00> : vector<16x64xf32>
    %48 = tpu.matmul %47, %11, %cst_32 {dimension_numbers = #tpu.dot_dimension_numbers<[1], [0], [0], [1], [0, 0, 1, 1], [], []>} : vector<16x64xbf16>, vector<64x64xbf16>, vector<16x64xf32> -> vector<16x64xf32>
    %49 = vector.broadcast %12 : vector<1x64xf32> to vector<16x64xf32>
    %50 = arith.mulf %48, %49 : vector<16x64xf32>
    %51 = vector.broadcast %13 : vector<1x64xf32> to vector<16x64xf32>
    %52 = arith.addf %50, %51 : vector<16x64xf32>
    %cst_33 = arith.constant 0.000000e+00 : f32
    %53 = vector.broadcast %cst_33 : f32 to vector<16x64xf32>
    %54 = arith.cmpf oge, %52, %53 : vector<16x64xf32>
    %cst_34 = arith.constant 2.000000e-01 : f32
    %55 = vector.broadcast %cst_34 : f32 to vector<16x64xf32>
    %56 = arith.mulf %55, %52 : vector<16x64xf32>
    %57 = arith.select %54, %52, %56 : vector<16x64xi1>, vector<16x64xf32>
    %58 = arith.maximumf %35, %57 : vector<16x64xf32>
    %c0_35 = arith.constant 0 : index
    %c2 = arith.constant 2 : index
    %c0_36 = arith.constant 0 : index
    %c0_37 = arith.constant 0 : index
    %59 = vector.load %arg2[%c0_35, %c2, %c0_36, %c0_37] : memref<1x4x16x9xbf16, #tpu.memory_space<vmem>>, vector<1x1x16x9xbf16>
    %60 = vector.shape_cast %59 : vector<1x1x16x9xbf16> to vector<16x9xbf16>
    %cst_38 = arith.constant dense<0.000000e+00> : vector<16x64xf32>
    %61 = tpu.matmul %60, %0, %cst_38 {dimension_numbers = #tpu.dot_dimension_numbers<[1], [0], [0], [1], [0, 0, 1, 1], [], []>} : vector<16x9xbf16>, vector<9x64xbf16>, vector<16x64xf32> -> vector<16x64xf32>
    %62 = vector.broadcast %1 : vector<1x64xf32> to vector<16x64xf32>
    %63 = arith.mulf %61, %62 : vector<16x64xf32>
    %64 = arith.addf %63, %10 : vector<16x64xf32>
    %cst_39 = arith.constant 0.000000e+00 : f32
    %65 = vector.broadcast %cst_39 : f32 to vector<16x64xf32>
    %66 = arith.cmpf oge, %64, %65 : vector<16x64xf32>
    %cst_40 = arith.constant 2.000000e-01 : f32
    %67 = vector.broadcast %cst_40 : f32 to vector<16x64xf32>
    %68 = arith.mulf %67, %64 : vector<16x64xf32>
    %69 = arith.select %66, %64, %68 : vector<16x64xi1>, vector<16x64xf32>
    %70 = arith.truncf %69 : vector<16x64xf32> to vector<16x64xbf16>
    %cst_41 = arith.constant dense<0.000000e+00> : vector<16x64xf32>
    %71 = tpu.matmul %70, %11, %cst_41 {dimension_numbers = #tpu.dot_dimension_numbers<[1], [0], [0], [1], [0, 0, 1, 1], [], []>} : vector<16x64xbf16>, vector<64x64xbf16>, vector<16x64xf32> -> vector<16x64xf32>
    %72 = vector.broadcast %12 : vector<1x64xf32> to vector<16x64xf32>
    %73 = arith.mulf %71, %72 : vector<16x64xf32>
    %74 = vector.broadcast %13 : vector<1x64xf32> to vector<16x64xf32>
    %75 = arith.addf %73, %74 : vector<16x64xf32>
    %cst_42 = arith.constant 0.000000e+00 : f32
    %76 = vector.broadcast %cst_42 : f32 to vector<16x64xf32>
    %77 = arith.cmpf oge, %75, %76 : vector<16x64xf32>
    %cst_43 = arith.constant 2.000000e-01 : f32
    %78 = vector.broadcast %cst_43 : f32 to vector<16x64xf32>
    %79 = arith.mulf %78, %75 : vector<16x64xf32>
    %80 = arith.select %77, %75, %79 : vector<16x64xi1>, vector<16x64xf32>
    %81 = arith.maximumf %58, %80 : vector<16x64xf32>
    %c0_44 = arith.constant 0 : index
    %c3 = arith.constant 3 : index
    %c0_45 = arith.constant 0 : index
    %c0_46 = arith.constant 0 : index
    %82 = vector.load %arg2[%c0_44, %c3, %c0_45, %c0_46] : memref<1x4x16x9xbf16, #tpu.memory_space<vmem>>, vector<1x1x16x9xbf16>
    %83 = vector.shape_cast %82 : vector<1x1x16x9xbf16> to vector<16x9xbf16>
    %cst_47 = arith.constant dense<0.000000e+00> : vector<16x64xf32>
    %84 = tpu.matmul %83, %0, %cst_47 {dimension_numbers = #tpu.dot_dimension_numbers<[1], [0], [0], [1], [0, 0, 1, 1], [], []>} : vector<16x9xbf16>, vector<9x64xbf16>, vector<16x64xf32> -> vector<16x64xf32>
    %85 = vector.broadcast %1 : vector<1x64xf32> to vector<16x64xf32>
    %86 = arith.mulf %84, %85 : vector<16x64xf32>
    %87 = arith.addf %86, %10 : vector<16x64xf32>
    %cst_48 = arith.constant 0.000000e+00 : f32
    %88 = vector.broadcast %cst_48 : f32 to vector<16x64xf32>
    %89 = arith.cmpf oge, %87, %88 : vector<16x64xf32>
    %cst_49 = arith.constant 2.000000e-01 : f32
    %90 = vector.broadcast %cst_49 : f32 to vector<16x64xf32>
    %91 = arith.mulf %90, %87 : vector<16x64xf32>
    %92 = arith.select %89, %87, %91 : vector<16x64xi1>, vector<16x64xf32>
    %93 = arith.truncf %92 : vector<16x64xf32> to vector<16x64xbf16>
    %cst_50 = arith.constant dense<0.000000e+00> : vector<16x64xf32>
    %94 = tpu.matmul %93, %11, %cst_50 {dimension_numbers = #tpu.dot_dimension_numbers<[1], [0], [0], [1], [0, 0, 1, 1], [], []>} : vector<16x64xbf16>, vector<64x64xbf16>, vector<16x64xf32> -> vector<16x64xf32>
    %95 = vector.broadcast %12 : vector<1x64xf32> to vector<16x64xf32>
    %96 = arith.mulf %94, %95 : vector<16x64xf32>
    %97 = vector.broadcast %13 : vector<1x64xf32> to vector<16x64xf32>
    %98 = arith.addf %96, %97 : vector<16x64xf32>
    %cst_51 = arith.constant 0.000000e+00 : f32
    %99 = vector.broadcast %cst_51 : f32 to vector<16x64xf32>
    %100 = arith.cmpf oge, %98, %99 : vector<16x64xf32>
    %cst_52 = arith.constant 2.000000e-01 : f32
    %101 = vector.broadcast %cst_52 : f32 to vector<16x64xf32>
    %102 = arith.mulf %101, %98 : vector<16x64xf32>
    %103 = arith.select %100, %98, %102 : vector<16x64xi1>, vector<16x64xf32>
    %104 = arith.maximumf %81, %103 : vector<16x64xf32>
    %105 = arith.truncf %104 : vector<16x64xf32> to vector<16x64xbf16>
    %c0_53 = arith.constant 0 : index
    %c0_54 = arith.constant 0 : index
    %c0_55 = arith.constant 0 : index
    %106 = vector.load %arg11[%c0_53, %c0_54, %c0_55] : memref<1x16x64xbf16, #tpu.memory_space<vmem>>, vector<1x16x64xbf16>
    %107 = vector.shape_cast %106 : vector<1x16x64xbf16> to vector<16x64xbf16>
    %108 = vector.shape_cast %105 : vector<16x64xbf16> to vector<1x16x64xbf16>
    tpu.vector_store %arg11[%c0_53, %c0_54, %c0_55], %108 {strides = array<i32>} : memref<1x16x64xbf16, #tpu.memory_space<vmem>>, vector<1x16x64xbf16>,
    return
  }
  func.func @transform_0(%arg0: i32, %arg1: i32) -> (i32, i32, i32, i32) {
    %c0_i32 = arith.constant 0 : i32
    %c0_i32_0 = arith.constant 0 : i32
    %c0_i32_1 = arith.constant 0 : i32
    return %arg0, %c0_i32, %arg1, %c0_i32_0 : i32, i32, i32, i32
  }
  func.func @transform_1(%arg0: i32, %arg1: i32) -> (i32, i32, i32) {
    %c0_i32 = arith.constant 0 : i32
    %c0_i32_0 = arith.constant 0 : i32
    return %arg0, %arg1, %c0_i32 : i32, i32, i32
  }
  func.func @transform_2(%arg0: i32, %arg1: i32) -> (i32, i32) {
    %c0_i32 = arith.constant 0 : i32
    %c0_i32_0 = arith.constant 0 : i32
    %c0_i32_1 = arith.constant 0 : i32
    return %c0_i32, %c0_i32_0 : i32, i32
  }
  func.func @transform_3(%arg0: i32, %arg1: i32) -> (i32, i32) {
    %c0_i32 = arith.constant 0 : i32
    %c0_i32_0 = arith.constant 0 : i32
    %c0_i32_1 = arith.constant 0 : i32
    return %c0_i32, %c0_i32_0 : i32, i32
  }
  func.func @transform_4(%arg0: i32, %arg1: i32) -> (i32, i32) {
    %c0_i32 = arith.constant 0 : i32
    %c0_i32_0 = arith.constant 0 : i32
    %c0_i32_1 = arith.constant 0 : i32
    return %c0_i32, %c0_i32_0 : i32, i32
  }
  func.func @transform_5(%arg0: i32, %arg1: i32) -> (i32, i32) {
    %c0_i32 = arith.constant 0 : i32
    %c0_i32_0 = arith.constant 0 : i32
    %c0_i32_1 = arith.constant 0 : i32
    return %c0_i32, %c0_i32_0 : i32, i32
  }
  func.func @transform_6(%arg0: i32, %arg1: i32) -> (i32, i32) {
    %c0_i32 = arith.constant 0 : i32
    %c0_i32_0 = arith.constant 0 : i32
    %c0_i32_1 = arith.constant 0 : i32
    return %c0_i32, %c0_i32_0 : i32, i32
  }
  func.func @transform_7(%arg0: i32, %arg1: i32) -> (i32, i32) {
    %c0_i32 = arith.constant 0 : i32
    %c0_i32_0 = arith.constant 0 : i32
    %c0_i32_1 = arith.constant 0 : i32
    return %c0_i32, %c0_i32_0 : i32, i32
  }
  func.func @transform_8(%arg0: i32, %arg1: i32) -> (i32, i32) {
    %c0_i32 = arith.constant 0 : i32
    %c0_i32_0 = arith.constant 0 : i32
    %c0_i32_1 = arith.constant 0 : i32
    return %c0_i32, %c0_i32_0 : i32, i32
  }
  func.func @transform_9(%arg0: i32, %arg1: i32) -> (i32, i32, i32) {
    %c0_i32 = arith.constant 0 : i32
    %c0_i32_0 = arith.constant 0 : i32
    return %arg0, %arg1, %c0_i32 : i32, i32, i32
  }
}

module attributes {stable_mosaic.version = 11 : i64} {
  func.func @_neg_sq_dist_kernel(%arg0: i32, %arg1: i32, %arg2: memref<1x16x64xbf16, #tpu.memory_space<vmem>>, %arg3: memref<1x16x64xbf16, #tpu.memory_space<vmem>>, %arg4: memref<1x16x16xf32, #tpu.memory_space<vmem>>) attributes {dimension_semantics = [#tpu.dimension_semantics<parallel>, #tpu.dimension_semantics<parallel>], iteration_bounds = array<i64: 2, 1>, scalar_prefetch = 0 : i64, scratch_operands = 0 : i64, tpu.core_type = #tpu.core_type<tc>, window_params = [{transform_indices = @transform_0, window_bounds = array<i64: 1, 16, 64>}, {transform_indices = @transform_1, window_bounds = array<i64: 1, 16, 64>}, {transform_indices = @transform_2, window_bounds = array<i64: 1, 16, 16>}]} {
    %c0 = arith.constant 0 : index
    %c0_0 = arith.constant 0 : index
    %c0_1 = arith.constant 0 : index
    %0 = vector.load %arg2[%c0, %c0_0, %c0_1] : memref<1x16x64xbf16, #tpu.memory_space<vmem>>, vector<1x16x64xbf16>
    %1 = vector.shape_cast %0 : vector<1x16x64xbf16> to vector<16x64xbf16>
    %2 = arith.extf %1 : vector<16x64xbf16> to vector<16x64xf32>
    %c0_2 = arith.constant 0 : index
    %c0_3 = arith.constant 0 : index
    %c0_4 = arith.constant 0 : index
    %3 = vector.load %arg3[%c0_2, %c0_3, %c0_4] : memref<1x16x64xbf16, #tpu.memory_space<vmem>>, vector<1x16x64xbf16>
    %4 = vector.shape_cast %3 : vector<1x16x64xbf16> to vector<16x64xbf16>
    %5 = arith.extf %4 : vector<16x64xbf16> to vector<16x64xf32>
    %6 = arith.mulf %2, %2 : vector<16x64xf32>
    %cst = arith.constant dense<0.000000e+00> : vector<16xf32>
    %7 = vector.multi_reduction <add>, %6, %cst [1] : vector<16x64xf32> to vector<16xf32>
    %8 = vector.shape_cast %7 : vector<16xf32> to vector<16x1xf32>
    %9 = arith.mulf %5, %5 : vector<16x64xf32>
    %cst_5 = arith.constant dense<0.000000e+00> : vector<16xf32>
    %10 = vector.multi_reduction <add>, %9, %cst_5 [1] : vector<16x64xf32> to vector<16xf32>
    %11 = vector.shape_cast %10 : vector<16xf32> to vector<16x1xf32>
    %cst_6 = arith.constant dense<0.000000e+00> : vector<16x16xf32>
    %12 = tpu.matmul %2, %5, %cst_6 {dimension_numbers = #tpu.dot_dimension_numbers<[1], [1], [0], [0], [0, 0, 1, 0], [], []>} : vector<16x64xf32>, vector<16x64xf32>, vector<16x16xf32> -> vector<16x16xf32>
    %cst_7 = arith.constant 2.000000e+00 : f32
    %13 = vector.broadcast %cst_7 : f32 to vector<16x16xf32>
    %14 = arith.mulf %13, %12 : vector<16x16xf32>
    %15 = vector.broadcast %8 : vector<16x1xf32> to vector<16x16xf32>
    %16 = arith.subf %14, %15 : vector<16x16xf32>
    %17 = tpu.transpose %11, [1, 0] : vector<16x1xf32> -> vector<1x16xf32>
    %18 = vector.broadcast %17 : vector<1x16xf32> to vector<16x16xf32>
    %19 = arith.subf %16, %18 : vector<16x16xf32>
    %c0_8 = arith.constant 0 : index
    %c0_9 = arith.constant 0 : index
    %c0_10 = arith.constant 0 : index
    %20 = vector.load %arg4[%c0_8, %c0_9, %c0_10] : memref<1x16x16xf32, #tpu.memory_space<vmem>>, vector<1x16x16xf32>
    %21 = vector.shape_cast %20 : vector<1x16x16xf32> to vector<16x16xf32>
    %22 = vector.shape_cast %19 : vector<16x16xf32> to vector<1x16x16xf32>
    tpu.vector_store %arg4[%c0_8, %c0_9, %c0_10], %22 {strides = array<i32>} : memref<1x16x16xf32, #tpu.memory_space<vmem>>, vector<1x16x16xf32>,
    return
  }
  func.func @transform_0(%arg0: i32, %arg1: i32) -> (i32, i32, i32) {
    %c0_i32 = arith.constant 0 : i32
    %c0_i32_0 = arith.constant 0 : i32
    return %arg0, %arg1, %c0_i32 : i32, i32, i32
  }
  func.func @transform_1(%arg0: i32, %arg1: i32) -> (i32, i32, i32) {
    %c0_i32 = arith.constant 0 : i32
    %c0_i32_0 = arith.constant 0 : i32
    %c0_i32_1 = arith.constant 0 : i32
    return %arg0, %c0_i32, %c0_i32_0 : i32, i32, i32
  }
  func.func @transform_2(%arg0: i32, %arg1: i32) -> (i32, i32, i32) {
    %c0_i32 = arith.constant 0 : i32
    %c0_i32_0 = arith.constant 0 : i32
    return %arg0, %arg1, %c0_i32 : i32, i32, i32
  }
}

module attributes {stable_mosaic.version = 11 : i64} {
  func.func @_edgeconv_kernel(%arg0: i32, %arg1: i32, %arg2: memref<1x4x16x64xbf16, #tpu.memory_space<vmem>>, %arg3: memref<1x16x64xbf16, #tpu.memory_space<vmem>>, %arg4: memref<64x64xbf16, #tpu.memory_space<vmem>>, %arg5: memref<64x64xbf16, #tpu.memory_space<vmem>>, %arg6: memref<1x64xf32, #tpu.memory_space<vmem>>, %arg7: memref<1x64xf32, #tpu.memory_space<vmem>>, %arg8: memref<64x64xbf16, #tpu.memory_space<vmem>>, %arg9: memref<1x64xf32, #tpu.memory_space<vmem>>, %arg10: memref<1x64xf32, #tpu.memory_space<vmem>>, %arg11: memref<1x16x64xbf16, #tpu.memory_space<vmem>>) attributes {dimension_semantics = [#tpu.dimension_semantics<parallel>, #tpu.dimension_semantics<parallel>], iteration_bounds = array<i64: 2, 1>, scalar_prefetch = 0 : i64, scratch_operands = 0 : i64, tpu.core_type = #tpu.core_type<tc>, window_params = [{transform_indices = @transform_0, window_bounds = array<i64: 1, 4, 16, 64>}, {transform_indices = @transform_1, window_bounds = array<i64: 1, 16, 64>}, {pipeline_mode = #tpu.pipeline_mode<synchronous>, transform_indices = @transform_2, window_bounds = array<i64: 64, 64>}, {pipeline_mode = #tpu.pipeline_mode<synchronous>, transform_indices = @transform_3, window_bounds = array<i64: 64, 64>}, {pipeline_mode = #tpu.pipeline_mode<synchronous>, transform_indices = @transform_4, window_bounds = array<i64: 1, 64>}, {pipeline_mode = #tpu.pipeline_mode<synchronous>, transform_indices = @transform_5, window_bounds = array<i64: 1, 64>}, {pipeline_mode = #tpu.pipeline_mode<synchronous>, transform_indices = @transform_6, window_bounds = array<i64: 64, 64>}, {pipeline_mode = #tpu.pipeline_mode<synchronous>, transform_indices = @transform_7, window_bounds = array<i64: 1, 64>}, {pipeline_mode = #tpu.pipeline_mode<synchronous>, transform_indices = @transform_8, window_bounds = array<i64: 1, 64>}, {transform_indices = @transform_9, window_bounds = array<i64: 1, 16, 64>}]} {
    %c0 = arith.constant 0 : index
    %c0_0 = arith.constant 0 : index
    %0 = vector.load %arg4[%c0, %c0_0] : memref<64x64xbf16, #tpu.memory_space<vmem>>, vector<64x64xbf16>
    %c0_1 = arith.constant 0 : index
    %c0_2 = arith.constant 0 : index
    %1 = vector.load %arg6[%c0_1, %c0_2] : memref<1x64xf32, #tpu.memory_space<vmem>>, vector<1x64xf32>
    %c0_3 = arith.constant 0 : index
    %c0_4 = arith.constant 0 : index
    %2 = vector.load %arg7[%c0_3, %c0_4] : memref<1x64xf32, #tpu.memory_space<vmem>>, vector<1x64xf32>
    %c0_5 = arith.constant 0 : index
    %c0_6 = arith.constant 0 : index
    %c0_7 = arith.constant 0 : index
    %3 = vector.load %arg3[%c0_5, %c0_6, %c0_7] : memref<1x16x64xbf16, #tpu.memory_space<vmem>>, vector<1x16x64xbf16>
    %4 = vector.shape_cast %3 : vector<1x16x64xbf16> to vector<16x64xbf16>
    %c0_8 = arith.constant 0 : index
    %c0_9 = arith.constant 0 : index
    %5 = vector.load %arg5[%c0_8, %c0_9] : memref<64x64xbf16, #tpu.memory_space<vmem>>, vector<64x64xbf16>
    %cst = arith.constant dense<0.000000e+00> : vector<16x64xf32>
    %6 = tpu.matmul %4, %5, %cst {dimension_numbers = #tpu.dot_dimension_numbers<[1], [0], [0], [1], [0, 0, 1, 1], [], []>} : vector<16x64xbf16>, vector<64x64xbf16>, vector<16x64xf32> -> vector<16x64xf32>
    %7 = vector.broadcast %1 : vector<1x64xf32> to vector<16x64xf32>
    %8 = arith.mulf %6, %7 : vector<16x64xf32>
    %9 = vector.broadcast %2 : vector<1x64xf32> to vector<16x64xf32>
    %10 = arith.addf %8, %9 : vector<16x64xf32>
    %c0_10 = arith.constant 0 : index
    %c0_11 = arith.constant 0 : index
    %11 = vector.load %arg8[%c0_10, %c0_11] : memref<64x64xbf16, #tpu.memory_space<vmem>>, vector<64x64xbf16>
    %c0_12 = arith.constant 0 : index
    %c0_13 = arith.constant 0 : index
    %12 = vector.load %arg9[%c0_12, %c0_13] : memref<1x64xf32, #tpu.memory_space<vmem>>, vector<1x64xf32>
    %c0_14 = arith.constant 0 : index
    %c0_15 = arith.constant 0 : index
    %13 = vector.load %arg10[%c0_14, %c0_15] : memref<1x64xf32, #tpu.memory_space<vmem>>, vector<1x64xf32>
    %c0_16 = arith.constant 0 : index
    %c0_17 = arith.constant 0 : index
    %c0_18 = arith.constant 0 : index
    %c0_19 = arith.constant 0 : index
    %14 = vector.load %arg2[%c0_16, %c0_17, %c0_18, %c0_19] : memref<1x4x16x64xbf16, #tpu.memory_space<vmem>>, vector<1x1x16x64xbf16>
    %15 = vector.shape_cast %14 : vector<1x1x16x64xbf16> to vector<16x64xbf16>
    %cst_20 = arith.constant dense<0.000000e+00> : vector<16x64xf32>
    %16 = tpu.matmul %15, %0, %cst_20 {dimension_numbers = #tpu.dot_dimension_numbers<[1], [0], [0], [1], [0, 0, 1, 1], [], []>} : vector<16x64xbf16>, vector<64x64xbf16>, vector<16x64xf32> -> vector<16x64xf32>
    %17 = vector.broadcast %1 : vector<1x64xf32> to vector<16x64xf32>
    %18 = arith.mulf %16, %17 : vector<16x64xf32>
    %19 = arith.addf %18, %10 : vector<16x64xf32>
    %cst_21 = arith.constant 0.000000e+00 : f32
    %20 = vector.broadcast %cst_21 : f32 to vector<16x64xf32>
    %21 = arith.cmpf oge, %19, %20 : vector<16x64xf32>
    %cst_22 = arith.constant 2.000000e-01 : f32
    %22 = vector.broadcast %cst_22 : f32 to vector<16x64xf32>
    %23 = arith.mulf %22, %19 : vector<16x64xf32>
    %24 = arith.select %21, %19, %23 : vector<16x64xi1>, vector<16x64xf32>
    %25 = arith.truncf %24 : vector<16x64xf32> to vector<16x64xbf16>
    %cst_23 = arith.constant dense<0.000000e+00> : vector<16x64xf32>
    %26 = tpu.matmul %25, %11, %cst_23 {dimension_numbers = #tpu.dot_dimension_numbers<[1], [0], [0], [1], [0, 0, 1, 1], [], []>} : vector<16x64xbf16>, vector<64x64xbf16>, vector<16x64xf32> -> vector<16x64xf32>
    %27 = vector.broadcast %12 : vector<1x64xf32> to vector<16x64xf32>
    %28 = arith.mulf %26, %27 : vector<16x64xf32>
    %29 = vector.broadcast %13 : vector<1x64xf32> to vector<16x64xf32>
    %30 = arith.addf %28, %29 : vector<16x64xf32>
    %cst_24 = arith.constant 0.000000e+00 : f32
    %31 = vector.broadcast %cst_24 : f32 to vector<16x64xf32>
    %32 = arith.cmpf oge, %30, %31 : vector<16x64xf32>
    %cst_25 = arith.constant 2.000000e-01 : f32
    %33 = vector.broadcast %cst_25 : f32 to vector<16x64xf32>
    %34 = arith.mulf %33, %30 : vector<16x64xf32>
    %35 = arith.select %32, %30, %34 : vector<16x64xi1>, vector<16x64xf32>
    %c0_26 = arith.constant 0 : index
    %c1 = arith.constant 1 : index
    %c0_27 = arith.constant 0 : index
    %c0_28 = arith.constant 0 : index
    %36 = vector.load %arg2[%c0_26, %c1, %c0_27, %c0_28] : memref<1x4x16x64xbf16, #tpu.memory_space<vmem>>, vector<1x1x16x64xbf16>
    %37 = vector.shape_cast %36 : vector<1x1x16x64xbf16> to vector<16x64xbf16>
    %cst_29 = arith.constant dense<0.000000e+00> : vector<16x64xf32>
    %38 = tpu.matmul %37, %0, %cst_29 {dimension_numbers = #tpu.dot_dimension_numbers<[1], [0], [0], [1], [0, 0, 1, 1], [], []>} : vector<16x64xbf16>, vector<64x64xbf16>, vector<16x64xf32> -> vector<16x64xf32>
    %39 = vector.broadcast %1 : vector<1x64xf32> to vector<16x64xf32>
    %40 = arith.mulf %38, %39 : vector<16x64xf32>
    %41 = arith.addf %40, %10 : vector<16x64xf32>
    %cst_30 = arith.constant 0.000000e+00 : f32
    %42 = vector.broadcast %cst_30 : f32 to vector<16x64xf32>
    %43 = arith.cmpf oge, %41, %42 : vector<16x64xf32>
    %cst_31 = arith.constant 2.000000e-01 : f32
    %44 = vector.broadcast %cst_31 : f32 to vector<16x64xf32>
    %45 = arith.mulf %44, %41 : vector<16x64xf32>
    %46 = arith.select %43, %41, %45 : vector<16x64xi1>, vector<16x64xf32>
    %47 = arith.truncf %46 : vector<16x64xf32> to vector<16x64xbf16>
    %cst_32 = arith.constant dense<0.000000e+00> : vector<16x64xf32>
    %48 = tpu.matmul %47, %11, %cst_32 {dimension_numbers = #tpu.dot_dimension_numbers<[1], [0], [0], [1], [0, 0, 1, 1], [], []>} : vector<16x64xbf16>, vector<64x64xbf16>, vector<16x64xf32> -> vector<16x64xf32>
    %49 = vector.broadcast %12 : vector<1x64xf32> to vector<16x64xf32>
    %50 = arith.mulf %48, %49 : vector<16x64xf32>
    %51 = vector.broadcast %13 : vector<1x64xf32> to vector<16x64xf32>
    %52 = arith.addf %50, %51 : vector<16x64xf32>
    %cst_33 = arith.constant 0.000000e+00 : f32
    %53 = vector.broadcast %cst_33 : f32 to vector<16x64xf32>
    %54 = arith.cmpf oge, %52, %53 : vector<16x64xf32>
    %cst_34 = arith.constant 2.000000e-01 : f32
    %55 = vector.broadcast %cst_34 : f32 to vector<16x64xf32>
    %56 = arith.mulf %55, %52 : vector<16x64xf32>
    %57 = arith.select %54, %52, %56 : vector<16x64xi1>, vector<16x64xf32>
    %58 = arith.maximumf %35, %57 : vector<16x64xf32>
    %c0_35 = arith.constant 0 : index
    %c2 = arith.constant 2 : index
    %c0_36 = arith.constant 0 : index
    %c0_37 = arith.constant 0 : index
    %59 = vector.load %arg2[%c0_35, %c2, %c0_36, %c0_37] : memref<1x4x16x64xbf16, #tpu.memory_space<vmem>>, vector<1x1x16x64xbf16>
    %60 = vector.shape_cast %59 : vector<1x1x16x64xbf16> to vector<16x64xbf16>
    %cst_38 = arith.constant dense<0.000000e+00> : vector<16x64xf32>
    %61 = tpu.matmul %60, %0, %cst_38 {dimension_numbers = #tpu.dot_dimension_numbers<[1], [0], [0], [1], [0, 0, 1, 1], [], []>} : vector<16x64xbf16>, vector<64x64xbf16>, vector<16x64xf32> -> vector<16x64xf32>
    %62 = vector.broadcast %1 : vector<1x64xf32> to vector<16x64xf32>
    %63 = arith.mulf %61, %62 : vector<16x64xf32>
    %64 = arith.addf %63, %10 : vector<16x64xf32>
    %cst_39 = arith.constant 0.000000e+00 : f32
    %65 = vector.broadcast %cst_39 : f32 to vector<16x64xf32>
    %66 = arith.cmpf oge, %64, %65 : vector<16x64xf32>
    %cst_40 = arith.constant 2.000000e-01 : f32
    %67 = vector.broadcast %cst_40 : f32 to vector<16x64xf32>
    %68 = arith.mulf %67, %64 : vector<16x64xf32>
    %69 = arith.select %66, %64, %68 : vector<16x64xi1>, vector<16x64xf32>
    %70 = arith.truncf %69 : vector<16x64xf32> to vector<16x64xbf16>
    %cst_41 = arith.constant dense<0.000000e+00> : vector<16x64xf32>
    %71 = tpu.matmul %70, %11, %cst_41 {dimension_numbers = #tpu.dot_dimension_numbers<[1], [0], [0], [1], [0, 0, 1, 1], [], []>} : vector<16x64xbf16>, vector<64x64xbf16>, vector<16x64xf32> -> vector<16x64xf32>
    %72 = vector.broadcast %12 : vector<1x64xf32> to vector<16x64xf32>
    %73 = arith.mulf %71, %72 : vector<16x64xf32>
    %74 = vector.broadcast %13 : vector<1x64xf32> to vector<16x64xf32>
    %75 = arith.addf %73, %74 : vector<16x64xf32>
    %cst_42 = arith.constant 0.000000e+00 : f32
    %76 = vector.broadcast %cst_42 : f32 to vector<16x64xf32>
    %77 = arith.cmpf oge, %75, %76 : vector<16x64xf32>
    %cst_43 = arith.constant 2.000000e-01 : f32
    %78 = vector.broadcast %cst_43 : f32 to vector<16x64xf32>
    %79 = arith.mulf %78, %75 : vector<16x64xf32>
    %80 = arith.select %77, %75, %79 : vector<16x64xi1>, vector<16x64xf32>
    %81 = arith.maximumf %58, %80 : vector<16x64xf32>
    %c0_44 = arith.constant 0 : index
    %c3 = arith.constant 3 : index
    %c0_45 = arith.constant 0 : index
    %c0_46 = arith.constant 0 : index
    %82 = vector.load %arg2[%c0_44, %c3, %c0_45, %c0_46] : memref<1x4x16x64xbf16, #tpu.memory_space<vmem>>, vector<1x1x16x64xbf16>
    %83 = vector.shape_cast %82 : vector<1x1x16x64xbf16> to vector<16x64xbf16>
    %cst_47 = arith.constant dense<0.000000e+00> : vector<16x64xf32>
    %84 = tpu.matmul %83, %0, %cst_47 {dimension_numbers = #tpu.dot_dimension_numbers<[1], [0], [0], [1], [0, 0, 1, 1], [], []>} : vector<16x64xbf16>, vector<64x64xbf16>, vector<16x64xf32> -> vector<16x64xf32>
    %85 = vector.broadcast %1 : vector<1x64xf32> to vector<16x64xf32>
    %86 = arith.mulf %84, %85 : vector<16x64xf32>
    %87 = arith.addf %86, %10 : vector<16x64xf32>
    %cst_48 = arith.constant 0.000000e+00 : f32
    %88 = vector.broadcast %cst_48 : f32 to vector<16x64xf32>
    %89 = arith.cmpf oge, %87, %88 : vector<16x64xf32>
    %cst_49 = arith.constant 2.000000e-01 : f32
    %90 = vector.broadcast %cst_49 : f32 to vector<16x64xf32>
    %91 = arith.mulf %90, %87 : vector<16x64xf32>
    %92 = arith.select %89, %87, %91 : vector<16x64xi1>, vector<16x64xf32>
    %93 = arith.truncf %92 : vector<16x64xf32> to vector<16x64xbf16>
    %cst_50 = arith.constant dense<0.000000e+00> : vector<16x64xf32>
    %94 = tpu.matmul %93, %11, %cst_50 {dimension_numbers = #tpu.dot_dimension_numbers<[1], [0], [0], [1], [0, 0, 1, 1], [], []>} : vector<16x64xbf16>, vector<64x64xbf16>, vector<16x64xf32> -> vector<16x64xf32>
    %95 = vector.broadcast %12 : vector<1x64xf32> to vector<16x64xf32>
    %96 = arith.mulf %94, %95 : vector<16x64xf32>
    %97 = vector.broadcast %13 : vector<1x64xf32> to vector<16x64xf32>
    %98 = arith.addf %96, %97 : vector<16x64xf32>
    %cst_51 = arith.constant 0.000000e+00 : f32
    %99 = vector.broadcast %cst_51 : f32 to vector<16x64xf32>
    %100 = arith.cmpf oge, %98, %99 : vector<16x64xf32>
    %cst_52 = arith.constant 2.000000e-01 : f32
    %101 = vector.broadcast %cst_52 : f32 to vector<16x64xf32>
    %102 = arith.mulf %101, %98 : vector<16x64xf32>
    %103 = arith.select %100, %98, %102 : vector<16x64xi1>, vector<16x64xf32>
    %104 = arith.maximumf %81, %103 : vector<16x64xf32>
    %105 = arith.truncf %104 : vector<16x64xf32> to vector<16x64xbf16>
    %c0_53 = arith.constant 0 : index
    %c0_54 = arith.constant 0 : index
    %c0_55 = arith.constant 0 : index
    %106 = vector.load %arg11[%c0_53, %c0_54, %c0_55] : memref<1x16x64xbf16, #tpu.memory_space<vmem>>, vector<1x16x64xbf16>
    %107 = vector.shape_cast %106 : vector<1x16x64xbf16> to vector<16x64xbf16>
    %108 = vector.shape_cast %105 : vector<16x64xbf16> to vector<1x16x64xbf16>
    tpu.vector_store %arg11[%c0_53, %c0_54, %c0_55], %108 {strides = array<i32>} : memref<1x16x64xbf16, #tpu.memory_space<vmem>>, vector<1x16x64xbf16>,
    return
  }
  func.func @transform_0(%arg0: i32, %arg1: i32) -> (i32, i32, i32, i32) {
    %c0_i32 = arith.constant 0 : i32
    %c0_i32_0 = arith.constant 0 : i32
    %c0_i32_1 = arith.constant 0 : i32
    return %arg0, %c0_i32, %arg1, %c0_i32_0 : i32, i32, i32, i32
  }
  func.func @transform_1(%arg0: i32, %arg1: i32) -> (i32, i32, i32) {
    %c0_i32 = arith.constant 0 : i32
    %c0_i32_0 = arith.constant 0 : i32
    return %arg0, %arg1, %c0_i32 : i32, i32, i32
  }
  func.func @transform_2(%arg0: i32, %arg1: i32) -> (i32, i32) {
    %c0_i32 = arith.constant 0 : i32
    %c0_i32_0 = arith.constant 0 : i32
    %c0_i32_1 = arith.constant 0 : i32
    return %c0_i32, %c0_i32_0 : i32, i32
  }
  func.func @transform_3(%arg0: i32, %arg1: i32) -> (i32, i32) {
    %c0_i32 = arith.constant 0 : i32
    %c0_i32_0 = arith.constant 0 : i32
    %c0_i32_1 = arith.constant 0 : i32
    return %c0_i32, %c0_i32_0 : i32, i32
  }
  func.func @transform_4(%arg0: i32, %arg1: i32) -> (i32, i32) {
    %c0_i32 = arith.constant 0 : i32
    %c0_i32_0 = arith.constant 0 : i32
    %c0_i32_1 = arith.constant 0 : i32
    return %c0_i32, %c0_i32_0 : i32, i32
  }
  func.func @transform_5(%arg0: i32, %arg1: i32) -> (i32, i32) {
    %c0_i32 = arith.constant 0 : i32
    %c0_i32_0 = arith.constant 0 : i32
    %c0_i32_1 = arith.constant 0 : i32
    return %c0_i32, %c0_i32_0 : i32, i32
  }
  func.func @transform_6(%arg0: i32, %arg1: i32) -> (i32, i32) {
    %c0_i32 = arith.constant 0 : i32
    %c0_i32_0 = arith.constant 0 : i32
    %c0_i32_1 = arith.constant 0 : i32
    return %c0_i32, %c0_i32_0 : i32, i32
  }
  func.func @transform_7(%arg0: i32, %arg1: i32) -> (i32, i32) {
    %c0_i32 = arith.constant 0 : i32
    %c0_i32_0 = arith.constant 0 : i32
    %c0_i32_1 = arith.constant 0 : i32
    return %c0_i32, %c0_i32_0 : i32, i32
  }
  func.func @transform_8(%arg0: i32, %arg1: i32) -> (i32, i32) {
    %c0_i32 = arith.constant 0 : i32
    %c0_i32_0 = arith.constant 0 : i32
    %c0_i32_1 = arith.constant 0 : i32
    return %c0_i32, %c0_i32_0 : i32, i32
  }
  func.func @transform_9(%arg0: i32, %arg1: i32) -> (i32, i32, i32) {
    %c0_i32 = arith.constant 0 : i32
    %c0_i32_0 = arith.constant 0 : i32
    return %arg0, %arg1, %c0_i32 : i32, i32, i32
  }
}

module attributes {stable_mosaic.version = 11 : i64} {
  func.func @_edgeconv_kernel(%arg0: i32, %arg1: i32, %arg2: memref<1x4x16x64xbf16, #tpu.memory_space<vmem>>, %arg3: memref<1x16x64xbf16, #tpu.memory_space<vmem>>, %arg4: memref<64x64xbf16, #tpu.memory_space<vmem>>, %arg5: memref<64x64xbf16, #tpu.memory_space<vmem>>, %arg6: memref<1x64xf32, #tpu.memory_space<vmem>>, %arg7: memref<1x64xf32, #tpu.memory_space<vmem>>, %arg8: memref<1x16x64xbf16, #tpu.memory_space<vmem>>) attributes {dimension_semantics = [#tpu.dimension_semantics<parallel>, #tpu.dimension_semantics<parallel>], iteration_bounds = array<i64: 2, 1>, scalar_prefetch = 0 : i64, scratch_operands = 0 : i64, tpu.core_type = #tpu.core_type<tc>, window_params = [{transform_indices = @transform_0, window_bounds = array<i64: 1, 4, 16, 64>}, {transform_indices = @transform_1, window_bounds = array<i64: 1, 16, 64>}, {pipeline_mode = #tpu.pipeline_mode<synchronous>, transform_indices = @transform_2, window_bounds = array<i64: 64, 64>}, {pipeline_mode = #tpu.pipeline_mode<synchronous>, transform_indices = @transform_3, window_bounds = array<i64: 64, 64>}, {pipeline_mode = #tpu.pipeline_mode<synchronous>, transform_indices = @transform_4, window_bounds = array<i64: 1, 64>}, {pipeline_mode = #tpu.pipeline_mode<synchronous>, transform_indices = @transform_5, window_bounds = array<i64: 1, 64>}, {transform_indices = @transform_6, window_bounds = array<i64: 1, 16, 64>}]} {
    %c0 = arith.constant 0 : index
    %c0_0 = arith.constant 0 : index
    %0 = vector.load %arg4[%c0, %c0_0] : memref<64x64xbf16, #tpu.memory_space<vmem>>, vector<64x64xbf16>
    %c0_1 = arith.constant 0 : index
    %c0_2 = arith.constant 0 : index
    %1 = vector.load %arg6[%c0_1, %c0_2] : memref<1x64xf32, #tpu.memory_space<vmem>>, vector<1x64xf32>
    %c0_3 = arith.constant 0 : index
    %c0_4 = arith.constant 0 : index
    %2 = vector.load %arg7[%c0_3, %c0_4] : memref<1x64xf32, #tpu.memory_space<vmem>>, vector<1x64xf32>
    %c0_5 = arith.constant 0 : index
    %c0_6 = arith.constant 0 : index
    %c0_7 = arith.constant 0 : index
    %3 = vector.load %arg3[%c0_5, %c0_6, %c0_7] : memref<1x16x64xbf16, #tpu.memory_space<vmem>>, vector<1x16x64xbf16>
    %4 = vector.shape_cast %3 : vector<1x16x64xbf16> to vector<16x64xbf16>
    %c0_8 = arith.constant 0 : index
    %c0_9 = arith.constant 0 : index
    %5 = vector.load %arg5[%c0_8, %c0_9] : memref<64x64xbf16, #tpu.memory_space<vmem>>, vector<64x64xbf16>
    %cst = arith.constant dense<0.000000e+00> : vector<16x64xf32>
    %6 = tpu.matmul %4, %5, %cst {dimension_numbers = #tpu.dot_dimension_numbers<[1], [0], [0], [1], [0, 0, 1, 1], [], []>} : vector<16x64xbf16>, vector<64x64xbf16>, vector<16x64xf32> -> vector<16x64xf32>
    %7 = vector.broadcast %1 : vector<1x64xf32> to vector<16x64xf32>
    %8 = arith.mulf %6, %7 : vector<16x64xf32>
    %9 = vector.broadcast %2 : vector<1x64xf32> to vector<16x64xf32>
    %10 = arith.addf %8, %9 : vector<16x64xf32>
    %c0_10 = arith.constant 0 : index
    %c0_11 = arith.constant 0 : index
    %c0_12 = arith.constant 0 : index
    %c0_13 = arith.constant 0 : index
    %11 = vector.load %arg2[%c0_10, %c0_11, %c0_12, %c0_13] : memref<1x4x16x64xbf16, #tpu.memory_space<vmem>>, vector<1x1x16x64xbf16>
    %12 = vector.shape_cast %11 : vector<1x1x16x64xbf16> to vector<16x64xbf16>
    %cst_14 = arith.constant dense<0.000000e+00> : vector<16x64xf32>
    %13 = tpu.matmul %12, %0, %cst_14 {dimension_numbers = #tpu.dot_dimension_numbers<[1], [0], [0], [1], [0, 0, 1, 1], [], []>} : vector<16x64xbf16>, vector<64x64xbf16>, vector<16x64xf32> -> vector<16x64xf32>
    %14 = vector.broadcast %1 : vector<1x64xf32> to vector<16x64xf32>
    %15 = arith.mulf %13, %14 : vector<16x64xf32>
    %16 = arith.addf %15, %10 : vector<16x64xf32>
    %cst_15 = arith.constant 0.000000e+00 : f32
    %17 = vector.broadcast %cst_15 : f32 to vector<16x64xf32>
    %18 = arith.cmpf oge, %16, %17 : vector<16x64xf32>
    %cst_16 = arith.constant 2.000000e-01 : f32
    %19 = vector.broadcast %cst_16 : f32 to vector<16x64xf32>
    %20 = arith.mulf %19, %16 : vector<16x64xf32>
    %21 = arith.select %18, %16, %20 : vector<16x64xi1>, vector<16x64xf32>
    %c0_17 = arith.constant 0 : index
    %c1 = arith.constant 1 : index
    %c0_18 = arith.constant 0 : index
    %c0_19 = arith.constant 0 : index
    %22 = vector.load %arg2[%c0_17, %c1, %c0_18, %c0_19] : memref<1x4x16x64xbf16, #tpu.memory_space<vmem>>, vector<1x1x16x64xbf16>
    %23 = vector.shape_cast %22 : vector<1x1x16x64xbf16> to vector<16x64xbf16>
    %cst_20 = arith.constant dense<0.000000e+00> : vector<16x64xf32>
    %24 = tpu.matmul %23, %0, %cst_20 {dimension_numbers = #tpu.dot_dimension_numbers<[1], [0], [0], [1], [0, 0, 1, 1], [], []>} : vector<16x64xbf16>, vector<64x64xbf16>, vector<16x64xf32> -> vector<16x64xf32>
    %25 = vector.broadcast %1 : vector<1x64xf32> to vector<16x64xf32>
    %26 = arith.mulf %24, %25 : vector<16x64xf32>
    %27 = arith.addf %26, %10 : vector<16x64xf32>
    %cst_21 = arith.constant 0.000000e+00 : f32
    %28 = vector.broadcast %cst_21 : f32 to vector<16x64xf32>
    %29 = arith.cmpf oge, %27, %28 : vector<16x64xf32>
    %cst_22 = arith.constant 2.000000e-01 : f32
    %30 = vector.broadcast %cst_22 : f32 to vector<16x64xf32>
    %31 = arith.mulf %30, %27 : vector<16x64xf32>
    %32 = arith.select %29, %27, %31 : vector<16x64xi1>, vector<16x64xf32>
    %33 = arith.maximumf %21, %32 : vector<16x64xf32>
    %c0_23 = arith.constant 0 : index
    %c2 = arith.constant 2 : index
    %c0_24 = arith.constant 0 : index
    %c0_25 = arith.constant 0 : index
    %34 = vector.load %arg2[%c0_23, %c2, %c0_24, %c0_25] : memref<1x4x16x64xbf16, #tpu.memory_space<vmem>>, vector<1x1x16x64xbf16>
    %35 = vector.shape_cast %34 : vector<1x1x16x64xbf16> to vector<16x64xbf16>
    %cst_26 = arith.constant dense<0.000000e+00> : vector<16x64xf32>
    %36 = tpu.matmul %35, %0, %cst_26 {dimension_numbers = #tpu.dot_dimension_numbers<[1], [0], [0], [1], [0, 0, 1, 1], [], []>} : vector<16x64xbf16>, vector<64x64xbf16>, vector<16x64xf32> -> vector<16x64xf32>
    %37 = vector.broadcast %1 : vector<1x64xf32> to vector<16x64xf32>
    %38 = arith.mulf %36, %37 : vector<16x64xf32>
    %39 = arith.addf %38, %10 : vector<16x64xf32>
    %cst_27 = arith.constant 0.000000e+00 : f32
    %40 = vector.broadcast %cst_27 : f32 to vector<16x64xf32>
    %41 = arith.cmpf oge, %39, %40 : vector<16x64xf32>
    %cst_28 = arith.constant 2.000000e-01 : f32
    %42 = vector.broadcast %cst_28 : f32 to vector<16x64xf32>
    %43 = arith.mulf %42, %39 : vector<16x64xf32>
    %44 = arith.select %41, %39, %43 : vector<16x64xi1>, vector<16x64xf32>
    %45 = arith.maximumf %33, %44 : vector<16x64xf32>
    %c0_29 = arith.constant 0 : index
    %c3 = arith.constant 3 : index
    %c0_30 = arith.constant 0 : index
    %c0_31 = arith.constant 0 : index
    %46 = vector.load %arg2[%c0_29, %c3, %c0_30, %c0_31] : memref<1x4x16x64xbf16, #tpu.memory_space<vmem>>, vector<1x1x16x64xbf16>
    %47 = vector.shape_cast %46 : vector<1x1x16x64xbf16> to vector<16x64xbf16>
    %cst_32 = arith.constant dense<0.000000e+00> : vector<16x64xf32>
    %48 = tpu.matmul %47, %0, %cst_32 {dimension_numbers = #tpu.dot_dimension_numbers<[1], [0], [0], [1], [0, 0, 1, 1], [], []>} : vector<16x64xbf16>, vector<64x64xbf16>, vector<16x64xf32> -> vector<16x64xf32>
    %49 = vector.broadcast %1 : vector<1x64xf32> to vector<16x64xf32>
    %50 = arith.mulf %48, %49 : vector<16x64xf32>
    %51 = arith.addf %50, %10 : vector<16x64xf32>
    %cst_33 = arith.constant 0.000000e+00 : f32
    %52 = vector.broadcast %cst_33 : f32 to vector<16x64xf32>
    %53 = arith.cmpf oge, %51, %52 : vector<16x64xf32>
    %cst_34 = arith.constant 2.000000e-01 : f32
    %54 = vector.broadcast %cst_34 : f32 to vector<16x64xf32>
    %55 = arith.mulf %54, %51 : vector<16x64xf32>
    %56 = arith.select %53, %51, %55 : vector<16x64xi1>, vector<16x64xf32>
    %57 = arith.maximumf %45, %56 : vector<16x64xf32>
    %58 = arith.truncf %57 : vector<16x64xf32> to vector<16x64xbf16>
    %c0_35 = arith.constant 0 : index
    %c0_36 = arith.constant 0 : index
    %c0_37 = arith.constant 0 : index
    %59 = vector.load %arg8[%c0_35, %c0_36, %c0_37] : memref<1x16x64xbf16, #tpu.memory_space<vmem>>, vector<1x16x64xbf16>
    %60 = vector.shape_cast %59 : vector<1x16x64xbf16> to vector<16x64xbf16>
    %61 = vector.shape_cast %58 : vector<16x64xbf16> to vector<1x16x64xbf16>
    tpu.vector_store %arg8[%c0_35, %c0_36, %c0_37], %61 {strides = array<i32>} : memref<1x16x64xbf16, #tpu.memory_space<vmem>>, vector<1x16x64xbf16>,
    return
  }
  func.func @transform_0(%arg0: i32, %arg1: i32) -> (i32, i32, i32, i32) {
    %c0_i32 = arith.constant 0 : i32
    %c0_i32_0 = arith.constant 0 : i32
    %c0_i32_1 = arith.constant 0 : i32
    return %arg0, %c0_i32, %arg1, %c0_i32_0 : i32, i32, i32, i32
  }
  func.func @transform_1(%arg0: i32, %arg1: i32) -> (i32, i32, i32) {
    %c0_i32 = arith.constant 0 : i32
    %c0_i32_0 = arith.constant 0 : i32
    return %arg0, %arg1, %c0_i32 : i32, i32, i32
  }
  func.func @transform_2(%arg0: i32, %arg1: i32) -> (i32, i32) {
    %c0_i32 = arith.constant 0 : i32
    %c0_i32_0 = arith.constant 0 : i32
    %c0_i32_1 = arith.constant 0 : i32
    return %c0_i32, %c0_i32_0 : i32, i32
  }
  func.func @transform_3(%arg0: i32, %arg1: i32) -> (i32, i32) {
    %c0_i32 = arith.constant 0 : i32
    %c0_i32_0 = arith.constant 0 : i32
    %c0_i32_1 = arith.constant 0 : i32
    return %c0_i32, %c0_i32_0 : i32, i32
  }
  func.func @transform_4(%arg0: i32, %arg1: i32) -> (i32, i32) {
    %c0_i32 = arith.constant 0 : i32
    %c0_i32_0 = arith.constant 0 : i32
    %c0_i32_1 = arith.constant 0 : i32
    return %c0_i32, %c0_i32_0 : i32, i32
  }
  func.func @transform_5(%arg0: i32, %arg1: i32) -> (i32, i32) {
    %c0_i32 = arith.constant 0 : i32
    %c0_i32_0 = arith.constant 0 : i32
    %c0_i32_1 = arith.constant 0 : i32
    return %c0_i32, %c0_i32_0 : i32, i32
  }
  func.func @transform_6(%arg0: i32, %arg1: i32) -> (i32, i32, i32) {
    %c0_i32 = arith.constant 0 : i32
    %c0_i32_0 = arith.constant 0 : i32
    return %arg0, %arg1, %c0_i32 : i32, i32, i32
  }
}

module attributes {stable_mosaic.version = 11 : i64} {
  func.func @_conv6_gmax_kernel(%arg0: i32, %arg1: i32, %arg2: memref<1x16x64xbf16, #tpu.memory_space<vmem>>, %arg3: memref<1x16x64xbf16, #tpu.memory_space<vmem>>, %arg4: memref<1x16x64xbf16, #tpu.memory_space<vmem>>, %arg5: memref<192x1024xbf16, #tpu.memory_space<vmem>>, %arg6: memref<1x1024xf32, #tpu.memory_space<vmem>>, %arg7: memref<1x1024xf32, #tpu.memory_space<vmem>>, %arg8: memref<1x1x1024xf32, #tpu.memory_space<vmem>>) attributes {dimension_semantics = [#tpu.dimension_semantics<parallel>, #tpu.dimension_semantics<arbitrary>], iteration_bounds = array<i64: 2, 1>, scalar_prefetch = 0 : i64, scratch_operands = 0 : i64, tpu.core_type = #tpu.core_type<tc>, window_params = [{transform_indices = @transform_0, window_bounds = array<i64: 1, 16, 64>}, {transform_indices = @transform_1, window_bounds = array<i64: 1, 16, 64>}, {transform_indices = @transform_2, window_bounds = array<i64: 1, 16, 64>}, {pipeline_mode = #tpu.pipeline_mode<synchronous>, transform_indices = @transform_3, window_bounds = array<i64: 192, 1024>}, {pipeline_mode = #tpu.pipeline_mode<synchronous>, transform_indices = @transform_4, window_bounds = array<i64: 1, 1024>}, {pipeline_mode = #tpu.pipeline_mode<synchronous>, transform_indices = @transform_5, window_bounds = array<i64: 1, 1024>}, {transform_indices = @transform_6, window_bounds = array<i64: 1, 1, 1024>}]} {
    %c0 = arith.constant 0 : index
    %c0_0 = arith.constant 0 : index
    %c0_1 = arith.constant 0 : index
    %0 = vector.load %arg2[%c0, %c0_0, %c0_1] : memref<1x16x64xbf16, #tpu.memory_space<vmem>>, vector<1x16x64xbf16>
    %1 = vector.shape_cast %0 : vector<1x16x64xbf16> to vector<16x64xbf16>
    %c0_2 = arith.constant 0 : index
    %c0_3 = arith.constant 0 : index
    %2 = vector.load %arg5[%c0_2, %c0_3] : memref<192x1024xbf16, #tpu.memory_space<vmem>>, vector<64x1024xbf16>
    %cst = arith.constant dense<0.000000e+00> : vector<16x1024xf32>
    %3 = tpu.matmul %1, %2, %cst {dimension_numbers = #tpu.dot_dimension_numbers<[1], [0], [0], [1], [0, 0, 1, 1], [], []>} : vector<16x64xbf16>, vector<64x1024xbf16>, vector<16x1024xf32> -> vector<16x1024xf32>
    %c0_4 = arith.constant 0 : index
    %c0_5 = arith.constant 0 : index
    %c0_6 = arith.constant 0 : index
    %4 = vector.load %arg3[%c0_4, %c0_5, %c0_6] : memref<1x16x64xbf16, #tpu.memory_space<vmem>>, vector<1x16x64xbf16>
    %5 = vector.shape_cast %4 : vector<1x16x64xbf16> to vector<16x64xbf16>
    %c64 = arith.constant 64 : index
    %c0_7 = arith.constant 0 : index
    %6 = vector.load %arg5[%c64, %c0_7] : memref<192x1024xbf16, #tpu.memory_space<vmem>>, vector<64x1024xbf16>
    %cst_8 = arith.constant dense<0.000000e+00> : vector<16x1024xf32>
    %7 = tpu.matmul %5, %6, %cst_8 {dimension_numbers = #tpu.dot_dimension_numbers<[1], [0], [0], [1], [0, 0, 1, 1], [], []>} : vector<16x64xbf16>, vector<64x1024xbf16>, vector<16x1024xf32> -> vector<16x1024xf32>
    %8 = arith.addf %3, %7 : vector<16x1024xf32>
    %c0_9 = arith.constant 0 : index
    %c0_10 = arith.constant 0 : index
    %c0_11 = arith.constant 0 : index
    %9 = vector.load %arg4[%c0_9, %c0_10, %c0_11] : memref<1x16x64xbf16, #tpu.memory_space<vmem>>, vector<1x16x64xbf16>
    %10 = vector.shape_cast %9 : vector<1x16x64xbf16> to vector<16x64xbf16>
    %c128 = arith.constant 128 : index
    %c0_12 = arith.constant 0 : index
    %11 = vector.load %arg5[%c128, %c0_12] : memref<192x1024xbf16, #tpu.memory_space<vmem>>, vector<64x1024xbf16>
    %cst_13 = arith.constant dense<0.000000e+00> : vector<16x1024xf32>
    %12 = tpu.matmul %10, %11, %cst_13 {dimension_numbers = #tpu.dot_dimension_numbers<[1], [0], [0], [1], [0, 0, 1, 1], [], []>} : vector<16x64xbf16>, vector<64x1024xbf16>, vector<16x1024xf32> -> vector<16x1024xf32>
    %13 = arith.addf %8, %12 : vector<16x1024xf32>
    %c0_14 = arith.constant 0 : index
    %c0_15 = arith.constant 0 : index
    %14 = vector.load %arg6[%c0_14, %c0_15] : memref<1x1024xf32, #tpu.memory_space<vmem>>, vector<1x1024xf32>
    %15 = vector.broadcast %14 : vector<1x1024xf32> to vector<16x1024xf32>
    %16 = arith.mulf %13, %15 : vector<16x1024xf32>
    %c0_16 = arith.constant 0 : index
    %c0_17 = arith.constant 0 : index
    %17 = vector.load %arg7[%c0_16, %c0_17] : memref<1x1024xf32, #tpu.memory_space<vmem>>, vector<1x1024xf32>
    %18 = vector.broadcast %17 : vector<1x1024xf32> to vector<16x1024xf32>
    %19 = arith.addf %16, %18 : vector<16x1024xf32>
    %cst_18 = arith.constant 0.000000e+00 : f32
    %20 = vector.broadcast %cst_18 : f32 to vector<16x1024xf32>
    %21 = arith.cmpf oge, %19, %20 : vector<16x1024xf32>
    %cst_19 = arith.constant 2.000000e-01 : f32
    %22 = vector.broadcast %cst_19 : f32 to vector<16x1024xf32>
    %23 = arith.mulf %22, %19 : vector<16x1024xf32>
    %24 = arith.select %21, %19, %23 : vector<16x1024xi1>, vector<16x1024xf32>
    %cst_20 = arith.constant dense<0xFF800000> : vector<1024xf32>
    %25 = vector.multi_reduction <maximumf>, %24, %cst_20 [0] : vector<16x1024xf32> to vector<1024xf32>
    %26 = vector.shape_cast %25 : vector<1024xf32> to vector<1x1024xf32>
    %c0_i32 = arith.constant 0 : i32
    %27 = arith.cmpi eq, %arg1, %c0_i32 : i32
    %28 = arith.extui %27 : i1 to i32
    %c0_i32_21 = arith.constant 0 : i32
    %29 = arith.cmpi ne, %28, %c0_i32_21 : i32
    scf.if %29 {
      %c0_24 = arith.constant 0 : index
      %c0_25 = arith.constant 0 : index
      %c0_26 = arith.constant 0 : index
      %33 = vector.load %arg8[%c0_24, %c0_25, %c0_26] : memref<1x1x1024xf32, #tpu.memory_space<vmem>>, vector<1x1x1024xf32>
      %34 = vector.shape_cast %33 : vector<1x1x1024xf32> to vector<1x1024xf32>
      %35 = vector.shape_cast %26 : vector<1x1024xf32> to vector<1x1x1024xf32>
      tpu.vector_store %arg8[%c0_24, %c0_25, %c0_26], %35 {strides = array<i32>} : memref<1x1x1024xf32, #tpu.memory_space<vmem>>, vector<1x1x1024xf32>,
    } else {
    }
    %c0_i32_22 = arith.constant 0 : i32
    %30 = arith.cmpi ne, %arg1, %c0_i32_22 : i32
    %31 = arith.extui %30 : i1 to i32
    %c0_i32_23 = arith.constant 0 : i32
    %32 = arith.cmpi ne, %31, %c0_i32_23 : i32
    scf.if %32 {
      %c0_24 = arith.constant 0 : index
      %c0_25 = arith.constant 0 : index
      %c0_26 = arith.constant 0 : index
      %33 = vector.load %arg8[%c0_24, %c0_25, %c0_26] : memref<1x1x1024xf32, #tpu.memory_space<vmem>>, vector<1x1x1024xf32>
      %34 = vector.shape_cast %33 : vector<1x1x1024xf32> to vector<1x1024xf32>
      %35 = arith.maximumf %34, %26 : vector<1x1024xf32>
      %c0_27 = arith.constant 0 : index
      %c0_28 = arith.constant 0 : index
      %c0_29 = arith.constant 0 : index
      %36 = vector.load %arg8[%c0_27, %c0_28, %c0_29] : memref<1x1x1024xf32, #tpu.memory_space<vmem>>, vector<1x1x1024xf32>
      %37 = vector.shape_cast %36 : vector<1x1x1024xf32> to vector<1x1024xf32>
      %38 = vector.shape_cast %35 : vector<1x1024xf32> to vector<1x1x1024xf32>
      tpu.vector_store %arg8[%c0_27, %c0_28, %c0_29], %38 {strides = array<i32>} : memref<1x1x1024xf32, #tpu.memory_space<vmem>>, vector<1x1x1024xf32>,
    } else {
    }
    return
  }
  func.func @transform_0(%arg0: i32, %arg1: i32) -> (i32, i32, i32) {
    %c0_i32 = arith.constant 0 : i32
    %c0_i32_0 = arith.constant 0 : i32
    return %arg0, %arg1, %c0_i32 : i32, i32, i32
  }
  func.func @transform_1(%arg0: i32, %arg1: i32) -> (i32, i32, i32) {
    %c0_i32 = arith.constant 0 : i32
    %c0_i32_0 = arith.constant 0 : i32
    return %arg0, %arg1, %c0_i32 : i32, i32, i32
  }
  func.func @transform_2(%arg0: i32, %arg1: i32) -> (i32, i32, i32) {
    %c0_i32 = arith.constant 0 : i32
    %c0_i32_0 = arith.constant 0 : i32
    return %arg0, %arg1, %c0_i32 : i32, i32, i32
  }
  func.func @transform_3(%arg0: i32, %arg1: i32) -> (i32, i32) {
    %c0_i32 = arith.constant 0 : i32
    %c0_i32_0 = arith.constant 0 : i32
    %c0_i32_1 = arith.constant 0 : i32
    return %c0_i32, %c0_i32_0 : i32, i32
  }
  func.func @transform_4(%arg0: i32, %arg1: i32) -> (i32, i32) {
    %c0_i32 = arith.constant 0 : i32
    %c0_i32_0 = arith.constant 0 : i32
    %c0_i32_1 = arith.constant 0 : i32
    return %c0_i32, %c0_i32_0 : i32, i32
  }
  func.func @transform_5(%arg0: i32, %arg1: i32) -> (i32, i32) {
    %c0_i32 = arith.constant 0 : i32
    %c0_i32_0 = arith.constant 0 : i32
    %c0_i32_1 = arith.constant 0 : i32
    return %c0_i32, %c0_i32_0 : i32, i32
  }
  func.func @transform_6(%arg0: i32, %arg1: i32) -> (i32, i32, i32) {
    %c0_i32 = arith.constant 0 : i32
    %c0_i32_0 = arith.constant 0 : i32
    %c0_i32_1 = arith.constant 0 : i32
    return %arg0, %c0_i32, %c0_i32_0 : i32, i32, i32
  }
}

module attributes {stable_mosaic.version = 11 : i64} {
  func.func @_head_kernel(%arg0: i32, %arg1: i32, %arg2: memref<1x1x1024xf32, #tpu.memory_space<vmem>>, %arg3: memref<1x16x64xbf16, #tpu.memory_space<vmem>>, %arg4: memref<1x16x64xbf16, #tpu.memory_space<vmem>>, %arg5: memref<1x16x64xbf16, #tpu.memory_space<vmem>>, %arg6: memref<1216x512xbf16, #tpu.memory_space<vmem>>, %arg7: memref<1x512xf32, #tpu.memory_space<vmem>>, %arg8: memref<1x512xf32, #tpu.memory_space<vmem>>, %arg9: memref<512x256xbf16, #tpu.memory_space<vmem>>, %arg10: memref<1x256xf32, #tpu.memory_space<vmem>>, %arg11: memref<1x256xf32, #tpu.memory_space<vmem>>, %arg12: memref<256x128xbf16, #tpu.memory_space<vmem>>, %arg13: memref<1x16x128xf32, #tpu.memory_space<vmem>>) attributes {dimension_semantics = [#tpu.dimension_semantics<parallel>, #tpu.dimension_semantics<parallel>], iteration_bounds = array<i64: 2, 1>, scalar_prefetch = 0 : i64, scratch_operands = 0 : i64, tpu.core_type = #tpu.core_type<tc>, window_params = [{transform_indices = @transform_0, window_bounds = array<i64: 1, 1, 1024>}, {transform_indices = @transform_1, window_bounds = array<i64: 1, 16, 64>}, {transform_indices = @transform_2, window_bounds = array<i64: 1, 16, 64>}, {transform_indices = @transform_3, window_bounds = array<i64: 1, 16, 64>}, {pipeline_mode = #tpu.pipeline_mode<synchronous>, transform_indices = @transform_4, window_bounds = array<i64: 1216, 512>}, {pipeline_mode = #tpu.pipeline_mode<synchronous>, transform_indices = @transform_5, window_bounds = array<i64: 1, 512>}, {pipeline_mode = #tpu.pipeline_mode<synchronous>, transform_indices = @transform_6, window_bounds = array<i64: 1, 512>}, {pipeline_mode = #tpu.pipeline_mode<synchronous>, transform_indices = @transform_7, window_bounds = array<i64: 512, 256>}, {pipeline_mode = #tpu.pipeline_mode<synchronous>, transform_indices = @transform_8, window_bounds = array<i64: 1, 256>}, {pipeline_mode = #tpu.pipeline_mode<synchronous>, transform_indices = @transform_9, window_bounds = array<i64: 1, 256>}, {pipeline_mode = #tpu.pipeline_mode<synchronous>, transform_indices = @transform_10, window_bounds = array<i64: 256, 128>}, {transform_indices = @transform_11, window_bounds = array<i64: 1, 16, 128>}]} {
    %c0 = arith.constant 0 : index
    %c0_0 = arith.constant 0 : index
    %c0_1 = arith.constant 0 : index
    %0 = vector.load %arg2[%c0, %c0_0, %c0_1] : memref<1x1x1024xf32, #tpu.memory_space<vmem>>, vector<1x1x1024xf32>
    %1 = vector.shape_cast %0 : vector<1x1x1024xf32> to vector<1x1024xf32>
    %2 = arith.truncf %1 : vector<1x1024xf32> to vector<1x1024xbf16>
    %c0_2 = arith.constant 0 : index
    %c0_3 = arith.constant 0 : index
    %3 = vector.load %arg6[%c0_2, %c0_3] : memref<1216x512xbf16, #tpu.memory_space<vmem>>, vector<1024x512xbf16>
    %cst = arith.constant dense<0.000000e+00> : vector<1x512xf32>
    %4 = tpu.matmul %2, %3, %cst {dimension_numbers = #tpu.dot_dimension_numbers<[1], [0], [0], [1], [0, 0, 1, 1], [], []>} : vector<1x1024xbf16>, vector<1024x512xbf16>, vector<1x512xf32> -> vector<1x512xf32>
    %c0_4 = arith.constant 0 : index
    %c0_5 = arith.constant 0 : index
    %c0_6 = arith.constant 0 : index
    %5 = vector.load %arg3[%c0_4, %c0_5, %c0_6] : memref<1x16x64xbf16, #tpu.memory_space<vmem>>, vector<1x16x64xbf16>
    %6 = vector.shape_cast %5 : vector<1x16x64xbf16> to vector<16x64xbf16>
    %c1024 = arith.constant 1024 : index
    %c0_7 = arith.constant 0 : index
    %7 = vector.load %arg6[%c1024, %c0_7] : memref<1216x512xbf16, #tpu.memory_space<vmem>>, vector<64x512xbf16>
    %cst_8 = arith.constant dense<0.000000e+00> : vector<16x512xf32>
    %8 = tpu.matmul %6, %7, %cst_8 {dimension_numbers = #tpu.dot_dimension_numbers<[1], [0], [0], [1], [0, 0, 1, 1], [], []>} : vector<16x64xbf16>, vector<64x512xbf16>, vector<16x512xf32> -> vector<16x512xf32>
    %c0_9 = arith.constant 0 : index
    %c0_10 = arith.constant 0 : index
    %c0_11 = arith.constant 0 : index
    %9 = vector.load %arg4[%c0_9, %c0_10, %c0_11] : memref<1x16x64xbf16, #tpu.memory_space<vmem>>, vector<1x16x64xbf16>
    %10 = vector.shape_cast %9 : vector<1x16x64xbf16> to vector<16x64xbf16>
    %c1088 = arith.constant 1088 : index
    %c0_12 = arith.constant 0 : index
    %11 = vector.load %arg6[%c1088, %c0_12] : memref<1216x512xbf16, #tpu.memory_space<vmem>>, vector<64x512xbf16>
    %cst_13 = arith.constant dense<0.000000e+00> : vector<16x512xf32>
    %12 = tpu.matmul %10, %11, %cst_13 {dimension_numbers = #tpu.dot_dimension_numbers<[1], [0], [0], [1], [0, 0, 1, 1], [], []>} : vector<16x64xbf16>, vector<64x512xbf16>, vector<16x512xf32> -> vector<16x512xf32>
    %13 = arith.addf %8, %12 : vector<16x512xf32>
    %c0_14 = arith.constant 0 : index
    %c0_15 = arith.constant 0 : index
    %c0_16 = arith.constant 0 : index
    %14 = vector.load %arg5[%c0_14, %c0_15, %c0_16] : memref<1x16x64xbf16, #tpu.memory_space<vmem>>, vector<1x16x64xbf16>
    %15 = vector.shape_cast %14 : vector<1x16x64xbf16> to vector<16x64xbf16>
    %c1152 = arith.constant 1152 : index
    %c0_17 = arith.constant 0 : index
    %16 = vector.load %arg6[%c1152, %c0_17] : memref<1216x512xbf16, #tpu.memory_space<vmem>>, vector<64x512xbf16>
    %cst_18 = arith.constant dense<0.000000e+00> : vector<16x512xf32>
    %17 = tpu.matmul %15, %16, %cst_18 {dimension_numbers = #tpu.dot_dimension_numbers<[1], [0], [0], [1], [0, 0, 1, 1], [], []>} : vector<16x64xbf16>, vector<64x512xbf16>, vector<16x512xf32> -> vector<16x512xf32>
    %18 = arith.addf %13, %17 : vector<16x512xf32>
    %19 = vector.shape_cast %4 : vector<1x512xf32> to vector<1x512xf32>
    %20 = vector.broadcast %19 : vector<1x512xf32> to vector<16x512xf32>
    %21 = arith.addf %18, %20 : vector<16x512xf32>
    %c0_19 = arith.constant 0 : index
    %c0_20 = arith.constant 0 : index
    %22 = vector.load %arg7[%c0_19, %c0_20] : memref<1x512xf32, #tpu.memory_space<vmem>>, vector<1x512xf32>
    %23 = vector.broadcast %22 : vector<1x512xf32> to vector<16x512xf32>
    %24 = arith.mulf %21, %23 : vector<16x512xf32>
    %c0_21 = arith.constant 0 : index
    %c0_22 = arith.constant 0 : index
    %25 = vector.load %arg8[%c0_21, %c0_22] : memref<1x512xf32, #tpu.memory_space<vmem>>, vector<1x512xf32>
    %26 = vector.broadcast %25 : vector<1x512xf32> to vector<16x512xf32>
    %27 = arith.addf %24, %26 : vector<16x512xf32>
    %cst_23 = arith.constant 0.000000e+00 : f32
    %28 = vector.broadcast %cst_23 : f32 to vector<16x512xf32>
    %29 = arith.cmpf oge, %27, %28 : vector<16x512xf32>
    %cst_24 = arith.constant 2.000000e-01 : f32
    %30 = vector.broadcast %cst_24 : f32 to vector<16x512xf32>
    %31 = arith.mulf %30, %27 : vector<16x512xf32>
    %32 = arith.select %29, %27, %31 : vector<16x512xi1>, vector<16x512xf32>
    %33 = arith.truncf %32 : vector<16x512xf32> to vector<16x512xbf16>
    %c0_25 = arith.constant 0 : index
    %c0_26 = arith.constant 0 : index
    %34 = vector.load %arg9[%c0_25, %c0_26] : memref<512x256xbf16, #tpu.memory_space<vmem>>, vector<512x256xbf16>
    %cst_27 = arith.constant dense<0.000000e+00> : vector<16x256xf32>
    %35 = tpu.matmul %33, %34, %cst_27 {dimension_numbers = #tpu.dot_dimension_numbers<[1], [0], [0], [1], [0, 0, 1, 1], [], []>} : vector<16x512xbf16>, vector<512x256xbf16>, vector<16x256xf32> -> vector<16x256xf32>
    %c0_28 = arith.constant 0 : index
    %c0_29 = arith.constant 0 : index
    %36 = vector.load %arg10[%c0_28, %c0_29] : memref<1x256xf32, #tpu.memory_space<vmem>>, vector<1x256xf32>
    %37 = vector.broadcast %36 : vector<1x256xf32> to vector<16x256xf32>
    %38 = arith.mulf %35, %37 : vector<16x256xf32>
    %c0_30 = arith.constant 0 : index
    %c0_31 = arith.constant 0 : index
    %39 = vector.load %arg11[%c0_30, %c0_31] : memref<1x256xf32, #tpu.memory_space<vmem>>, vector<1x256xf32>
    %40 = vector.broadcast %39 : vector<1x256xf32> to vector<16x256xf32>
    %41 = arith.addf %38, %40 : vector<16x256xf32>
    %cst_32 = arith.constant 0.000000e+00 : f32
    %42 = vector.broadcast %cst_32 : f32 to vector<16x256xf32>
    %43 = arith.cmpf oge, %41, %42 : vector<16x256xf32>
    %cst_33 = arith.constant 2.000000e-01 : f32
    %44 = vector.broadcast %cst_33 : f32 to vector<16x256xf32>
    %45 = arith.mulf %44, %41 : vector<16x256xf32>
    %46 = arith.select %43, %41, %45 : vector<16x256xi1>, vector<16x256xf32>
    %47 = arith.truncf %46 : vector<16x256xf32> to vector<16x256xbf16>
    %c0_34 = arith.constant 0 : index
    %c0_35 = arith.constant 0 : index
    %48 = vector.load %arg12[%c0_34, %c0_35] : memref<256x128xbf16, #tpu.memory_space<vmem>>, vector<256x128xbf16>
    %cst_36 = arith.constant dense<0.000000e+00> : vector<16x128xf32>
    %49 = tpu.matmul %47, %48, %cst_36 {dimension_numbers = #tpu.dot_dimension_numbers<[1], [0], [0], [1], [0, 0, 1, 1], [], []>} : vector<16x256xbf16>, vector<256x128xbf16>, vector<16x128xf32> -> vector<16x128xf32>
    %c0_37 = arith.constant 0 : index
    %c0_38 = arith.constant 0 : index
    %c0_39 = arith.constant 0 : index
    %50 = vector.load %arg13[%c0_37, %c0_38, %c0_39] : memref<1x16x128xf32, #tpu.memory_space<vmem>>, vector<1x16x128xf32>
    %51 = vector.shape_cast %50 : vector<1x16x128xf32> to vector<16x128xf32>
    %52 = vector.shape_cast %49 : vector<16x128xf32> to vector<1x16x128xf32>
    tpu.vector_store %arg13[%c0_37, %c0_38, %c0_39], %52 {strides = array<i32>} : memref<1x16x128xf32, #tpu.memory_space<vmem>>, vector<1x16x128xf32>,
    return
  }
  func.func @transform_0(%arg0: i32, %arg1: i32) -> (i32, i32, i32) {
    %c0_i32 = arith.constant 0 : i32
    %c0_i32_0 = arith.constant 0 : i32
    %c0_i32_1 = arith.constant 0 : i32
    return %arg0, %c0_i32, %c0_i32_0 : i32, i32, i32
  }
  func.func @transform_1(%arg0: i32, %arg1: i32) -> (i32, i32, i32) {
    %c0_i32 = arith.constant 0 : i32
    %c0_i32_0 = arith.constant 0 : i32
    return %arg0, %arg1, %c0_i32 : i32, i32, i32
  }
  func.func @transform_2(%arg0: i32, %arg1: i32) -> (i32, i32, i32) {
    %c0_i32 = arith.constant 0 : i32
    %c0_i32_0 = arith.constant 0 : i32
    return %arg0, %arg1, %c0_i32 : i32, i32, i32
  }
  func.func @transform_3(%arg0: i32, %arg1: i32) -> (i32, i32, i32) {
    %c0_i32 = arith.constant 0 : i32
    %c0_i32_0 = arith.constant 0 : i32
    return %arg0, %arg1, %c0_i32 : i32, i32, i32
  }
  func.func @transform_4(%arg0: i32, %arg1: i32) -> (i32, i32) {
    %c0_i32 = arith.constant 0 : i32
    %c0_i32_0 = arith.constant 0 : i32
    %c0_i32_1 = arith.constant 0 : i32
    return %c0_i32, %c0_i32_0 : i32, i32
  }
  func.func @transform_5(%arg0: i32, %arg1: i32) -> (i32, i32) {
    %c0_i32 = arith.constant 0 : i32
    %c0_i32_0 = arith.constant 0 : i32
    %c0_i32_1 = arith.constant 0 : i32
    return %c0_i32, %c0_i32_0 : i32, i32
  }
  func.func @transform_6(%arg0: i32, %arg1: i32) -> (i32, i32) {
    %c0_i32 = arith.constant 0 : i32
    %c0_i32_0 = arith.constant 0 : i32
    %c0_i32_1 = arith.constant 0 : i32
    return %c0_i32, %c0_i32_0 : i32, i32
  }
  func.func @transform_7(%arg0: i32, %arg1: i32) -> (i32, i32) {
    %c0_i32 = arith.constant 0 : i32
    %c0_i32_0 = arith.constant 0 : i32
    %c0_i32_1 = arith.constant 0 : i32
    return %c0_i32, %c0_i32_0 : i32, i32
  }
  func.func @transform_8(%arg0: i32, %arg1: i32) -> (i32, i32) {
    %c0_i32 = arith.constant 0 : i32
    %c0_i32_0 = arith.constant 0 : i32
    %c0_i32_1 = arith.constant 0 : i32
    return %c0_i32, %c0_i32_0 : i32, i32
  }
  func.func @transform_9(%arg0: i32, %arg1: i32) -> (i32, i32) {
    %c0_i32 = arith.constant 0 : i32
    %c0_i32_0 = arith.constant 0 : i32
    %c0_i32_1 = arith.constant 0 : i32
    return %c0_i32, %c0_i32_0 : i32, i32
  }
  func.func @transform_10(%arg0: i32, %arg1: i32) -> (i32, i32) {
    %c0_i32 = arith.constant 0 : i32
    %c0_i32_0 = arith.constant 0 : i32
    %c0_i32_1 = arith.constant 0 : i32
    return %c0_i32, %c0_i32_0 : i32, i32
  }
  func.func @transform_11(%arg0: i32, %arg1: i32) -> (i32, i32, i32) {
    %c0_i32 = arith.constant 0 : i32
    %c0_i32_0 = arith.constant 0 : i32
    return %arg0, %arg1, %c0_i32 : i32, i32, i32
  }
}

</mosaic_0001>

<bundles_post_ra>
// kernel: dgcnn_semseg_forward.8
= control target key start
LH: loop header
LB: loop body
LE: loop exit
PB: predicated region body
PF: predicated region fallthrough
CT: control target
= control target key end

     0   :  { %s556_s9 = smov 0   ;;  %s558_s10 = smov 0   ;;  %s605_s0 = inlined_call_operand.vmem [shape: f32[2,16,8], index: 0, kind: input, shape index: {}, may-alias: {0,1}]   ;;  %s606_s1 = inlined_call_operand.vmem [shape: f32[2,16,8], index: 1, kind: input, shape index: {}, may-alias: {0,1}]   ;;  %s607_s2 = inlined_call_operand.vmem [shape: f32[2,16,16], index: 2, kind: output, shape index: {}]  }
   0x1   :  { %s560_s11 = smov 0  }
   0x2 LB: > { %s24_s12 = sadd.s32 1, %s535_s10  ;;  %p459_p0 = scmp.ge.s32.totalorder %s539_s11, 1  ;;  %s539_s11 = sphi %s560_s11, %s12_s11   ;;  %s535_s10 = sphi %s558_s10, %s609_s10   ;;  %s531_s9 = sphi %s556_s9, %s608_s9  }
   0x3   : > { %p26_p1 = scmp.ge.s32.totalorder %s24_s12, 2  ;;  %p143_p2 = scmp.lt.s32.totalorder %s539_s11, 3 }
   0x5   : > { %s611_s12 = smov (%p26_p1, %s24_s12), 0  ;;  %p144_p3 = pnand %p459_p0, %p143_p2 }
   0x6   : > { %p179_p4 = scmp.lt.s32.totalorder (!%p144_p3), %s531_s9, 1  ;;  %vm209_vm0 = vcmask (!%p144_p3), 64512   ;;  %v347_v17 = vlaneseq (!%p144_p3)  ;;  %vm353_vm2 = vcmask (!%p144_p3), 130048  }
   0x7   : > { %147 = sbr.rel (%p144_p3) target bundleno = 297 (0x129), region = 28  ;;  %vm487_vm1 = vmpackc.low (!%p144_p3), %vm209_vm0, %vm209_vm0 }
   0x8   : > { %v348_v19 = vshrl.u32 (!%p144_p3), %v347_v17, 7 }
   0xa   : > { %v349_v23 = vsub.s32 (!%p144_p3), 0, %v348_v19 }
   0xe   : > { %s613_s9 = smov (!%p179_p4, %s531_s9), 1 }
   0xf   : > { %s574_s13 = sshll.u32 %s613_s9, 4 }
  0x10   : > { %s192_s16 = scalar_lea.vmem %s606_s1, %s574_s13  ;;  %s186_s19 = scalar_lea.vmem %s605_s0, %s574_s13 }
  0x11   : > { %v205_v0 = vld [vmem:[%s192_s16] sm:$0xff]  ;;  %v206_v1 = vld [vmem:[%s192_s16 + $0x8] sm:$0xff]  ;;  %s201_s22 = scalar_lea.vmem %s607_s2, %s574_s13 }
  0x12   : > { %v216_v2 = vmul.f32 %v205_v0, %v205_v0  ;;  %v217_v3 = vmul.f32 %v206_v1, %v206_v1  ;;  %v486_v4 = vpack.c.bf16 %v206_v1, %v205_v0  ;;  %v203_v5 = vld [vmem:[%s186_s19] sm:$0xff]  ;;  %v204_v6 = vld [vmem:[%s186_s19 + $0x8] sm:$0xff] }
  0x13   : > { %v207_v7 = vmul.f32 %v203_v5, %v203_v5  ;;  %483 = vmatprep.mubr.msk.f32.mxu0 %vm209_vm0, %v203_v5  ;;  %v208_v8 = vmul.f32 %v204_v6, %v204_v6 }
  0x14   : > { %v218_v9 = vsel %vm209_vm0, %v216_v2, 0.0  ;;  %488 = vmatprep.subr.msk.bf16.mxu0 %vm487_vm1, %v486_v4  ;;  %v221_v11 = vsel %vm209_vm0, %v217_v3, 0.0 }
  0x15   : > { %219 = vadd.xlane.f32.xlu0 %v218_v9  ;;  %491 = vmatpush3.bf16.xpose.msk.msra.mxu0 %vm487_vm1, %v486_v4  ;;  %v210_v10 = vsel %vm209_vm0, %v207_v7, 0.0  ;;  %v213_v12 = vsel %vm209_vm0, %v208_v8, 0.0 }
  0x16   : > { %211 = vadd.xlane.f32.xlu1 %v210_v10 }
  0x19   : > { %222 = vadd.xlane.f32.xlu0 %v221_v11 }
  0x1a   : > { %214 = vadd.xlane.f32.xlu1 %v213_v12 }
  0x1c   : > { %484 = vmatmul.mubr.msk.f32.vlgmr.msra.gmra.mrb[0].mxu0 %vm209_vm0, %v204_v6 }
  0xa2   : > { %v220_v13 = vpop.xlane.xlu0 %219 }
  0xa3   : > { %315 = vxpose.xlu0.b32.start [1/2] (short) (narrow) %v220_v13, 8  ;;  %v212_v18 = vpop.xlane.xlu1 %211 }
  0xa6   : > { %v223_v14 = vpop.xlane.xlu0 %222 }
  0xa7   : > { %316 = vxpose.xlu0.b32.end [2/2] (short) (narrow) %v223_v14, 8  ;;  %v215_v21 = vpop.xlane.xlu1 %214 }
  0xef   : > { %v485_v15 = vpop.f32.mrb[0].mxu0 }
  0xf0   : > { %v302_v16 = vpop.f32.mrb[1].mxu0  ;;  %v312_v20 = vmul.f32 2.0, %v485_v15 }
  0xf1   : > { %v311_v22 = vmul.f32 2.0, %v302_v16 }
  0xf2   : > { %v314_v24 = vsub.f32 %v312_v20, %v215_v21 }
  0xf3   : > { %v313_v26 = vsub.f32 %v311_v22, %v212_v18 }
 0x123   : > { %v331_v25 = vpop.trf.xlu0 }
 0x124   : > { %v350_v27 = vrot.slane %v331_v25, %v349_v23 }
 0x126   : > { %v351_v28 = vsub.f32 %v313_v26, %v350_v27  ;;  %v352_v29 = vsub.f32 %v314_v24, %v350_v27 }
 0x128   : > { %354 = vst.msk [vmem:[%s201_s22] sm:$0xff] %vm353_vm2, %v351_v28  ;;  %355 = vst.msk [vmem:[%s201_s22 + $0x8] sm:$0xff] %vm353_vm2, %v352_v29 }
 0x129 PF: > { %s12_s11 = sadd.s32 1, %s539_s11   ;;  %s608_s9 = smov %s535_s10 }
 0x12a   : > { %p9_p5 = scmp.ge.s32.totalorder %s12_s11, 4   ;;  %s609_s10 = smov %s611_s12 }
 0x12c   :  { %11 = sbr.rel (!%p9_p5) target bundleno = 2 (0x2), region = 61 }

// kernel: dgcnn_semseg_forward.9
= control target key start
LH: loop header
LB: loop body
LE: loop exit
PB: predicated region body
PF: predicated region fallthrough
CT: control target
= control target key end

     0   :  { %s2076_s0 = inlined_call_operand.vmem [shape: bf16[2,4,16,9], index: 0, kind: input, shape index: {}]   ;;  %s2077_s1 = inlined_call_operand.vmem [shape: bf16[2,16,9], index: 1, kind: input, shape index: {}]   ;;  %s2078_s2 = inlined_call_operand.vmem [shape: bf16[9,64], index: 2, kind: input, shape index: {}]   ;;  %s2079_s3 = inlined_call_operand.vmem [shape: bf16[9,64], index: 3, kind: input, shape index: {}]   ;;  %s2080_s4 = inlined_call_operand.hbm [shape: f32[1,64], index: 4, kind: input, shape index: {}]   ;;  %s2081_s5 = inlined_call_operand.hbm [shape: f32[1,64], index: 5, kind: input, shape index: {}]   ;;  %s2082_s6 = inlined_call_operand.hbm [shape: bf16[64,64], index: 6, kind: input, shape index: {}]   ;;  %s2083_s7 = inlined_call_operand.hbm [shape: f32[1,64], index: 7, kind: input, shape index: {}]   ;;  %s2084_s8 = inlined_call_operand.hbm [shape: f32[1,64], index: 8, kind: input, shape index: {}]   ;;  %s2085_s9 = inlined_call_operand.vmem [shape: bf16[2,16,64], index: 9, kind: output, shape index: {}]  }
   0x1   :  { %2089 = sst [smem:[#allocation13_spill]] %s2080_s4 }
   0x2   :  { %14 = vsyncpa [#allocation3], 0 }
   0x3   :  { %15 = vsyncpa [#allocation5], 0 }
   0x4   :  { %16 = vsyncpa [#allocation8], 0  ;;  %s1749_s30 = smov 0   ;;  %s1751_s10 = smov 0  }
   0x5   :  { %s1753_s11 = smov 0  }
   0x6 LB: > { %s1689_s12 = smov [#allocation4]   ;;  %s1254_s14 = sadd.s32 4294967295, %s1687_s11   ;;  %s1687_s11 = sphi %s1753_s11, %s22_s11   ;;  %s1683_s10 = sphi %s1751_s10, %s2100_s10   ;;  %s1679_s30 = sphi %s1749_s30, %s2099_s30  }
   0x7   : > { %s300_s13 = sshll.u32 %s1689_s12, 4  ;;  %p1256_p0 = scmp.ge.s32.totalorder %s1687_s11, 1  ;;  %s301_s13 = int_to_ptr.vmem [resolvable:$true] %s300_s13 }
   0x8   : > { %p270_p1 = scmp.lt.s32.totalorder %s1687_s11, 3  ;;  %p1767_p2 = scmp.eq.s32.totalorder %s1254_s14, 0 }
   0x9   : > { %s1690_s17 = smov [#allocation7]   ;;  %s34_s20 = sadd.s32 1, %s1683_s10 }
   0xa   : > { %s2090_s15 = scalar_select %p1767_p2, 1, 0 }
   0xb   : > { %p1771_p3 = pnand %p1256_p0, %p270_p1  ;;  %s324_s18 = sshll.u32 %s1690_s17, 4  ;;  %s1777_s18 = int_to_ptr.vmem [resolvable:$true] %s324_s18 }
   0xc   : > { %p1788_p6 = scmp.ge.s32.totalorder %s34_s20, 2  ;;  %s1513_s24 = scalar_lea.hbm %s2081_s5, 16 }
   0xd   : > { %s2091_s16 = scalar_select %p1771_p3, 1, 0 }
   0xe   : > { %p1442_p4 = pneg %p1771_p3  ;;  %p1514_p7 = scmp.ne.s32.totalorder %s2081_s5, %s1513_s24 }
   0xf   : > { %s2093_s21 = scalar_select %p1788_p6, 1, 0 }
  0x10   : > { %p1781_p5 = pnand %p1767_p2, %p1442_p4  ;;  %p1520_p11 = scmp.lt.u32.totalorder %s1513_s24, %s2081_s5 }
  0x12   : > { %p1800_p8 = pneg %p1781_p5 }
  0x14   : > { %p1516_p9 = pnand %p1800_p8, %p1514_p7 }
  0x16   : > { %p1517_p10 = pneg %p1516_p9 }
  0x18   : > { %p1522_p12 = pnand %p1520_p11, %p1517_p10 }
  0x1a   : > { %1525 = shalt.err (!%p1522_p12)
}
  0x1b   : > { %s1526_s12 = scalar_lea.vmem %s301_s13, 16  ;;  %s1533_s14 = scalar_lea.vmem %s301_s13, 32 }
  0x1c   : > { %p1527_p13 = scmp.ne.s32.totalorder %s301_s13, %s1526_s12  ;;  %p1534_p4 = scmp.lt.s32.totalorder %s301_s13, %s301_s13 }
  0x1d   : > { %p1535_p2 = scmp.lt.s32.totalorder %s1533_s14, %s1526_s12 }
  0x1e   : > { %p1529_p0 = pnand %p1527_p13, %p1800_p8 }
  0x1f   : > { %p1536_p3 = por %p1535_p2, %p1534_p4 }
  0x20   : > { %p1530_p1 = pneg %p1529_p0 }
  0x22   : > { %p1537_p6 = pnand %p1536_p3, %p1530_p1 }
  0x24   : > { %1540 = shalt.err (!%p1537_p6)
}
  0x25   : > { %1448 = dma.hbm_to_vmem [thread:$0]  (!%p1781_p5), %s2081_s5, 16, %s301_s13, [#allocation5]  }
  0x26   : > { %s1541_s25 = scalar_lea.hbm %s2083_s7, 16 }
  0x27   : > { %p1542_p7 = scmp.ne.s32.totalorder %s2083_s7, %s1541_s25  ;;  %p1548_p3 = scmp.lt.u32.totalorder %s1541_s25, %s2083_s7 }
  0x29   : > { %p1544_p9 = pnand %p1542_p7, %p1800_p8 }
  0x2b   : > { %p1545_p2 = pneg %p1544_p9 }
  0x2d   : > { %p1550_p6 = pnand %p1548_p3, %p1545_p2 }
  0x2f   : > { %1553 = shalt.err (!%p1550_p6)
}
  0x30   : > { %s1554_s13 = scalar_lea.vmem %s1777_s18, 16  ;;  %s1561_s14 = scalar_lea.vmem %s1777_s18, 32 }
  0x31   : > { %p1555_p10 = scmp.ne.s32.totalorder %s1777_s18, %s1554_s13  ;;  %p1562_p13 = scmp.lt.s32.totalorder %s1777_s18, %s1777_s18 }
  0x32   : > { %p1563_p0 = scmp.lt.s32.totalorder %s1561_s14, %s1554_s13 }
  0x33   : > { %p1557_p11 = pnand %p1555_p10, %p1800_p8 }
  0x34   : > { %p1564_p1 = por %p1563_p0, %p1562_p13 }
  0x35   : > { %p1558_p12 = pneg %p1557_p11 }
  0x37   : > { %p1565_p4 = pnand %p1564_p1, %p1558_p12 }
  0x39   : > { %1568 = shalt.err (!%p1565_p4)
}
  0x3a   : > { %1454 = dma.hbm_to_vmem [thread:$0]  (!%p1781_p5), %s2083_s7, 16, %s1777_s18, [#allocation8]  }
  0x3b   : > { %p2095_p7 = scmp.ne.s32.totalorder %s2093_s21, 0  ;;  %s1691_s23 = smov [#allocation2]  }
  0x3c   : > { %s289_s24 = sshll.u32 %s1691_s23, 4  ;;  %s1692_s25 = smov [#allocation6]   ;;  %s290_s24 = int_to_ptr.vmem [resolvable:$true] %s289_s24 }
  0x3d   : > { %s2102_s20 = smov (%p2095_p7, %s34_s20), 0  ;;  %s310_s26 = sshll.u32 %s1692_s25, 4  ;;  %s311_s26 = int_to_ptr.vmem [resolvable:$true] %s310_s26 }
  0x3e   : > { %s2096_s4 = sld [smem:[#allocation13_spill]] }
  0x44   : > { %s1569_s12 = scalar_lea.hbm %s2096_s4, 16 }
  0x45   : > { %p1570_p9 = scmp.ne.s32.totalorder %s2096_s4, %s1569_s12  ;;  %p1576_p6 = scmp.lt.u32.totalorder %s1569_s12, %s2096_s4 }
  0x47   : > { %p1572_p2 = pnand %p1570_p9, %p1800_p8 }
  0x49   : > { %p1573_p3 = pneg %p1572_p2 }
  0x4b   : > { %p1578_p10 = pnand %p1576_p6, %p1573_p3 }
  0x4d   : > { %1581 = shalt.err (!%p1578_p10)
}
  0x4e   : > { %s1582_s17 = scalar_lea.vmem %s290_s24, 16  ;;  %s1589_s22 = scalar_lea.vmem %s290_s24, 32 }
  0x4f   : > { %p1583_p11 = scmp.ne.s32.totalorder %s290_s24, %s1582_s17  ;;  %p1590_p0 = scmp.lt.s32.totalorder %s290_s24, %s290_s24 }
  0x50   : > { %p1591_p1 = scmp.lt.s32.totalorder %s1589_s22, %s1582_s17 }
  0x51   : > { %p1585_p12 = pnand %p1583_p11, %p1800_p8 }
  0x52   : > { %p1592_p4 = por %p1591_p1, %p1590_p0 }
  0x53   : > { %p1586_p13 = pneg %p1585_p12 }
  0x55   : > { %p1593_p7 = pnand %p1592_p4, %p1586_p13 }
  0x57   : > { %1596 = shalt.err (!%p1593_p7)
}
  0x58   : > { %1445 = dma.hbm_to_vmem [thread:$0]  (!%p1781_p5), %s2096_s4, 16, %s290_s24, [#allocation3]  }
  0x59   : > { %s1597_s12 = scalar_lea.hbm %s2082_s6, 512 }
  0x5a   : > { %p1598_p9 = scmp.ne.s32.totalorder %s2082_s6, %s1597_s12  ;;  %p1604_p6 = scmp.lt.u32.totalorder %s1597_s12, %s2082_s6 }
  0x5c   : > { %p1600_p2 = pnand %p1598_p9, %p1800_p8 }
  0x5e   : > { %p1601_p3 = pneg %p1600_p2 }
  0x60   : > { %p1606_p10 = pnand %p1604_p6, %p1601_p3 }
  0x62   : > { %1609 = shalt.err (!%p1606_p10)
}
  0x63   : > { %s1610_s17 = scalar_lea.vmem %s311_s26, 512  ;;  %p1618_p0 = scmp.lt.s32.totalorder %s311_s26, %s311_s26 }
  0x64   : > { %p1611_p11 = scmp.ne.s32.totalorder %s311_s26, %s1610_s17  ;;  %p1619_p1 = scmp.lt.s32.totalorder %s1610_s17, %s1610_s17 }
  0x66   : > { %p1613_p12 = pnand %p1611_p11, %p1800_p8  ;;  %p1620_p4 = por %p1619_p1, %p1618_p0 }
  0x68   : > { %p1614_p13 = pneg %p1613_p12 }
  0x6a   : > { %p1621_p7 = pnand %p1620_p4, %p1614_p13 }
  0x6c   : > { %1624 = shalt.err (!%p1621_p7)
}
  0x6d   : > { %s1693_s24 = smov 64   ;;  %s1694_s22 = smov 4  }
  0x6e   : > { %1451 = dma.hbm_to_vmem [thread:$0]  (!%p1781_p5), %s2082_s6, 512, %s311_s26, [#allocation5], %s1693_s24, %s1693_s24, %s1694_s22  }
  0x6f   : > { %s1695_s28 = smov [#allocation9]   ;;  %s1625_s14 = scalar_lea.hbm %s2084_s8, 16 }
  0x70   : > { %s335_s29 = sshll.u32 %s1695_s28, 4  ;;  %p1626_p9 = scmp.ne.s32.totalorder %s2084_s8, %s1625_s14  ;;  %s336_s29 = int_to_ptr.vmem [resolvable:$true] %s335_s29 }
  0x71   : > { %p1632_p6 = scmp.lt.u32.totalorder %s1625_s14, %s2084_s8 }
  0x72   : > { %p1628_p2 = pnand %p1626_p9, %p1800_p8 }
  0x74   : > { %p1629_p3 = pneg %p1628_p2 }
  0x76   : > { %p1634_p10 = pnand %p1632_p6, %p1629_p3 }
  0x78   : > { %1637 = shalt.err (!%p1634_p10)
}
  0x79   : > { %s1638_s26 = scalar_lea.vmem %s336_s29, 16  ;;  %s1645_s24 = scalar_lea.vmem %s336_s29, 32 }
  0x7a   : > { %p1639_p11 = scmp.ne.s32.totalorder %s336_s29, %s1638_s26  ;;  %p1646_p0 = scmp.lt.s32.totalorder %s336_s29, %s336_s29 }
  0x7b   : > { %p1647_p1 = scmp.lt.s32.totalorder %s1645_s24, %s1638_s26 }
  0x7c   : > { %p1641_p12 = pnand %p1639_p11, %p1800_p8 }
  0x7d   : > { %p1648_p4 = por %p1647_p1, %p1646_p0 }
  0x7e   : > { %p1642_p13 = pneg %p1641_p12 }
  0x80   : > { %p1649_p7 = pnand %p1648_p4, %p1642_p13 }
  0x82   : > { %1652 = shalt.err (!%p1649_p7)
}
  0x83   : > { %1457 = dma.hbm_to_vmem [thread:$0]  (!%p1781_p5), %s2084_s8, 16, %s336_s29, [#allocation8]  }
  0x84   : > { %p2097_p9 = scmp.ne.s32.totalorder %s2091_s16, 0 }
  0x85   : > { %p2098_p2 = scmp.ne.s32.totalorder (!%p2097_p9), %s2090_s15, 0 }
  0x86   : > { %374 = sbr.rel (%p2097_p9) target bundleno = 843 (0x34b), region = 56 }
  0x8d   : > { %1666 = dma.done.wait (%p2098_p2), [#allocation3], 16  }
  0x8e   : > { %1668 = vsyncadd (%p2098_p2), [#allocation3], 4294967280 }
  0x8f   : > { %1670 = dma.done.wait (%p2098_p2), [#allocation5], 528  }
  0x90   : > { %1672 = vsyncadd (%p2098_p2), [#allocation5], 4294966768 }
  0x91   : > { %1674 = dma.done.wait (%p2098_p2), [#allocation8], 32  }
  0x92   : > { %1676 = vsyncadd (%p2098_p2), [#allocation8], 4294967264  ;;  %vm496_vm0 = vcmask 1043456   ;;  %v1696_v0 = vmov 0.0   ;;  %p444_p5 = scmp.lt.s32.totalorder %s1679_s30, 1  ;;  %vm1697_vm1 = vmmov 0  }
  0x93   : > { %1344 = vmatprep.subr.bf16.mxu0 %v1696_v0  ;;  %1350 = vmatprep.subr.bf16.mxu1 %v1696_v0  ;;  %vm497_vm2 = vcmask 1044480   ;;  %v1698_v1 = vmov 65535   ;;  %v1502_v4 = vld [vmem:[%s2079_s3] sm:$0x1f]   ;;  %vm492_vm3 = vcmask 72704   ;;  %v1966_v12 = vld [vmem:[#allocation6 + $0x8] sm:$0xff]  }
  0x94   : > { %1346 = vmatprep.mubr.msk.bf16.mxu0 %vm1697_vm1, %v1696_v0  ;;  %1352 = vmatprep.mubr.msk.bf16.mxu1 %vm1697_vm1, %v1696_v0  ;;  %v498_v2 = vsel %vm496_vm0, 4294967295, %v1698_v1  ;;  %s2104_s30 = smov (!%p444_p5, %s1679_s30), 1  ;;  %v1503_v5 = vld [vmem:[%s2078_s2] sm:$0x1f]   ;;  %v1972_v13 = vld [vmem:[#allocation6 + $0x10] sm:$0xff]   ;;  %vm664_vm6 = vcmask 523264  }
  0x95   : > { %s1309_s4 = sshll.u32 %s2104_s30, 5  ;;  %s1310_s15 = sshll.u32 %s2104_s30, 3  ;;  %v499_v3 = vsel %vm497_vm2, %v498_v2, 0  ;;  %v1948_v10 = vld [vmem:[#allocation6] sm:$0xff]   ;;  %v1978_v14 = vld [vmem:[#allocation6 + $0x18] sm:$0xff]  }
  0x96   : > { %s461_s27 = scalar_lea.vmem %s2077_s1, %s1310_s15  ;;  %s1940_s18 = scalar_lea.vmem %s2076_s0, %s1309_s4  ;;  %v501_v6 = vand.u32 %v1502_v4, %v499_v3  ;;  %v1942_v7 = vand.u32 %v1503_v5, %v499_v3  ;;  %v1984_v15 = vld [vmem:[#allocation2] ss:$0 sm:$0xff]  ;;  %v1279_v16 = vld [vmem:[#allocation4] ss:$0 sm:$0xff]  ;;  %v2032_v53 = vld [vmem:[#allocation7] ss:$0 sm:$0xff] }
  0x97   : > { %v1504_v8 = vld [vmem:[%s461_s27] sm:$0xff]   ;;  %v1506_v11 = vld [vmem:[%s1940_s18 + $0x8] sm:$0xff]   ;;  %v1511_v51 = vld [vmem:[%s1940_s18 + $0x10] sm:$0xff]   ;;  %s471_s26 = scalar_lea.vmem %s2085_s9, %s1310_s15 }
  0x98   : > { %v1505_v9 = vld [vmem:[%s1940_s18] sm:$0xff]   ;;  %1345 = vmatpush3.bf16.msra.mxu0 %v501_v6  ;;  %1351 = vmatpush3.bf16.msra.mxu1 %v1942_v7  ;;  %v1512_v52 = vld [vmem:[%s1940_s18 + $0x18] sm:$0xff]  }
  0x99   : > { %1368 = vmatprep.subr.bf16.mxu1 %v1696_v0  ;;  %1356 = vmatprep.subr.bf16.mxu0 %v1696_v0  ;;  %v2035_v57 = vld [vmem:[#allocation9] ss:$0 sm:$0xff] }
  0x9b   : > { %1347 = vmatmul.mubr.msk.bf16.vlgmr.msra.gmra.mrb[0].mxu0 %vm492_vm3, %v1504_v8  ;;  %1353 = vmatmul.mubr.msk.bf16.vlgmr.msra.gmra.mrb[0].mxu1 %vm492_vm3, %v1505_v9 }
  0x9c   : > { %1369 = vmatpush3.bf16.msra.mxu1 %v1942_v7  ;;  %1370 = vmatprep.mubr.msk.bf16.mxu1 %vm1697_vm1, %v1696_v0 }
  0x9d   : > { %1357 = vmatpush3.bf16.msra.mxu0 %v1948_v10  ;;  %1374 = vmatprep.subr.bf16.mxu1 %v1696_v0 }
  0x9e   : > { %1358 = vmatprep.subr.bf16.mxu0 %v1696_v0  ;;  %1364 = vmatprep.mubr.msk.bf16.mxu0 %vm1697_vm1, %v1696_v0 }
  0xa1   : > { %1359 = vmatpush3.bf16.msra.mxu0 %v1966_v12 }
  0xa2   : > { %1360 = vmatprep.subr.bf16.mxu0 %v1696_v0 }
  0xa3   : > { %1371 = vmatmul.mubr.msk.bf16.vlgmr.msra.gmra.mrb[4].mxu1 %vm492_vm3, %v1506_v11 }
  0xa4   : > { %1375 = vmatpush3.bf16.msra.mxu1 %v1948_v10  ;;  %1382 = vmatprep.mubr.msk.bf16.mxu1 %vm1697_vm1, %v1696_v0 }
  0xa5   : > { %1376 = vmatprep.subr.bf16.mxu1 %v1696_v0  ;;  %1361 = vmatpush3.bf16.msra.mxu0 %v1972_v13 }
  0xa6   : > { %1362 = vmatprep.subr.bf16.mxu0 %v1696_v0 }
  0xa8   : > { %1377 = vmatpush3.bf16.msra.mxu1 %v1966_v12 }
  0xa9   : > { %1378 = vmatprep.subr.bf16.mxu1 %v1696_v0  ;;  %1363 = vmatpush3.bf16.msra.mxu0 %v1978_v14 }
  0xaa   : > { %1386 = vmatprep.subr.bf16.mxu0 %v1696_v0 }
  0xac   : > { %1379 = vmatpush3.bf16.msra.mxu1 %v1972_v13 }
  0xad   : > { %1380 = vmatprep.subr.bf16.mxu1 %v1696_v0 }
  0xb0   : > { %1381 = vmatpush3.bf16.msra.mxu1 %v1978_v14 }
  0xb1   : > { %1404 = vmatprep.subr.bf16.mxu1 %v1696_v0 }
 0x16e   : > { %v537_v17 = vpop.f32.mrb[0].mxu0  ;;  %v622_v18 = vpop.f32.mrb[0].mxu1 }
 0x16f   : > { %v550_v19 = vmul.f32 %v1984_v15, %v537_v17  ;;  %v1348_v20 = vpop.f32.mrb[1].mxu0  ;;  %v1354_v21 = vpop.f32.mrb[1].mxu1  ;;  %v629_v25 = vmul.f32 %v1984_v15, %v622_v18 }
 0x170   : > { %v540_v22 = vpop.f32.mrb[2].mxu0  ;;  %v625_v23 = vpop.f32.mrb[2].mxu1 }
 0x171   : > { %v1987_v24 = vadd.f32 %v1279_v16, %v550_v19  ;;  %v551_v26 = vmul.f32 %v1984_v15, %v540_v22  ;;  %v1355_v27 = vpop.f32.mrb[3].mxu1  ;;  %v1349_v28 = vpop.f32.mrb[3].mxu0  ;;  %v630_v31 = vmul.f32 %v1984_v15, %v625_v23 }
 0x173   : > { %v631_v29 = vadd.f32 %v629_v25, %v1987_v24  ;;  %v1992_v30 = vadd.f32 %v1279_v16, %v551_v26 }
 0x175   : > { %v635_v32 = vmul.f32 0.2, %v631_v29  ;;  %v632_v33 = vadd.f32 %v630_v31, %v1992_v30  ;;  %vm633_vm4 = vcmp.ge.f32.partialorder %v631_v29, 0.0 }
 0x176   : > { %v776_v34 = vpop.f32.mrb[4].mxu1 }
 0x177   : > { %vm634_vm5 = vcmp.ge.f32.partialorder %v632_v33, 0.0  ;;  %v636_v35 = vmul.f32 0.2, %v632_v33  ;;  %v783_v36 = vmul.f32 %v1984_v15, %v776_v34  ;;  %v1372_v37 = vpop.f32.mrb[5].mxu1  ;;  %v637_v39 = vsel %vm633_vm4, %v631_v29, %v635_v32 }
 0x178   : > { %v779_v38 = vpop.f32.mrb[6].mxu1 }
 0x179   : > { %v638_v40 = vsel %vm634_vm5, %v632_v33, %v636_v35  ;;  %v785_v41 = vadd.f32 %v783_v36, %v1987_v24  ;;  %v784_v42 = vmul.f32 %v1984_v15, %v779_v38  ;;  %v1373_v43 = vpop.f32.mrb[7].mxu1  ;;  %vm1096_vm5 = vcmask 519168  }
 0x17a   : > { %v639_v44 = vpack.c.bf16 %v638_v40, %v637_v39 }
 0x17b   : > { %v789_v45 = vmul.f32 0.2, %v785_v41  ;;  %v786_v46 = vadd.f32 %v784_v42, %v1992_v30  ;;  %vm787_vm7 = vcmp.ge.f32.partialorder %v785_v41, 0.0 }
 0x17c   : > { %1365 = vmatmul.mubr.msk.bf16.vlgmr.msra.gmra.mrb[4].mxu0 %vm664_vm6, %v639_v44 }
 0x17d   : > { %vm788_vm8 = vcmp.ge.f32.partialorder %v786_v46, 0.0  ;;  %v790_v47 = vmul.f32 0.2, %v786_v46  ;;  %1387 = vmatpush3.bf16.msra.mxu0 %v1942_v7  ;;  %1388 = vmatprep.mubr.msk.bf16.mxu0 %vm1697_vm1, %v1696_v0  ;;  %v791_v48 = vsel %vm787_vm7, %v785_v41, %v789_v45 }
 0x17e   : > { %1392 = vmatprep.subr.bf16.mxu0 %v1696_v0 }
 0x17f   : > { %v792_v49 = vsel %vm788_vm8, %v786_v46, %v790_v47 }
 0x180   : > { %v793_v50 = vpack.c.bf16 %v792_v49, %v791_v48 }
 0x182   : > { %1383 = vmatmul.mubr.msk.bf16.vlgmr.msra.gmra.mrb[8].mxu1 %vm664_vm6, %v793_v50 }
 0x183   : > { %1405 = vmatpush3.bf16.msra.mxu1 %v1942_v7  ;;  %1406 = vmatprep.mubr.msk.bf16.mxu1 %vm1697_vm1, %v1696_v0 }
 0x184   : > { %1389 = vmatmul.mubr.msk.bf16.vlgmr.msra.gmra.mrb[8].mxu0 %vm492_vm3, %v1511_v51  ;;  %1410 = vmatprep.subr.bf16.mxu1 %v1696_v0 }
 0x185   : > { %1393 = vmatpush3.bf16.msra.mxu0 %v1948_v10  ;;  %1400 = vmatprep.mubr.msk.bf16.mxu0 %vm1697_vm1, %v1696_v0 }
 0x186   : > { %1394 = vmatprep.subr.bf16.mxu0 %v1696_v0 }
 0x189   : > { %1395 = vmatpush3.bf16.msra.mxu0 %v1966_v12 }
 0x18a   : > { %1407 = vmatmul.mubr.msk.bf16.vlgmr.msra.gmra.mrb[12].mxu1 %vm492_vm3, %v1512_v52  ;;  %1396 = vmatprep.subr.bf16.mxu0 %v1696_v0 }
 0x18b   : > { %1411 = vmatpush3.bf16.msra.mxu1 %v1948_v10  ;;  %1418 = vmatprep.mubr.msk.bf16.mxu1 %vm1697_vm1, %v1696_v0 }
 0x18c   : > { %1412 = vmatprep.subr.bf16.mxu1 %v1696_v0 }
 0x18d   : > { %1397 = vmatpush3.bf16.msra.mxu0 %v1972_v13 }
 0x18e   : > { %1398 = vmatprep.subr.bf16.mxu0 %v1696_v0 }
 0x18f   : > { %1413 = vmatpush3.bf16.msra.mxu1 %v1966_v12 }
 0x190   : > { %1414 = vmatprep.subr.bf16.mxu1 %v1696_v0 }
 0x191   : > { %1399 = vmatpush3.bf16.msra.mxu0 %v1978_v14 }
 0x193   : > { %1415 = vmatpush3.bf16.msra.mxu1 %v1972_v13 }
 0x194   : > { %1416 = vmatprep.subr.bf16.mxu1 %v1696_v0 }
 0x197   : > { %1417 = vmatpush3.bf16.msra.mxu1 %v1978_v14 }
 0x24f   : > { %v702_v54 = vpop.f32.mrb[4].mxu0 }
 0x250   : > { %v715_v55 = vmul.f32 %v2032_v53, %v702_v54  ;;  %v1366_v56 = vpop.f32.mrb[5].mxu0 }
 0x251   : > { %v705_v58 = vpop.f32.mrb[6].mxu0 }
 0x252   : > { %v716_v59 = vmul.f32 %v2032_v53, %v705_v58  ;;  %v1367_v60 = vpop.f32.mrb[7].mxu0  ;;  %v723_v61 = vadd.f32 %v2035_v57, %v715_v55 }
 0x254   : > { %v724_v62 = vadd.f32 %v2035_v57, %v716_v59  ;;  %v727_v4 = vmul.f32 0.2, %v723_v61  ;;  %vm725_vm9 = vcmp.ge.f32.partialorder %v723_v61, 0.0 }
 0x255   : > { %v831_v63 = vpop.f32.mrb[8].mxu1 }
 0x256   : > { %v838_v0 = vmul.f32 %v2032_v53, %v831_v63  ;;  %v1384_v1 = vpop.f32.mrb[9].mxu1  ;;  %v728_v10 = vmul.f32 0.2, %v724_v62  ;;  %vm726_vm11 = vcmp.ge.f32.partialorder %v724_v62, 0.0  ;;  %v729_v18 = vsel %vm725_vm9, %v723_v61, %v727_v4 }
 0x257   : > { %v834_v2 = vpop.f32.mrb[10].mxu1  ;;  %v895_v3 = vpop.f32.mrb[8].mxu0 }
 0x258   : > { %v840_v5 = vadd.f32 %v2035_v57, %v838_v0  ;;  %v839_v6 = vmul.f32 %v2032_v53, %v834_v2  ;;  %v902_v7 = vmul.f32 %v1984_v15, %v895_v3  ;;  %v1385_v8 = vpop.f32.mrb[11].mxu1  ;;  %v1390_v9 = vpop.f32.mrb[9].mxu0  ;;  %v730_v26 = vsel %vm726_vm11, %v724_v62, %v728_v10 }
 0x259   : > { %v898_v11 = vpop.f32.mrb[10].mxu0 }
 0x25a   : > { %vm842_vm10 = vcmp.ge.f32.partialorder %v840_v5, 0.0  ;;  %v844_v12 = vmul.f32 0.2, %v840_v5  ;;  %v841_v13 = vadd.f32 %v2035_v57, %v839_v6  ;;  %v904_v14 = vadd.f32 %v902_v7, %v1987_v24  ;;  %v1391_v16 = vpop.f32.mrb[11].mxu0 }
 0x25b   : > { %v903_v17 = vmul.f32 %v1984_v15, %v898_v11 }
 0x25c   : > { %v846_v19 = vsel %vm842_vm10, %v840_v5, %v844_v12  ;;  %vm843_vm12 = vcmp.ge.f32.partialorder %v841_v13, 0.0  ;;  %v845_v20 = vmul.f32 0.2, %v841_v13  ;;  %v908_v22 = vmul.f32 0.2, %v904_v14 }
 0x25d   : > { %v848_v21 = vmax.f32 %v729_v18, %v846_v19  ;;  %v905_v23 = vadd.f32 %v903_v17, %v1992_v30  ;;  %v1014_v25 = vpop.f32.mrb[12].mxu1  ;;  %vm906_vm13 = vcmp.ge.f32.partialorder %v904_v14, 0.0 }
 0x25e   : > { %v847_v27 = vsel %vm843_vm12, %v841_v13, %v845_v20  ;;  %v1021_v28 = vmul.f32 %v1984_v15, %v1014_v25  ;;  %v1408_v29 = vpop.f32.mrb[13].mxu1  ;;  %v910_v37 = vsel %vm906_vm13, %v904_v14, %v908_v22 }
 0x25f   : > { %v849_v31 = vmax.f32 %v730_v26, %v847_v27  ;;  %vm907_vm14 = vcmp.ge.f32.partialorder %v905_v23, 0.0  ;;  %v909_v32 = vmul.f32 0.2, %v905_v23  ;;  %v1017_v33 = vpop.f32.mrb[14].mxu1 }
 0x260   : > { %v1023_v34 = vadd.f32 %v1021_v28, %v1987_v24  ;;  %v1022_v35 = vmul.f32 %v1984_v15, %v1017_v33  ;;  %v1409_v36 = vpop.f32.mrb[15].mxu1 }
 0x261   : > { %v911_v38 = vsel %vm907_vm14, %v905_v23, %v909_v32 }
 0x262   : > { %v912_v39 = vpack.c.bf16 %v911_v38, %v910_v37  ;;  %v1027_v40 = vmul.f32 0.2, %v1023_v34  ;;  %v1024_v41 = vadd.f32 %v1022_v35, %v1992_v30  ;;  %vm1025_vm15 = vcmp.ge.f32.partialorder %v1023_v34, 0.0 }
 0x264   : > { %vm1026_vm0 = vcmp.ge.f32.partialorder %v1024_v41, 0.0  ;;  %v1028_v42 = vmul.f32 0.2, %v1024_v41  ;;  %1401 = vmatmul.mubr.msk.bf16.vlgmr.msra.gmra.mrb[12].mxu0 %vm664_vm6, %v912_v39  ;;  %v1029_v43 = vsel %vm1025_vm15, %v1023_v34, %v1027_v40 }
 0x266   : > { %v1030_v44 = vsel %vm1026_vm0, %v1024_v41, %v1028_v42 }
 0x267   : > { %v1031_v45 = vpack.c.bf16 %v1030_v44, %v1029_v43 }
 0x269   : > { %1419 = vmatmul.mubr.msk.bf16.vlgmr.msra.gmra.mrb[16].mxu1 %vm664_vm6, %v1031_v45 }
 0x337   : > { %v950_v24 = vpop.f32.mrb[12].mxu0 }
 0x338   : > { %v957_v15 = vmul.f32 %v2032_v53, %v950_v24  ;;  %v1402_v46 = vpop.f32.mrb[13].mxu0 }
 0x339   : > { %v953_v47 = vpop.f32.mrb[14].mxu0 }
 0x33a   : > { %v959_v48 = vadd.f32 %v2035_v57, %v957_v15  ;;  %v958_v49 = vmul.f32 %v2032_v53, %v953_v47  ;;  %v1403_v30 = vpop.f32.mrb[15].mxu0 }
 0x33c   : > { %vm961_vm1 = vcmp.ge.f32.partialorder %v959_v48, 0.0  ;;  %v963_v50 = vmul.f32 0.2, %v959_v48  ;;  %v960_v51 = vadd.f32 %v2035_v57, %v958_v49  ;;  %v1069_v52 = vpop.f32.mrb[16].mxu1 }
 0x33d   : > { %v1076_v54 = vmul.f32 %v2032_v53, %v1069_v52  ;;  %v1420_v55 = vpop.f32.mrb[17].mxu1 }
 0x33e   : > { %v965_v56 = vsel %vm961_vm1, %v959_v48, %v963_v50  ;;  %vm962_vm2 = vcmp.ge.f32.partialorder %v960_v51, 0.0  ;;  %v964_v58 = vmul.f32 0.2, %v960_v51  ;;  %v1072_v59 = vpop.f32.mrb[18].mxu1 }
 0x33f   : > { %v967_v60 = vmax.f32 %v848_v21, %v965_v56  ;;  %v1078_v61 = vadd.f32 %v2035_v57, %v1076_v54  ;;  %v1077_v62 = vmul.f32 %v2032_v53, %v1072_v59  ;;  %v1421_v63 = vpop.f32.mrb[19].mxu1 }
 0x340   : > { %v966_v0 = vsel %vm962_vm2, %v960_v51, %v964_v58 }
 0x341   : > { %v968_v1 = vmax.f32 %v849_v31, %v966_v0  ;;  %vm1080_vm3 = vcmp.ge.f32.partialorder %v1078_v61, 0.0  ;;  %v1082_v2 = vmul.f32 0.2, %v1078_v61  ;;  %v1079_v3 = vadd.f32 %v2035_v57, %v1077_v62 }
 0x343   : > { %v1084_v4 = vsel %vm1080_vm3, %v1078_v61, %v1082_v2  ;;  %vm1081_vm4 = vcmp.ge.f32.partialorder %v1079_v3, 0.0  ;;  %v1083_v5 = vmul.f32 0.2, %v1079_v3 }
 0x344   : > { %v1086_v6 = vmax.f32 %v967_v60, %v1084_v4 }
 0x345   : > { %v1085_v7 = vsel %vm1081_vm4, %v1079_v3, %v1083_v5 }
 0x346   : > { %v1312_v8 = vpack.c.bf16 %v1086_v6, %v1086_v6  ;;  %v1087_v53 = vmax.f32 %v968_v1, %v1085_v7 }
 0x348   : > { %1097 = vst.msk [vmem:[%s471_s26] sm:$0xf] %vm1096_vm5, %v1312_v8  ;;  %v1313_v9 = vpack.c.bf16 %v1087_v53, %v1087_v53 }
 0x34a   : > { %1098 = vst.msk [vmem:[%s471_s26 + $0x4] sm:$0xf] %vm1096_vm5, %v1313_v9 }
 0x34b PF: > { %s22_s11 = sadd.s32 1, %s1687_s11   ;;  %s2099_s30 = smov %s1683_s10 }
 0x34c   : > { %p19_p8 = scmp.ge.s32.totalorder %s22_s11, 4   ;;  %s2100_s10 = smov %s2102_s20 }
 0x34e   :  { %21 = sbr.rel (!%p19_p8) target bundleno = 6 (0x6), region = 113 }
 0x355   :  { %1129 = vsyncpa [#allocation3], 1 }
 0x356   :  { %1131 = vsyncpa [#allocation3 + $0x1], 1 }
 0x357   :  { %1132 = vsyncpa [#allocation5], 1 }
 0x358   :  { %1133 = vsyncpa [#allocation8], 1 }

// kernel: dgcnn_semseg_forward.10
= control target key start
LH: loop header
LB: loop body
LE: loop exit
PB: predicated region body
PF: predicated region fallthrough
CT: control target
= control target key end

     0   :  { %s568_s9 = smov 0   ;;  %s570_s10 = smov 0   ;;  %s616_s0 = inlined_call_operand.vmem [shape: bf16[2,16,64], index: 0, kind: input, shape index: {}, may-alias: {0,1}]   ;;  %s617_s1 = inlined_call_operand.vmem [shape: bf16[2,16,64], index: 1, kind: input, shape index: {}, may-alias: {0,1}]   ;;  %s618_s2 = inlined_call_operand.vmem [shape: f32[2,16,16], index: 2, kind: output, shape index: {}]  }
   0x1   :  { %s572_s11 = smov 0  }
   0x2 LB: > { %s24_s12 = sadd.s32 1, %s547_s10  ;;  %p463_p0 = scmp.ge.s32.totalorder %s551_s11, 1  ;;  %s551_s11 = sphi %s572_s11, %s12_s11   ;;  %s547_s10 = sphi %s570_s10, %s620_s10   ;;  %s543_s9 = sphi %s568_s9, %s619_s9  }
   0x3   : > { %p26_p1 = scmp.ge.s32.totalorder %s24_s12, 2  ;;  %p143_p2 = scmp.lt.s32.totalorder %s551_s11, 3 }
   0x5   : > { %s622_s12 = smov (%p26_p1, %s24_s12), 0  ;;  %p144_p3 = pnand %p463_p0, %p143_p2 }
   0x6   : > { %p179_p4 = scmp.lt.s32.totalorder (!%p144_p3), %s543_s9, 1  ;;  %vm213_vm0 = vcmask (!%p144_p3), 523264   ;;  %v351_v18 = vlaneseq (!%p144_p3)  ;;  %vm357_vm2 = vcmask (!%p144_p3), 130048  }
   0x7   : > { %147 = sbr.rel (%p144_p3) target bundleno = 299 (0x12b), region = 28  ;;  %vm499_vm1 = vmpackc.low (!%p144_p3), %vm213_vm0, %vm213_vm0 }
   0x8   : > { %v352_v20 = vshrl.u32 (!%p144_p3), %v351_v18, 7 }
   0xa   : > { %v353_v24 = vsub.s32 (!%p144_p3), 0, %v352_v20 }
   0xe   : > { %s624_s9 = smov (!%p179_p4, %s543_s9), 1 }
   0xf   : > { %s476_s13 = sshll.u32 %s624_s9, 3  ;;  %s478_s20 = sshll.u32 %s624_s9, 4 }
  0x10   : > { %s192_s16 = scalar_lea.vmem %s617_s1, %s476_s13  ;;  %s186_s19 = scalar_lea.vmem %s616_s0, %s476_s13 }
  0x11   : > { %v484_v0 = vld [vmem:[%s192_s16] sm:$0xff]   ;;  %s201_s23 = scalar_lea.vmem %s618_s2, %s478_s20 }
  0x12   : > { %v480_v1 = vld [vmem:[%s186_s19] sm:$0xff]   ;;  %v485_v2 = vunpack.c.l.bf16 %v484_v0  ;;  %v486_v3 = vunpack.c.h.bf16 %v484_v0  ;;  %500 = vmatprep.subr.msk.bf16.mxu0 %vm499_vm1, %v484_v0 }
  0x13   : > { %v481_v4 = vunpack.c.l.bf16 %v480_v1  ;;  %v482_v5 = vunpack.c.h.bf16 %v480_v1  ;;  %503 = vmatpush3.bf16.xpose.msk.msra.mxu0 %vm499_vm1, %v484_v0 }
  0x14   : > { %v220_v6 = vmul.f32 %v485_v2, %v485_v2  ;;  %v221_v7 = vmul.f32 %v486_v3, %v486_v3 }
  0x15   : > { %495 = vmatprep.mubr.msk.f32.mxu0 %vm213_vm0, %v481_v4  ;;  %v211_v8 = vmul.f32 %v481_v4, %v481_v4  ;;  %v212_v9 = vmul.f32 %v482_v5, %v482_v5 }
  0x16   : > { %v222_v10 = vsel %vm213_vm0, %v220_v6, 0.0  ;;  %v225_v12 = vsel %vm213_vm0, %v221_v7, 0.0 }
  0x17   : > { %v214_v11 = vsel %vm213_vm0, %v211_v8, 0.0  ;;  %223 = vadd.xlane.f32.xlu0 %v222_v10  ;;  %v217_v13 = vsel %vm213_vm0, %v212_v9, 0.0 }
  0x18   : > { %215 = vadd.xlane.f32.xlu1 %v214_v11 }
  0x1a   : > { %496 = vmatmul.mubr.msk.f32.vlgmr.msra.gmra.mrb[0].mxu0 %vm213_vm0, %v482_v5 }
  0x1b   : > { %226 = vadd.xlane.f32.xlu0 %v225_v12 }
  0x1c   : > { %218 = vadd.xlane.f32.xlu1 %v217_v13 }
  0xa4   : > { %v224_v14 = vpop.xlane.xlu0 %223 }
  0xa5   : > { %319 = vxpose.xlu0.b32.start [1/2] (short) (narrow) %v224_v14, 8  ;;  %v216_v19 = vpop.xlane.xlu1 %215 }
  0xa8   : > { %v227_v15 = vpop.xlane.xlu0 %226 }
  0xa9   : > { %320 = vxpose.xlu0.b32.end [2/2] (short) (narrow) %v227_v15, 8  ;;  %v219_v22 = vpop.xlane.xlu1 %218 }
  0xed   : > { %v497_v16 = vpop.f32.mrb[0].mxu0 }
  0xee   : > { %v306_v17 = vpop.f32.mrb[1].mxu0  ;;  %v316_v21 = vmul.f32 2.0, %v497_v16 }
  0xef   : > { %v315_v23 = vmul.f32 2.0, %v306_v17 }
  0xf0   : > { %v318_v25 = vsub.f32 %v316_v21, %v219_v22 }
  0xf1   : > { %v317_v27 = vsub.f32 %v315_v23, %v216_v19 }
 0x125   : > { %v335_v26 = vpop.trf.xlu0 }
 0x126   : > { %v354_v28 = vrot.slane %v335_v26, %v353_v24 }
 0x128   : > { %v355_v29 = vsub.f32 %v317_v27, %v354_v28  ;;  %v356_v30 = vsub.f32 %v318_v25, %v354_v28 }
 0x12a   : > { %358 = vst.msk [vmem:[%s201_s23] sm:$0xff] %vm357_vm2, %v355_v29  ;;  %359 = vst.msk [vmem:[%s201_s23 + $0x8] sm:$0xff] %vm357_vm2, %v356_v30 }
 0x12b PF: > { %s12_s11 = sadd.s32 1, %s551_s11   ;;  %s619_s9 = smov %s547_s10 }
 0x12c   : > { %p9_p5 = scmp.ge.s32.totalorder %s12_s11, 4   ;;  %s620_s10 = smov %s622_s12 }
 0x12e   :  { %11 = sbr.rel (!%p9_p5) target bundleno = 2 (0x2), region = 61 }

// kernel: dgcnn_semseg_forward.13
= control target key start
LH: loop header
LB: loop body
LE: loop exit
PB: predicated region body
PF: predicated region fallthrough
CT: control target
= control target key end

     0   :  { %s1062_s21 = smov 0   ;;  %s1064_s22 = smov 0   ;;  %s1177_s0 = inlined_call_operand.vmem [shape: bf16[2,4,16,64], index: 0, kind: input, shape index: {}]   ;;  %s1178_s1 = inlined_call_operand.vmem [shape: bf16[2,16,64], index: 1, kind: input, shape index: {}]   ;;  %s1179_s2 = inlined_call_operand.vmem [shape: bf16[64,64], index: 2, kind: input, shape index: {}]   ;;  %s1180_s3 = inlined_call_operand.vmem [shape: bf16[64,64], index: 3, kind: input, shape index: {}]   ;;  %s1181_s4 = inlined_call_operand.vmem [shape: f32[1,64], index: 4, kind: input, shape index: {}]   ;;  %s1182_s5 = inlined_call_operand.vmem [shape: f32[1,64], index: 5, kind: input, shape index: {}]   ;;  %s1183_s6 = inlined_call_operand.vmem [shape: bf16[2,16,64], index: 6, kind: output, shape index: {}]  }
   0x1   :  { %s1066_s23 = smov 0  }
   0x2 LB: > { %s28_s24 = sadd.s32 1, %s1019_s22  ;;  %p835_p0 = scmp.ge.s32.totalorder %s1023_s23, 1  ;;  %s1023_s23 = sphi %s1066_s23, %s16_s23   ;;  %s1019_s22 = sphi %s1064_s22, %s1185_s22   ;;  %s1015_s21 = sphi %s1062_s21, %s1184_s21  }
   0x3   : > { %p30_p1 = scmp.ge.s32.totalorder %s28_s24, 2  ;;  %p250_p2 = scmp.lt.s32.totalorder %s1023_s23, 3 }
   0x5   : > { %s1187_s24 = smov (%p30_p1, %s28_s24), 0  ;;  %p251_p3 = pnand %p835_p0, %p250_p2 }
   0x6   : > { %v988_v0 = vld [vmem:[%s1180_s3] sm:$0xff] (!%p251_p3)   ;;  %v1025_v1 = vmov (!%p251_p3), 0.0   ;;  %v990_v3 = vld [vmem:[%s1180_s3 + $0x8] sm:$0xff] (!%p251_p3)   ;;  %vm1026_vm0 = vmmov (!%p251_p3), 0   ;;  %p298_p4 = scmp.lt.s32.totalorder (!%p251_p3), %s1015_s21, 1  ;;  %v992_v5 = vld [vmem:[%s1180_s3 + $0x10] sm:$0xff] (!%p251_p3)  }
   0x7   : > { %254 = sbr.rel (%p251_p3) target bundleno = 281 (0x119), region = 44  ;;  %902 = vmatprep.subr.bf16.mxu0 (!%p251_p3), %v1025_v1  ;;  %914 = vmatprep.subr.bf16.mxu1 (!%p251_p3), %v1025_v1  ;;  %v989_v2 = vld [vmem:[%s1179_s2] sm:$0xff] (!%p251_p3)   ;;  %v991_v4 = vld [vmem:[%s1179_s2 + $0x8] sm:$0xff] (!%p251_p3)   ;;  %v993_v6 = vld [vmem:[%s1179_s2 + $0x10] sm:$0xff] (!%p251_p3)   ;;  %vm377_vm1 = vcmask (!%p251_p3), 523264   ;;  %vm723_vm10 = vcmask (!%p251_p3), 519168  }
   0x8   : > { %903 = vmatpush3.bf16.msra.mxu0 (!%p251_p3), %v988_v0  ;;  %910 = vmatprep.mubr.msk.bf16.mxu0 (!%p251_p3), %vm1026_vm0, %v1025_v1  ;;  %v994_v7 = vld [vmem:[%s1180_s3 + $0x18] sm:$0xff] (!%p251_p3)   ;;  %v848_v14 = vld [vmem:[%s1181_s4] ss:$0 sm:$0xff] (!%p251_p3) }
   0x9   : > { %915 = vmatpush3.bf16.msra.mxu1 (!%p251_p3), %v989_v2  ;;  %904 = vmatprep.subr.bf16.mxu0 (!%p251_p3), %v1025_v1  ;;  %v995_v8 = vld [vmem:[%s1179_s2 + $0x18] sm:$0xff] (!%p251_p3)   ;;  %v849_v15 = vld [vmem:[%s1182_s5] ss:$0 sm:$0xff] (!%p251_p3) }
   0xa   : > { %916 = vmatprep.subr.bf16.mxu1 (!%p251_p3), %v1025_v1  ;;  %922 = vmatprep.mubr.msk.bf16.mxu1 (!%p251_p3), %vm1026_vm0, %v1025_v1 }
   0xc   : > { %905 = vmatpush3.bf16.msra.mxu0 (!%p251_p3), %v990_v3 }
   0xd   : > { %917 = vmatpush3.bf16.msra.mxu1 (!%p251_p3), %v991_v4  ;;  %906 = vmatprep.subr.bf16.mxu0 (!%p251_p3), %v1025_v1 }
   0xe   : > { %s1189_s21 = smov (!%p298_p4, %s1015_s21), 1  ;;  %918 = vmatprep.subr.bf16.mxu1 %v1025_v1 }
   0xf   : > { %s872_s11 = sshll.u32 %s1189_s21, 5  ;;  %s873_s17 = sshll.u32 %s1189_s21, 3 }
  0x10   : > { %s1113_s16 = scalar_lea.vmem %s1177_s0, %s872_s11  ;;  %s315_s20 = scalar_lea.vmem %s1178_s1, %s873_s17  ;;  %907 = vmatpush3.bf16.msra.mxu0 %v992_v5 }
  0x11   : > { %919 = vmatpush3.bf16.msra.mxu1 %v993_v6  ;;  %908 = vmatprep.subr.bf16.mxu0 %v1025_v1  ;;  %v996_v9 = vld [vmem:[%s315_s20] sm:$0xff]   ;;  %v998_v11 = vld [vmem:[%s1113_s16 + $0x8] sm:$0xff]   ;;  %v999_v12 = vld [vmem:[%s1113_s16 + $0x10] sm:$0xff]   ;;  %s325_s11 = scalar_lea.vmem %s1183_s6, %s873_s17 }
  0x12   : > { %920 = vmatprep.subr.bf16.mxu1 %v1025_v1  ;;  %v997_v10 = vld [vmem:[%s1113_s16] sm:$0xff]   ;;  %v1000_v13 = vld [vmem:[%s1113_s16 + $0x18] sm:$0xff]  }
  0x14   : > { %909 = vmatpush3.bf16.msra.mxu0 %v994_v7 }
  0x15   : > { %921 = vmatpush3.bf16.msra.mxu1 %v995_v8  ;;  %926 = vmatprep.subr.bf16.mxu0 %v1025_v1 }
  0x16   : > { %938 = vmatprep.subr.bf16.mxu1 %v1025_v1 }
  0x17   : > { %911 = vmatmul.mubr.msk.bf16.vlgmr.msra.gmra.mrb[0].mxu0 %vm377_vm1, %v996_v9 }
  0x18   : > { %923 = vmatmul.mubr.msk.bf16.vlgmr.msra.gmra.mrb[0].mxu1 %vm377_vm1, %v997_v10  ;;  %927 = vmatpush3.bf16.msra.mxu0 %v989_v2 }
  0x19   : > { %939 = vmatpush3.bf16.msra.mxu1 %v989_v2  ;;  %928 = vmatprep.subr.bf16.mxu0 %v1025_v1 }
  0x1a   : > { %940 = vmatprep.subr.bf16.mxu1 %v1025_v1  ;;  %934 = vmatprep.mubr.msk.bf16.mxu0 %vm1026_vm0, %v1025_v1 }
  0x1b   : > { %946 = vmatprep.mubr.msk.bf16.mxu1 %vm1026_vm0, %v1025_v1 }
  0x1c   : > { %929 = vmatpush3.bf16.msra.mxu0 %v991_v4 }
  0x1d   : > { %941 = vmatpush3.bf16.msra.mxu1 %v991_v4  ;;  %930 = vmatprep.subr.bf16.mxu0 %v1025_v1 }
  0x1e   : > { %942 = vmatprep.subr.bf16.mxu1 %v1025_v1 }
  0x20   : > { %931 = vmatpush3.bf16.msra.mxu0 %v993_v6 }
  0x21   : > { %943 = vmatpush3.bf16.msra.mxu1 %v993_v6  ;;  %932 = vmatprep.subr.bf16.mxu0 %v1025_v1 }
  0x22   : > { %944 = vmatprep.subr.bf16.mxu1 %v1025_v1 }
  0x24   : > { %933 = vmatpush3.bf16.msra.mxu0 %v995_v8 }
  0x25   : > { %945 = vmatpush3.bf16.msra.mxu1 %v995_v8  ;;  %950 = vmatprep.subr.bf16.mxu0 %v1025_v1 }
  0x27   : > { %935 = vmatmul.mubr.msk.bf16.vlgmr.msra.gmra.mrb[4].mxu0 %vm377_vm1, %v998_v11 }
  0x28   : > { %947 = vmatmul.mubr.msk.bf16.vlgmr.msra.gmra.mrb[4].mxu1 %vm377_vm1, %v999_v12  ;;  %951 = vmatpush3.bf16.msra.mxu0 %v989_v2 }
  0x29   : > { %952 = vmatprep.subr.bf16.mxu0 %v1025_v1  ;;  %958 = vmatprep.mubr.msk.bf16.mxu0 %vm1026_vm0, %v1025_v1 }
  0x2c   : > { %953 = vmatpush3.bf16.msra.mxu0 %v991_v4 }
  0x2d   : > { %954 = vmatprep.subr.bf16.mxu0 %v1025_v1 }
  0x30   : > { %955 = vmatpush3.bf16.msra.mxu0 %v993_v6 }
  0x31   : > { %956 = vmatprep.subr.bf16.mxu0 %v1025_v1 }
  0x34   : > { %957 = vmatpush3.bf16.msra.mxu0 %v995_v8 }
  0x37   : > { %959 = vmatmul.mubr.msk.bf16.vlgmr.msra.gmra.mrb[8].mxu0 %vm377_vm1, %v1000_v13 }
  0xea   : > { %v415_v16 = vpop.f32.mrb[0].mxu0 }
  0xeb   : > { %v428_v17 = vmul.f32 %v848_v14, %v415_v16  ;;  %v912_v18 = vpop.f32.mrb[1].mxu0  ;;  %v506_v19 = vpop.f32.mrb[0].mxu1 }
  0xec   : > { %v418_v20 = vpop.f32.mrb[2].mxu0  ;;  %v513_v21 = vmul.f32 %v848_v14, %v506_v19  ;;  %v924_v22 = vpop.f32.mrb[1].mxu1 }
  0xed   : > { %v436_v23 = vadd.f32 %v849_v15, %v428_v17  ;;  %v429_v24 = vmul.f32 %v848_v14, %v418_v20  ;;  %v913_v25 = vpop.f32.mrb[3].mxu0  ;;  %v509_v26 = vpop.f32.mrb[2].mxu1 }
  0xee   : > { %v514_v27 = vmul.f32 %v848_v14, %v509_v26  ;;  %v925_v28 = vpop.f32.mrb[3].mxu1 }
  0xef   : > { %v437_v29 = vadd.f32 %v849_v15, %v429_v24  ;;  %v515_v30 = vadd.f32 %v513_v21, %v436_v23 }
  0xf1   : > { %v516_v31 = vadd.f32 %v514_v27, %v437_v29  ;;  %v519_v39 = vmul.f32 0.2, %v515_v30  ;;  %vm517_vm2 = vcmp.ge.f32.partialorder %v515_v30, 0.0 }
  0xf3   : > { %v520_v47 = vmul.f32 0.2, %v516_v31  ;;  %vm518_vm4 = vcmp.ge.f32.partialorder %v516_v31, 0.0  ;;  %v521_v52 = vsel %vm517_vm2, %v515_v30, %v519_v39 }
  0xf5   : > { %v522_v57 = vsel %vm518_vm4, %v516_v31, %v520_v47 }
  0xfa   : > { %v568_v32 = vpop.f32.mrb[4].mxu0 }
  0xfb   : > { %v575_v33 = vmul.f32 %v848_v14, %v568_v32  ;;  %v632_v34 = vpop.f32.mrb[4].mxu1  ;;  %v936_v35 = vpop.f32.mrb[5].mxu0 }
  0xfc   : > { %v639_v36 = vmul.f32 %v848_v14, %v632_v34  ;;  %v948_v37 = vpop.f32.mrb[5].mxu1  ;;  %v571_v38 = vpop.f32.mrb[6].mxu0 }
  0xfd   : > { %v577_v40 = vadd.f32 %v575_v33, %v436_v23  ;;  %v576_v41 = vmul.f32 %v848_v14, %v571_v38  ;;  %v635_v42 = vpop.f32.mrb[6].mxu1  ;;  %v937_v43 = vpop.f32.mrb[7].mxu0 }
  0xfe   : > { %v641_v44 = vadd.f32 %v639_v36, %v436_v23  ;;  %v640_v45 = vmul.f32 %v848_v14, %v635_v42  ;;  %v949_v46 = vpop.f32.mrb[7].mxu1 }
  0xff   : > { %vm579_vm3 = vcmp.ge.f32.partialorder %v577_v40, 0.0  ;;  %v581_v48 = vmul.f32 0.2, %v577_v40  ;;  %v578_v49 = vadd.f32 %v576_v41, %v437_v29 }
 0x100   : > { %vm643_vm5 = vcmp.ge.f32.partialorder %v641_v44, 0.0  ;;  %v645_v50 = vmul.f32 0.2, %v641_v44  ;;  %v642_v51 = vadd.f32 %v640_v45, %v437_v29 }
 0x101   : > { %v583_v53 = vsel %vm579_vm3, %v577_v40, %v581_v48  ;;  %vm580_vm6 = vcmp.ge.f32.partialorder %v578_v49, 0.0  ;;  %v582_v54 = vmul.f32 0.2, %v578_v49 }
 0x102   : > { %v585_v55 = vmax.f32 %v521_v52, %v583_v53  ;;  %vm644_vm7 = vcmp.ge.f32.partialorder %v642_v51, 0.0  ;;  %v646_v56 = vmul.f32 0.2, %v642_v51  ;;  %v647_v58 = vsel %vm643_vm5, %v641_v44, %v645_v50 }
 0x103   : > { %v584_v59 = vsel %vm580_vm6, %v578_v49, %v582_v54 }
 0x104   : > { %v649_v60 = vmax.f32 %v585_v55, %v647_v58  ;;  %v586_v61 = vmax.f32 %v522_v57, %v584_v59  ;;  %v648_v62 = vsel %vm644_vm7, %v642_v51, %v646_v56 }
 0x106   : > { %v650_v63 = vmax.f32 %v586_v61, %v648_v62 }
 0x10a   : > { %v696_v0 = vpop.f32.mrb[8].mxu0 }
 0x10b   : > { %v703_v1 = vmul.f32 %v848_v14, %v696_v0  ;;  %v960_v2 = vpop.f32.mrb[9].mxu0 }
 0x10c   : > { %v699_v3 = vpop.f32.mrb[10].mxu0 }
 0x10d   : > { %v705_v4 = vadd.f32 %v703_v1, %v436_v23  ;;  %v704_v5 = vmul.f32 %v848_v14, %v699_v3  ;;  %v961_v6 = vpop.f32.mrb[11].mxu0 }
 0x10f   : > { %vm707_vm8 = vcmp.ge.f32.partialorder %v705_v4, 0.0  ;;  %v709_v7 = vmul.f32 0.2, %v705_v4  ;;  %v706_v8 = vadd.f32 %v704_v5, %v437_v29 }
 0x111   : > { %v711_v9 = vsel %vm707_vm8, %v705_v4, %v709_v7  ;;  %vm708_vm9 = vcmp.ge.f32.partialorder %v706_v8, 0.0  ;;  %v710_v10 = vmul.f32 0.2, %v706_v8 }
 0x112   : > { %v713_v11 = vmax.f32 %v649_v60, %v711_v9 }
 0x113   : > { %v712_v12 = vsel %vm708_vm9, %v706_v8, %v710_v10 }
 0x114   : > { %v875_v13 = vpack.c.bf16 %v713_v11, %v713_v11  ;;  %v714_v15 = vmax.f32 %v650_v63, %v712_v12 }
 0x116   : > { %724 = vst.msk [vmem:[%s325_s11] sm:$0xf] %vm723_vm10, %v875_v13  ;;  %v876_v16 = vpack.c.bf16 %v714_v15, %v714_v15 }
 0x118   : > { %725 = vst.msk [vmem:[%s325_s11 + $0x4] sm:$0xf] %vm723_vm10, %v876_v16 }
 0x119 PF: > { %s16_s23 = sadd.s32 1, %s1023_s23   ;;  %s1184_s21 = smov %s1019_s22 }
 0x11a   : > { %p13_p5 = scmp.ge.s32.totalorder %s16_s23, 4   ;;  %s1185_s22 = smov %s1187_s24 }
 0x11c   :  { %15 = sbr.rel (!%p13_p5) target bundleno = 2 (0x2), region = 80 }

// kernel: dgcnn_semseg_forward.11
= control target key start
LH: loop header
LB: loop body
LE: loop exit
PB: predicated region body
PF: predicated region fallthrough
CT: control target
= control target key end

     0   :  { %s1506_s30 = smov 0   ;;  %s1508_s10 = smov 0   ;;  %s1721_s0 = inlined_call_operand.vmem [shape: bf16[2,4,16,64], index: 0, kind: input, shape index: {}]   ;;  %s1722_s1 = inlined_call_operand.vmem [shape: bf16[2,16,64], index: 1, kind: input, shape index: {}]   ;;  %s1723_s2 = inlined_call_operand.vmem [shape: bf16[64,64], index: 2, kind: input, shape index: {}]   ;;  %s1724_s3 = inlined_call_operand.vmem [shape: bf16[64,64], index: 3, kind: input, shape index: {}]   ;;  %s1725_s4 = inlined_call_operand.vmem [shape: f32[1,64], index: 4, kind: input, shape index: {}]   ;;  %s1726_s5 = inlined_call_operand.vmem [shape: f32[1,64], index: 5, kind: input, shape index: {}]   ;;  %s1727_s6 = inlined_call_operand.vmem [shape: bf16[64,64], index: 6, kind: input, shape index: {}]   ;;  %s1728_s7 = inlined_call_operand.vmem [shape: f32[1,64], index: 7, kind: input, shape index: {}]   ;;  %s1729_s8 = inlined_call_operand.vmem [shape: f32[1,64], index: 8, kind: input, shape index: {}]   ;;  %s1730_s9 = inlined_call_operand.vmem [shape: bf16[2,16,64], index: 9, kind: output, shape index: {}]  }
   0x1   :  { %s1510_s11 = smov 0  }
   0x2 LB: > { %s31_s12 = sadd.s32 1, %s1448_s10  ;;  %p1182_p0 = scmp.ge.s32.totalorder %s1452_s11, 1  ;;  %s1452_s11 = sphi %s1510_s11, %s19_s11   ;;  %s1448_s10 = sphi %s1508_s10, %s1732_s10   ;;  %s1444_s30 = sphi %s1506_s30, %s1731_s30  }
   0x3   : > { %p33_p1 = scmp.ge.s32.totalorder %s31_s12, 2  ;;  %p325_p2 = scmp.lt.s32.totalorder %s1452_s11, 3 }
   0x5   : > { %s1734_s12 = smov (%p33_p1, %s31_s12), 0  ;;  %p326_p3 = pnand %p1182_p0, %p325_p2 }
   0x6   : > { %v1413_v0 = vld [vmem:[%s1724_s3] sm:$0xff] (!%p326_p3)   ;;  %v1454_v1 = vmov (!%p326_p3), 0.0   ;;  %v1415_v3 = vld [vmem:[%s1724_s3 + $0x8] sm:$0xff] (!%p326_p3)   ;;  %vm1455_vm0 = vmmov (!%p326_p3), 0   ;;  %p379_p4 = scmp.lt.s32.totalorder (!%p326_p3), %s1444_s30, 1  ;;  %v1417_v5 = vld [vmem:[%s1724_s3 + $0x10] sm:$0xff] (!%p326_p3)  }
   0x7   : > { %329 = sbr.rel (%p326_p3) target bundleno = 522 (0x20a), region = 56  ;;  %1279 = vmatprep.subr.bf16.mxu0 (!%p326_p3), %v1454_v1  ;;  %1291 = vmatprep.subr.bf16.mxu1 (!%p326_p3), %v1454_v1  ;;  %v1532_v2 = vld [vmem:[%s1723_s2] sm:$0xff] (!%p326_p3)   ;;  %v1416_v4 = vld [vmem:[%s1723_s2 + $0x8] sm:$0xff] (!%p326_p3)   ;;  %v1418_v6 = vld [vmem:[%s1723_s2 + $0x10] sm:$0xff] (!%p326_p3)   ;;  %vm458_vm1 = vcmask (!%p326_p3), 523264  }
   0x8   : > { %1280 = vmatpush3.bf16.msra.mxu0 (!%p326_p3), %v1413_v0  ;;  %1287 = vmatprep.mubr.msk.bf16.mxu0 (!%p326_p3), %vm1455_vm0, %v1454_v1  ;;  %v1419_v7 = vld [vmem:[%s1724_s3 + $0x18] sm:$0xff] (!%p326_p3)   ;;  %v1581_v11 = vld [vmem:[%s1727_s6] sm:$0xff] (!%p326_p3)   ;;  %v1620_v15 = vld [vmem:[%s1727_s6 + $0x8] sm:$0xff] (!%p326_p3)  }
   0x9   : > { %1292 = vmatpush3.bf16.msra.mxu1 (!%p326_p3), %v1532_v2  ;;  %1281 = vmatprep.subr.bf16.mxu0 (!%p326_p3), %v1454_v1  ;;  %v1420_v8 = vld [vmem:[%s1723_s2 + $0x18] sm:$0xff] (!%p326_p3)   ;;  %v1627_v16 = vld [vmem:[%s1727_s6 + $0x10] sm:$0xff] (!%p326_p3)   ;;  %v1641_v18 = vld [vmem:[%s1725_s4] ss:$0 sm:$0xff] (!%p326_p3) }
   0xa   : > { %1293 = vmatprep.subr.bf16.mxu1 (!%p326_p3), %v1454_v1  ;;  %1299 = vmatprep.mubr.msk.bf16.mxu1 (!%p326_p3), %vm1455_vm0, %v1454_v1  ;;  %v1634_v17 = vld [vmem:[%s1727_s6 + $0x18] sm:$0xff] (!%p326_p3)   ;;  %v1196_v19 = vld [vmem:[%s1726_s5] ss:$0 sm:$0xff] (!%p326_p3) }
   0xc   : > { %1282 = vmatpush3.bf16.msra.mxu0 (!%p326_p3), %v1415_v3 }
   0xd   : > { %1294 = vmatpush3.bf16.msra.mxu1 (!%p326_p3), %v1416_v4  ;;  %1283 = vmatprep.subr.bf16.mxu0 (!%p326_p3), %v1454_v1 }
   0xe   : > { %s1736_s30 = smov (!%p379_p4, %s1444_s30), 1  ;;  %1295 = vmatprep.subr.bf16.mxu1 %v1454_v1 }
   0xf   : > { %s1229_s23 = sshll.u32 %s1736_s30, 5  ;;  %s1230_s29 = sshll.u32 %s1736_s30, 3 }
  0x10   : > { %s1560_s28 = scalar_lea.vmem %s1721_s0, %s1229_s23  ;;  %s396_s15 = scalar_lea.vmem %s1722_s1, %s1230_s29  ;;  %1284 = vmatpush3.bf16.msra.mxu0 %v1417_v5 }
  0x11   : > { %1296 = vmatpush3.bf16.msra.mxu1 %v1418_v6  ;;  %1285 = vmatprep.subr.bf16.mxu0 %v1454_v1  ;;  %v1421_v9 = vld [vmem:[%s396_s15] sm:$0xff]   ;;  %v1423_v12 = vld [vmem:[%s1560_s28 + $0x8] sm:$0xff]   ;;  %v1424_v13 = vld [vmem:[%s1560_s28 + $0x10] sm:$0xff]   ;;  %s406_s22 = scalar_lea.vmem %s1730_s9, %s1230_s29 }
  0x12   : > { %1297 = vmatprep.subr.bf16.mxu1 %v1454_v1  ;;  %v1422_v10 = vld [vmem:[%s1560_s28] sm:$0xff]   ;;  %v1425_v14 = vld [vmem:[%s1560_s28 + $0x18] sm:$0xff]  }
  0x14   : > { %1286 = vmatpush3.bf16.msra.mxu0 %v1419_v7 }
  0x15   : > { %1298 = vmatpush3.bf16.msra.mxu1 %v1420_v8  ;;  %1303 = vmatprep.subr.bf16.mxu0 %v1454_v1 }
  0x16   : > { %1315 = vmatprep.subr.bf16.mxu1 %v1454_v1 }
  0x17   : > { %1288 = vmatmul.mubr.msk.bf16.vlgmr.msra.gmra.mrb[0].mxu0 %vm458_vm1, %v1421_v9 }
  0x18   : > { %1300 = vmatmul.mubr.msk.bf16.vlgmr.msra.gmra.mrb[0].mxu1 %vm458_vm1, %v1422_v10  ;;  %1304 = vmatpush3.bf16.msra.mxu0 %v1581_v11 }
  0x19   : > { %1316 = vmatpush3.bf16.msra.mxu1 %v1532_v2  ;;  %1323 = vmatprep.mubr.msk.bf16.mxu1 %vm1455_vm0, %v1454_v1 }
  0x1a   : > { %1317 = vmatprep.subr.bf16.mxu1 %v1454_v1  ;;  %1305 = vmatprep.subr.bf16.mxu0 %v1454_v1 }
  0x1b   : > { %1311 = vmatprep.mubr.msk.bf16.mxu0 %vm1455_vm0, %v1454_v1 }
  0x1c   : > { %1306 = vmatpush3.bf16.msra.mxu0 %v1620_v15 }
  0x1d   : > { %1318 = vmatpush3.bf16.msra.mxu1 %v1416_v4  ;;  %1307 = vmatprep.subr.bf16.mxu0 %v1454_v1 }
  0x1e   : > { %1319 = vmatprep.subr.bf16.mxu1 %v1454_v1 }
  0x20   : > { %1308 = vmatpush3.bf16.msra.mxu0 %v1627_v16 }
  0x21   : > { %1320 = vmatpush3.bf16.msra.mxu1 %v1418_v6  ;;  %1309 = vmatprep.subr.bf16.mxu0 %v1454_v1 }
  0x22   : > { %1321 = vmatprep.subr.bf16.mxu1 %v1454_v1 }
  0x24   : > { %1310 = vmatpush3.bf16.msra.mxu0 %v1634_v17 }
  0x25   : > { %1322 = vmatpush3.bf16.msra.mxu1 %v1420_v8  ;;  %1327 = vmatprep.subr.bf16.mxu0 %v1454_v1 }
  0x26   : > { %1339 = vmatprep.subr.bf16.mxu1 %v1454_v1 }
  0x28   : > { %1324 = vmatmul.mubr.msk.bf16.vlgmr.msra.gmra.mrb[4].mxu1 %vm458_vm1, %v1423_v12 }
  0x29   : > { %1340 = vmatpush3.bf16.msra.mxu1 %v1532_v2  ;;  %1347 = vmatprep.mubr.msk.bf16.mxu1 %vm1455_vm0, %v1454_v1 }
  0x2a   : > { %1341 = vmatprep.subr.bf16.mxu1 %v1454_v1 }
  0x2d   : > { %1342 = vmatpush3.bf16.msra.mxu1 %v1416_v4 }
  0x2e   : > { %1343 = vmatprep.subr.bf16.mxu1 %v1454_v1 }
  0x31   : > { %1344 = vmatpush3.bf16.msra.mxu1 %v1418_v6 }
  0x32   : > { %1345 = vmatprep.subr.bf16.mxu1 %v1454_v1 }
  0x35   : > { %1346 = vmatpush3.bf16.msra.mxu1 %v1420_v8 }
  0x36   : > { %1363 = vmatprep.subr.bf16.mxu1 %v1454_v1 }
  0x38   : > { %1348 = vmatmul.mubr.msk.bf16.vlgmr.msra.gmra.mrb[8].mxu1 %vm458_vm1, %v1424_v13 }
  0x39   : > { %1364 = vmatpush3.bf16.msra.mxu1 %v1532_v2  ;;  %1371 = vmatprep.mubr.msk.bf16.mxu1 %vm1455_vm0, %v1454_v1 }
  0x3a   : > { %1365 = vmatprep.subr.bf16.mxu1 %v1454_v1 }
  0x3d   : > { %1366 = vmatpush3.bf16.msra.mxu1 %v1416_v4 }
  0x3e   : > { %1367 = vmatprep.subr.bf16.mxu1 %v1454_v1 }
  0x41   : > { %1368 = vmatpush3.bf16.msra.mxu1 %v1418_v6 }
  0x42   : > { %1369 = vmatprep.subr.bf16.mxu1 %v1454_v1 }
  0x45   : > { %1370 = vmatpush3.bf16.msra.mxu1 %v1420_v8 }
  0x48   : > { %1372 = vmatmul.mubr.msk.bf16.vlgmr.msra.gmra.mrb[12].mxu1 %vm458_vm1, %v1425_v14 }
  0xea   : > { %v496_v20 = vpop.f32.mrb[0].mxu0 }
  0xeb   : > { %v509_v21 = vmul.f32 %v1641_v18, %v496_v20  ;;  %v597_v22 = vpop.f32.mrb[0].mxu1  ;;  %v1289_v23 = vpop.f32.mrb[1].mxu0 }
  0xec   : > { %v604_v24 = vmul.f32 %v1641_v18, %v597_v22  ;;  %v1301_v25 = vpop.f32.mrb[1].mxu1  ;;  %v499_v26 = vpop.f32.mrb[2].mxu0  ;;  %v1208_v23 = vld [vmem:[%s1728_s7] ss:$0 sm:$0xff] }
  0xed   : > { %v1648_v27 = vadd.f32 %v1196_v19, %v509_v21  ;;  %v510_v28 = vmul.f32 %v1641_v18, %v499_v26  ;;  %v600_v29 = vpop.f32.mrb[2].mxu1  ;;  %v1290_v30 = vpop.f32.mrb[3].mxu0 }
  0xee   : > { %v1302_v31 = vpop.f32.mrb[3].mxu1  ;;  %v605_v34 = vmul.f32 %v1641_v18, %v600_v29 }
  0xef   : > { %v606_v32 = vadd.f32 %v604_v24, %v1648_v27  ;;  %v1652_v33 = vadd.f32 %v1196_v19, %v510_v28 }
  0xf1   : > { %v610_v35 = vmul.f32 0.2, %v606_v32  ;;  %v607_v36 = vadd.f32 %v605_v34, %v1652_v33  ;;  %vm608_vm2 = vcmp.ge.f32.partialorder %v606_v32, 0.0 }
  0xf3   : > { %vm609_vm3 = vcmp.ge.f32.partialorder %v607_v36, 0.0  ;;  %v611_v37 = vmul.f32 0.2, %v607_v36  ;;  %v612_v38 = vsel %vm608_vm2, %v606_v32, %v610_v35  ;;  %vm1070_vm2 = vcmask 519168  }
  0xf5   : > { %v613_v39 = vsel %vm609_vm3, %v607_v36, %v611_v37 }
  0xf6   : > { %v614_v40 = vpack.c.bf16 %v613_v39, %v612_v38 }
  0xf8   : > { %1312 = vmatmul.mubr.msk.bf16.vlgmr.msra.gmra.mrb[4].mxu0 %vm458_vm1, %v614_v40 }
  0xf9   : > { %1328 = vmatpush3.bf16.msra.mxu0 %v1581_v11  ;;  %1335 = vmatprep.mubr.msk.bf16.mxu0 %vm1455_vm0, %v1454_v1 }
  0xfa   : > { %1329 = vmatprep.subr.bf16.mxu0 %v1454_v1 }
  0xfb   : > { %v750_v41 = vpop.f32.mrb[4].mxu1 }
  0xfc   : > { %v757_v42 = vmul.f32 %v1641_v18, %v750_v41  ;;  %v1325_v43 = vpop.f32.mrb[5].mxu1 }
  0xfd   : > { %v753_v44 = vpop.f32.mrb[6].mxu1  ;;  %1330 = vmatpush3.bf16.msra.mxu0 %v1620_v15 }
  0xfe   : > { %v759_v45 = vadd.f32 %v757_v42, %v1648_v27  ;;  %v758_v46 = vmul.f32 %v1641_v18, %v753_v44  ;;  %v1326_v47 = vpop.f32.mrb[7].mxu1  ;;  %1331 = vmatprep.subr.bf16.mxu0 %v1454_v1 }
 0x100   : > { %v763_v48 = vmul.f32 0.2, %v759_v45  ;;  %v760_v49 = vadd.f32 %v758_v46, %v1652_v33  ;;  %vm761_vm4 = vcmp.ge.f32.partialorder %v759_v45, 0.0 }
 0x101   : > { %1332 = vmatpush3.bf16.msra.mxu0 %v1627_v16 }
 0x102   : > { %vm762_vm5 = vcmp.ge.f32.partialorder %v760_v49, 0.0  ;;  %v764_v50 = vmul.f32 0.2, %v760_v49  ;;  %1333 = vmatprep.subr.bf16.mxu0 %v1454_v1  ;;  %v765_v51 = vsel %vm761_vm4, %v759_v45, %v763_v48 }
 0x104   : > { %v766_v52 = vsel %vm762_vm5, %v760_v49, %v764_v50 }
 0x105   : > { %v767_v53 = vpack.c.bf16 %v766_v52, %v765_v51  ;;  %1334 = vmatpush3.bf16.msra.mxu0 %v1634_v17 }
 0x106   : > { %1351 = vmatprep.subr.bf16.mxu0 %v1454_v1 }
 0x108   : > { %1336 = vmatmul.mubr.msk.bf16.vlgmr.msra.gmra.mrb[8].mxu0 %vm458_vm1, %v767_v53 }
 0x109   : > { %1352 = vmatpush3.bf16.msra.mxu0 %v1581_v11  ;;  %1359 = vmatprep.mubr.msk.bf16.mxu0 %vm1455_vm0, %v1454_v1 }
 0x10a   : > { %1353 = vmatprep.subr.bf16.mxu0 %v1454_v1 }
 0x10b   : > { %v869_v54 = vpop.f32.mrb[8].mxu1 }
 0x10c   : > { %v876_v55 = vmul.f32 %v1641_v18, %v869_v54  ;;  %v1349_v56 = vpop.f32.mrb[9].mxu1 }
 0x10d   : > { %v872_v57 = vpop.f32.mrb[10].mxu1  ;;  %1354 = vmatpush3.bf16.msra.mxu0 %v1620_v15 }
 0x10e   : > { %v878_v58 = vadd.f32 %v876_v55, %v1648_v27  ;;  %v877_v59 = vmul.f32 %v1641_v18, %v872_v57  ;;  %v1350_v60 = vpop.f32.mrb[11].mxu1  ;;  %1355 = vmatprep.subr.bf16.mxu0 %v1454_v1 }
 0x110   : > { %v882_v61 = vmul.f32 0.2, %v878_v58  ;;  %v879_v62 = vadd.f32 %v877_v59, %v1652_v33  ;;  %vm880_vm6 = vcmp.ge.f32.partialorder %v878_v58, 0.0 }
 0x111   : > { %1356 = vmatpush3.bf16.msra.mxu0 %v1627_v16 }
 0x112   : > { %vm881_vm7 = vcmp.ge.f32.partialorder %v879_v62, 0.0  ;;  %v883_v63 = vmul.f32 0.2, %v879_v62  ;;  %1357 = vmatprep.subr.bf16.mxu0 %v1454_v1  ;;  %v884_v0 = vsel %vm880_vm6, %v878_v58, %v882_v61 }
 0x114   : > { %v885_v2 = vsel %vm881_vm7, %v879_v62, %v883_v63 }
 0x115   : > { %v886_v3 = vpack.c.bf16 %v885_v2, %v884_v0  ;;  %1358 = vmatpush3.bf16.msra.mxu0 %v1634_v17 }
 0x116   : > { %1375 = vmatprep.subr.bf16.mxu0 %v1454_v1 }
 0x118   : > { %1360 = vmatmul.mubr.msk.bf16.vlgmr.msra.gmra.mrb[12].mxu0 %vm458_vm1, %v886_v3 }
 0x119   : > { %1376 = vmatpush3.bf16.msra.mxu0 %v1581_v11  ;;  %1383 = vmatprep.mubr.msk.bf16.mxu0 %vm1455_vm0, %v1454_v1 }
 0x11a   : > { %1377 = vmatprep.subr.bf16.mxu0 %v1454_v1 }
 0x11b   : > { %v988_v4 = vpop.f32.mrb[12].mxu1 }
 0x11c   : > { %v995_v5 = vmul.f32 %v1641_v18, %v988_v4  ;;  %v1373_v6 = vpop.f32.mrb[13].mxu1 }
 0x11d   : > { %v991_v7 = vpop.f32.mrb[14].mxu1  ;;  %1378 = vmatpush3.bf16.msra.mxu0 %v1620_v15 }
 0x11e   : > { %v997_v8 = vadd.f32 %v995_v5, %v1648_v27  ;;  %v996_v9 = vmul.f32 %v1641_v18, %v991_v7  ;;  %v1374_v10 = vpop.f32.mrb[15].mxu1  ;;  %1379 = vmatprep.subr.bf16.mxu0 %v1454_v1 }
 0x120   : > { %v1001_v11 = vmul.f32 0.2, %v997_v8  ;;  %v998_v12 = vadd.f32 %v996_v9, %v1652_v33  ;;  %vm999_vm8 = vcmp.ge.f32.partialorder %v997_v8, 0.0 }
 0x121   : > { %1380 = vmatpush3.bf16.msra.mxu0 %v1627_v16 }
 0x122   : > { %vm1000_vm9 = vcmp.ge.f32.partialorder %v998_v12, 0.0  ;;  %v1002_v13 = vmul.f32 0.2, %v998_v12  ;;  %1381 = vmatprep.subr.bf16.mxu0 %v1454_v1  ;;  %v1003_v14 = vsel %vm999_vm8, %v997_v8, %v1001_v11  ;;  %v1209_v1 = vld [vmem:[%s1729_s8] ss:$0 sm:$0xff] }
 0x124   : > { %v1004_v19 = vsel %vm1000_vm9, %v998_v12, %v1002_v13 }
 0x125   : > { %v1005_v15 = vpack.c.bf16 %v1004_v19, %v1003_v14  ;;  %1382 = vmatpush3.bf16.msra.mxu0 %v1634_v17 }
 0x128   : > { %1384 = vmatmul.mubr.msk.bf16.vlgmr.msra.gmra.mrb[16].mxu0 %vm458_vm1, %v1005_v15 }
 0x1cb   : > { %v676_v18 = vpop.f32.mrb[4].mxu0 }
 0x1cc   : > { %v1313_v20 = vpop.f32.mrb[5].mxu0  ;;  %v689_v16 = vmul.f32 %v1208_v23, %v676_v18 }
 0x1cd   : > { %v679_v21 = vpop.f32.mrb[6].mxu0 }
 0x1ce   : > { %v1314_v22 = vpop.f32.mrb[7].mxu0  ;;  %v690_v24 = vmul.f32 %v1208_v23, %v679_v21  ;;  %v697_v25 = vadd.f32 %v1209_v1, %v689_v16 }
 0x1d0   : > { %v698_v27 = vadd.f32 %v1209_v1, %v690_v24  ;;  %v701_v30 = vmul.f32 0.2, %v697_v25  ;;  %vm699_vm10 = vcmp.ge.f32.partialorder %v697_v25, 0.0 }
 0x1d2   : > { %v702_v34 = vmul.f32 0.2, %v698_v27  ;;  %vm700_vm12 = vcmp.ge.f32.partialorder %v698_v27, 0.0  ;;  %v703_v37 = vsel %vm699_vm10, %v697_v25, %v701_v30 }
 0x1d4   : > { %v704_v41 = vsel %vm700_vm12, %v698_v27, %v702_v34 }
 0x1db   : > { %v805_v26 = vpop.f32.mrb[8].mxu0 }
 0x1dc   : > { %v812_v17 = vmul.f32 %v1208_v23, %v805_v26  ;;  %v1337_v28 = vpop.f32.mrb[9].mxu0 }
 0x1dd   : > { %v808_v29 = vpop.f32.mrb[10].mxu0 }
 0x1de   : > { %v814_v31 = vadd.f32 %v1209_v1, %v812_v17  ;;  %v813_v32 = vmul.f32 %v1208_v23, %v808_v29  ;;  %v1338_v33 = vpop.f32.mrb[11].mxu0 }
 0x1e0   : > { %vm816_vm11 = vcmp.ge.f32.partialorder %v814_v31, 0.0  ;;  %v818_v35 = vmul.f32 0.2, %v814_v31  ;;  %v815_v36 = vadd.f32 %v1209_v1, %v813_v32 }
 0x1e2   : > { %v820_v38 = vsel %vm816_vm11, %v814_v31, %v818_v35  ;;  %vm817_vm13 = vcmp.ge.f32.partialorder %v815_v36, 0.0  ;;  %v819_v39 = vmul.f32 0.2, %v815_v36 }
 0x1e3   : > { %v822_v40 = vmax.f32 %v703_v37, %v820_v38 }
 0x1e4   : > { %v821_v42 = vsel %vm817_vm13, %v815_v36, %v819_v39 }
 0x1e5   : > { %v823_v43 = vmax.f32 %v704_v41, %v821_v42 }
 0x1eb   : > { %v924_v44 = vpop.f32.mrb[12].mxu0 }
 0x1ec   : > { %v931_v45 = vmul.f32 %v1208_v23, %v924_v44  ;;  %v1361_v46 = vpop.f32.mrb[13].mxu0 }
 0x1ed   : > { %v927_v47 = vpop.f32.mrb[14].mxu0 }
 0x1ee   : > { %v933_v48 = vadd.f32 %v1209_v1, %v931_v45  ;;  %v932_v49 = vmul.f32 %v1208_v23, %v927_v47  ;;  %v1362_v50 = vpop.f32.mrb[15].mxu0 }
 0x1f0   : > { %vm935_vm14 = vcmp.ge.f32.partialorder %v933_v48, 0.0  ;;  %v937_v51 = vmul.f32 0.2, %v933_v48  ;;  %v934_v52 = vadd.f32 %v1209_v1, %v932_v49 }
 0x1f2   : > { %v939_v53 = vsel %vm935_vm14, %v933_v48, %v937_v51  ;;  %vm936_vm15 = vcmp.ge.f32.partialorder %v934_v52, 0.0  ;;  %v938_v54 = vmul.f32 0.2, %v934_v52 }
 0x1f3   : > { %v941_v55 = vmax.f32 %v822_v40, %v939_v53 }
 0x1f4   : > { %v940_v56 = vsel %vm936_vm15, %v934_v52, %v938_v54 }
 0x1f5   : > { %v942_v57 = vmax.f32 %v823_v43, %v940_v56 }
 0x1fb   : > { %v1043_v58 = vpop.f32.mrb[16].mxu0 }
 0x1fc   : > { %v1050_v59 = vmul.f32 %v1208_v23, %v1043_v58  ;;  %v1385_v60 = vpop.f32.mrb[17].mxu0 }
 0x1fd   : > { %v1046_v61 = vpop.f32.mrb[18].mxu0 }
 0x1fe   : > { %v1052_v62 = vadd.f32 %v1209_v1, %v1050_v59  ;;  %v1051_v63 = vmul.f32 %v1208_v23, %v1046_v61  ;;  %v1386_v0 = vpop.f32.mrb[19].mxu0 }
 0x200   : > { %vm1054_vm0 = vcmp.ge.f32.partialorder %v1052_v62, 0.0  ;;  %v1056_v2 = vmul.f32 0.2, %v1052_v62  ;;  %v1053_v3 = vadd.f32 %v1209_v1, %v1051_v63 }
 0x202   : > { %v1058_v4 = vsel %vm1054_vm0, %v1052_v62, %v1056_v2  ;;  %vm1055_vm1 = vcmp.ge.f32.partialorder %v1053_v3, 0.0  ;;  %v1057_v5 = vmul.f32 0.2, %v1053_v3 }
 0x203   : > { %v1060_v6 = vmax.f32 %v941_v55, %v1058_v4 }
 0x204   : > { %v1059_v7 = vsel %vm1055_vm1, %v1053_v3, %v1057_v5 }
 0x205   : > { %v1232_v8 = vpack.c.bf16 %v1060_v6, %v1060_v6  ;;  %v1061_v9 = vmax.f32 %v942_v57, %v1059_v7 }
 0x207   : > { %1071 = vst.msk [vmem:[%s406_s22] sm:$0xf] %vm1070_vm2, %v1232_v8  ;;  %v1233_v10 = vpack.c.bf16 %v1061_v9, %v1061_v9 }
 0x209   : > { %1072 = vst.msk [vmem:[%s406_s22 + $0x4] sm:$0xf] %vm1070_vm2, %v1233_v10 }
 0x20a PF: > { %s19_s11 = sadd.s32 1, %s1452_s11   ;;  %s1731_s30 = smov %s1448_s10 }
 0x20b   : > { %p16_p5 = scmp.ge.s32.totalorder %s19_s11, 4   ;;  %s1732_s10 = smov %s1734_s12 }
 0x20d   :  { %18 = sbr.rel (!%p16_p5) target bundleno = 2 (0x2), region = 92 }

// kernel: dgcnn_semseg_forward.14
= control target key start
LH: loop header
LB: loop body
LE: loop exit
PB: predicated region body
PF: predicated region fallthrough
CT: control target
= control target key end

     0   :  { %s2191_s21 = smov 0   ;;  %s2193_s22 = smov 0   ;;  %s2631_s0 = inlined_call_operand.vmem [shape: bf16[2,16,64], index: 0, kind: input, shape index: {}]   ;;  %s2632_s1 = inlined_call_operand.vmem [shape: bf16[2,16,64], index: 1, kind: input, shape index: {}]   ;;  %s2633_s2 = inlined_call_operand.vmem [shape: bf16[2,16,64], index: 2, kind: input, shape index: {}]   ;;  %s2634_s3 = inlined_call_operand.vmem [shape: bf16[192,1024], index: 3, kind: input, shape index: {}]   ;;  %s2635_s4 = inlined_call_operand.vmem [shape: f32[1,1024], index: 4, kind: input, shape index: {}]   ;;  %s2636_s5 = inlined_call_operand.vmem [shape: f32[1,1024], index: 5, kind: input, shape index: {}]   ;;  %s2637_s6 = inlined_call_operand.vmem [shape: f32[2,1,1024], index: 6, kind: output, shape index: {}]  }
   0x1   :  { %s2195_s23 = smov 0  }
   0x2 LB: > { %s28_s24 = sadd.s32 1, %s2148_s22  ;;  %p1945_p0 = scmp.ge.s32.totalorder %s2152_s23, 1  ;;  %s2152_s23 = sphi %s2195_s23, %s16_s23   ;;  %s2148_s22 = sphi %s2193_s22, %s2639_s22   ;;  %s2144_s21 = sphi %s2191_s21, %s2638_s21  }
   0x3   : > { %p30_p1 = scmp.ge.s32.totalorder %s28_s24, 2  ;;  %p265_p2 = scmp.lt.s32.totalorder %s2152_s23, 3 }
   0x5   : > { %s2641_s24 = smov (%p30_p1, %s28_s24), 0  ;;  %p266_p3 = pnand %p1945_p0, %p265_p2 }
   0x6   : > { %v387_v0 = vld [vmem:[%s2634_s3 + $0x100] sm:$0xff] (!%p266_p3)  ;;  %v388_v2 = vld [vmem:[%s2634_s3 + $0x108] sm:$0xff] (!%p266_p3)  ;;  %p317_p4 = scmp.lt.s32.totalorder (!%p266_p3), %s2144_s21, 1  ;;  %v2154_v8 = vmov (!%p266_p3), 0   ;;  %v389_v31 = vld [vmem:[%s2634_s3 + $0x110] sm:$0xff] (!%p266_p3)  ;;  %vm584_vm0 = vcmask (!%p266_p3), 523264  }
   0x7   : > { %269 = sbr.rel (%p266_p3) target bundleno = 361 (0x169), region = 44  ;;  %v391_v1 = vld [vmem:[%s2634_s3 + $0x120] sm:$0xff] (!%p266_p3)  ;;  %v392_v4 = vld [vmem:[%s2634_s3 + $0x128] sm:$0xff] (!%p266_p3)  ;;  %620 = vmatprep.mubr.bf16.mxu0 (!%p266_p3), %v2154_v8  ;;  %663 = vmatprep.mubr.bf16.mxu1 (!%p266_p3), %v2154_v8  ;;  %v393_v32 = vld [vmem:[%s2634_s3 + $0x130] sm:$0xff] (!%p266_p3) }
   0x8   : > { %v1955_v3 = vcombine.high (!%p266_p3), %v387_v0, %v391_v1  ;;  %v1954_v5 = vcombine.low (!%p266_p3), %v387_v0, %v391_v1  ;;  %v395_v6 = vld [vmem:[%s2634_s3 + $0x140] sm:$0xff] (!%p266_p3)  ;;  %v1957_v9 = vcombine.high (!%p266_p3), %v388_v2, %v392_v4  ;;  %v1956_v10 = vcombine.low (!%p266_p3), %v388_v2, %v392_v4  ;;  %v396_v12 = vld [vmem:[%s2634_s3 + $0x148] sm:$0xff] (!%p266_p3)  ;;  %v390_v33 = vld [vmem:[%s2634_s3 + $0x118] sm:$0xff] (!%p266_p3) }
   0x9   : > { %v399_v7 = vld [vmem:[%s2634_s3 + $0x160] sm:$0xff] (!%p266_p3)  ;;  %v400_v13 = vld [vmem:[%s2634_s3 + $0x168] sm:$0xff] (!%p266_p3)  ;;  %v394_v34 = vld [vmem:[%s2634_s3 + $0x138] sm:$0xff] (!%p266_p3)  ;;  %v1959_v37 = vcombine.high (!%p266_p3), %v389_v31, %v393_v32  ;;  %v1958_v44 = vcombine.low (!%p266_p3), %v389_v31, %v393_v32 }
   0xa   : > { %v1963_v11 = vcombine.high (!%p266_p3), %v395_v6, %v399_v7  ;;  %v403_v14 = vld [vmem:[%s2634_s3 + $0x180] sm:$0xff] (!%p266_p3)  ;;  %588 = vmatprep.subr.bf16.mxu0 (!%p266_p3), %v1955_v3  ;;  %v1965_v15 = vcombine.high (!%p266_p3), %v396_v12, %v400_v13  ;;  %v404_v17 = vld [vmem:[%s2634_s3 + $0x188] sm:$0xff] (!%p266_p3)  ;;  %631 = vmatprep.subr.bf16.mxu1 (!%p266_p3), %v1957_v9  ;;  %v1962_v19 = vcombine.low (!%p266_p3), %v395_v6, %v399_v7  ;;  %v397_v39 = vld [vmem:[%s2634_s3 + $0x150] sm:$0xff] (!%p266_p3) }
   0xb   : > { %v407_v16 = vld [vmem:[%s2634_s3 + $0x1a0] sm:$0xff] (!%p266_p3)  ;;  %v408_v18 = vld [vmem:[%s2634_s3 + $0x1a8] sm:$0xff] (!%p266_p3)  ;;  %589 = vmatpush1.bf16.msra.mxu0 (!%p266_p3), %v1954_v5  ;;  %632 = vmatpush1.bf16.msra.mxu1 (!%p266_p3), %v1956_v10  ;;  %v1964_v20 = vcombine.low (!%p266_p3), %v396_v12, %v400_v13  ;;  %v1961_v38 = vcombine.high (!%p266_p3), %v390_v33, %v394_v34  ;;  %v401_v40 = vld [vmem:[%s2634_s3 + $0x170] sm:$0xff] (!%p266_p3)  ;;  %v1960_v45 = vcombine.low (!%p266_p3), %v390_v33, %v394_v34 }
   0xc   : > { %590 = vmatprep.subr.bf16.mxu0 (!%p266_p3), %v1963_v11  ;;  %v1971_v21 = vcombine.high (!%p266_p3), %v403_v14, %v407_v16  ;;  %633 = vmatprep.subr.bf16.mxu1 (!%p266_p3), %v1965_v15  ;;  %v1973_v22 = vcombine.high (!%p266_p3), %v404_v17, %v408_v18  ;;  %v411_v23 = vld [vmem:[%s2634_s3 + $0x1c0] sm:$0xff] (!%p266_p3)  ;;  %v412_v25 = vld [vmem:[%s2634_s3 + $0x1c8] sm:$0xff] (!%p266_p3)  ;;  %v1970_v27 = vcombine.low (!%p266_p3), %v403_v14, %v407_v16  ;;  %v398_v42 = vld [vmem:[%s2634_s3 + $0x158] sm:$0xff] (!%p266_p3) }
   0xd   : > { %v415_v24 = vld [vmem:[%s2634_s3 + $0x1e0] sm:$0xff] (!%p266_p3)  ;;  %v416_v26 = vld [vmem:[%s2634_s3 + $0x1e8] sm:$0xff] (!%p266_p3)  ;;  %v1972_v28 = vcombine.low (!%p266_p3), %v404_v17, %v408_v18  ;;  %v402_v43 = vld [vmem:[%s2634_s3 + $0x178] sm:$0xff] (!%p266_p3)  ;;  %v1967_v46 = vcombine.high (!%p266_p3), %v397_v39, %v401_v40  ;;  %v1966_v52 = vcombine.low (!%p266_p3), %v397_v39, %v401_v40 }
   0xe   : > { %s2643_s21 = smov (!%p317_p4, %s2144_s21), 1  ;;  %v1979_v29 = vcombine.high %v411_v23, %v415_v24  ;;  %v1981_v30 = vcombine.high %v412_v25, %v416_v26  ;;  %v1978_v35 = vcombine.low %v411_v23, %v415_v24  ;;  %v1980_v36 = vcombine.low %v412_v25, %v416_v26  ;;  %v405_v47 = vld [vmem:[%s2634_s3 + $0x190] sm:$0xff]  ;;  %v406_v50 = vld [vmem:[%s2634_s3 + $0x198] sm:$0xff]  ;;  %v353_v0 = vld [vmem:[%s2634_s3] sm:$0xff] }
   0xf   : > { %s2248_s29 = sshll.u32 %s2643_s21, 3  ;;  %591 = vmatpush1.bf16.msra.mxu0 %v1962_v19  ;;  %634 = vmatpush1.bf16.msra.mxu1 %v1964_v20  ;;  %v1969_v48 = vcombine.high %v398_v42, %v402_v43  ;;  %v409_v49 = vld [vmem:[%s2634_s3 + $0x1b0] sm:$0xff]  ;;  %v410_v51 = vld [vmem:[%s2634_s3 + $0x1b8] sm:$0xff]  ;;  %v1968_v53 = vcombine.low %v398_v42, %v402_v43  ;;  %v357_v1 = vld [vmem:[%s2634_s3 + $0x20] sm:$0xff] }
  0x10   : > { %s334_s8 = scalar_lea.vmem %s2632_s1, %s2248_s29  ;;  %592 = vmatprep.subr.bf16.mxu0 %v1971_v21  ;;  %635 = vmatprep.subr.bf16.mxu1 %v1973_v22  ;;  %s324_s16 = scalar_lea.vmem %s2631_s0, %s2248_s29  ;;  %v1975_v54 = vcombine.high %v405_v47, %v409_v49  ;;  %v1977_v55 = vcombine.high %v406_v50, %v410_v51  ;;  %v413_v56 = vld [vmem:[%s2634_s3 + $0x1d0] sm:$0xff]  ;;  %v414_v58 = vld [vmem:[%s2634_s3 + $0x1d8] sm:$0xff]  ;;  %v1974_v60 = vcombine.low %v405_v47, %v409_v49  ;;  %v354_v2 = vld [vmem:[%s2634_s3 + $0x8] sm:$0xff] }
  0x11   : > { %v2284_v41 = vld [vmem:[%s334_s8] sm:$0xff]   ;;  %v417_v57 = vld [vmem:[%s2634_s3 + $0x1f0] sm:$0xff]  ;;  %v418_v59 = vld [vmem:[%s2634_s3 + $0x1f8] sm:$0xff]  ;;  %v1976_v61 = vcombine.low %v406_v50, %v410_v51  ;;  %s344_s26 = scalar_lea.vmem %s2633_s2, %s2248_s29  ;;  %v1992_v6 = vcombine.high %v353_v0, %v357_v1  ;;  %v1991_v13 = vcombine.low %v353_v0, %v357_v1 }
  0x12   : > { %v1983_v62 = vcombine.high %v413_v56, %v417_v57  ;;  %v1985_v63 = vcombine.high %v414_v58, %v418_v59  ;;  %v358_v3 = vld [vmem:[%s2634_s3 + $0x28] sm:$0xff]  ;;  %v1982_v4 = vcombine.low %v413_v56, %v417_v57  ;;  %v1984_v5 = vcombine.low %v414_v58, %v418_v59  ;;  %v361_v9 = vld [vmem:[%s2634_s3 + $0x40] sm:$0xff]  ;;  %v355_v33 = vld [vmem:[%s2634_s3 + $0x10] sm:$0xff] }
  0x13   : > { %593 = vmatpush1.bf16.msra.mxu0 %v1970_v27  ;;  %636 = vmatpush1.bf16.msra.mxu1 %v1972_v28  ;;  %v1994_v7 = vcombine.high %v354_v2, %v358_v3  ;;  %v365_v10 = vld [vmem:[%s2634_s3 + $0x60] sm:$0xff]  ;;  %v362_v11 = vld [vmem:[%s2634_s3 + $0x48] sm:$0xff]  ;;  %v1993_v14 = vcombine.low %v354_v2, %v358_v3  ;;  %v359_v34 = vld [vmem:[%s2634_s3 + $0x30] sm:$0xff] }
  0x14   : > { %594 = vmatprep.subr.bf16.mxu0 %v1979_v29  ;;  %637 = vmatprep.subr.bf16.mxu1 %v1981_v30  ;;  %v366_v12 = vld [vmem:[%s2634_s3 + $0x68] sm:$0xff]  ;;  %v2000_v15 = vcombine.high %v361_v9, %v365_v10  ;;  %v369_v17 = vld [vmem:[%s2634_s3 + $0x80] sm:$0xff]  ;;  %v1999_v21 = vcombine.low %v361_v9, %v365_v10  ;;  %v1996_v39 = vcombine.high %v355_v33, %v359_v34  ;;  %v367_v42 = vld [vmem:[%s2634_s3 + $0x70] sm:$0xff] }
  0x15   : > { %v2002_v16 = vcombine.high %v362_v11, %v366_v12  ;;  %v373_v18 = vld [vmem:[%s2634_s3 + $0xa0] sm:$0xff]  ;;  %v370_v19 = vld [vmem:[%s2634_s3 + $0x88] sm:$0xff]  ;;  %v2001_v22 = vcombine.low %v362_v11, %v366_v12  ;;  %v371_v50 = vld [vmem:[%s2634_s3 + $0x90] sm:$0xff] }
  0x16   : > { %v374_v20 = vld [vmem:[%s2634_s3 + $0xa8] sm:$0xff]  ;;  %v2008_v23 = vcombine.high %v369_v17, %v373_v18  ;;  %v377_v25 = vld [vmem:[%s2634_s3 + $0xc0] sm:$0xff]  ;;  %v2007_v29 = vcombine.low %v369_v17, %v373_v18  ;;  %v375_v51 = vld [vmem:[%s2634_s3 + $0xb0] sm:$0xff] }
  0x17   : > { %595 = vmatpush1.bf16.msra.mxu0 %v1978_v35  ;;  %638 = vmatpush1.bf16.msra.mxu1 %v1980_v36  ;;  %v2010_v24 = vcombine.high %v370_v19, %v374_v20  ;;  %v381_v26 = vld [vmem:[%s2634_s3 + $0xe0] sm:$0xff]  ;;  %v378_v27 = vld [vmem:[%s2634_s3 + $0xc8] sm:$0xff]  ;;  %v2009_v30 = vcombine.low %v370_v19, %v374_v20  ;;  %v356_v35 = vld [vmem:[%s2634_s3 + $0x18] sm:$0xff]  ;;  %v2012_v56 = vcombine.high %v371_v50, %v375_v51 }
  0x18   : > { %674 = vmatprep.subr.bf16.mxu0 %v1959_v37  ;;  %717 = vmatprep.subr.bf16.mxu1 %v1961_v38  ;;  %v382_v28 = vld [vmem:[%s2634_s3 + $0xe8] sm:$0xff]  ;;  %v2016_v31 = vcombine.high %v377_v25, %v381_v26  ;;  %v360_v36 = vld [vmem:[%s2634_s3 + $0x38] sm:$0xff]  ;;  %v2015_v37 = vcombine.low %v377_v25, %v381_v26  ;;  %v2407_v43 = vld [vmem:[%s324_s16] sm:$0xff]  }
  0x19   : > { %v2018_v32 = vcombine.high %v378_v27, %v382_v28  ;;  %v2017_v38 = vcombine.low %v378_v27, %v382_v28  ;;  %v1998_v40 = vcombine.high %v356_v35, %v360_v36  ;;  %v1997_v47 = vcombine.low %v356_v35, %v360_v36  ;;  %v379_v58 = vld [vmem:[%s2634_s3 + $0xd0] sm:$0xff]  ;;  %v1102_v2 = vld [vmem:[%s2634_s3 + $0x200] sm:$0xff] }
  0x1a   : > { %1986 = vmatmul.mubr.msk.bf16.vlgmr.msra.gmra.mrb[0].mxu0 %vm584_vm0, %v2284_v41  ;;  %1987 = vmatmul.mubr.msk.bf16.vlgmr.msra.gmra.mrb[0].mxu1 %vm584_vm0, %v2284_v41  ;;  %v383_v59 = vld [vmem:[%s2634_s3 + $0xf0] sm:$0xff]  ;;  %v1106_v3 = vld [vmem:[%s2634_s3 + $0x220] sm:$0xff] }
  0x1b   : > { %675 = vmatpush1.bf16.msra.mxu0 %v1958_v44  ;;  %718 = vmatpush1.bf16.msra.mxu1 %v1960_v45  ;;  %v364_v44 = vld [vmem:[%s2634_s3 + $0x58] sm:$0xff]  ;;  %v2020_v0 = vcombine.high %v379_v58, %v383_v59  ;;  %v2029_v9 = vcombine.high %v1102_v2, %v1106_v3  ;;  %v1110_v11 = vld [vmem:[%s2634_s3 + $0x240] sm:$0xff]  ;;  %v1104_v35 = vld [vmem:[%s2634_s3 + $0x210] sm:$0xff] }
  0x1c   : > { %676 = vmatprep.subr.bf16.mxu0 %v1967_v46  ;;  %719 = vmatprep.subr.bf16.mxu1 %v1969_v48  ;;  %v368_v45 = vld [vmem:[%s2634_s3 + $0x78] sm:$0xff]  ;;  %v1995_v46 = vcombine.low %v355_v33, %v359_v34  ;;  %v1114_v12 = vld [vmem:[%s2634_s3 + $0x260] sm:$0xff]  ;;  %v1108_v36 = vld [vmem:[%s2634_s3 + $0x230] sm:$0xff] }
  0x1d   : > { %706 = vmatprep.mubr.bf16.mxu0 %v2154_v8  ;;  %749 = vmatprep.mubr.bf16.mxu1 %v2154_v8  ;;  %v2006_v49 = vcombine.high %v364_v44, %v368_v45  ;;  %v2037_v17 = vcombine.high %v1110_v11, %v1114_v12  ;;  %v1118_v19 = vld [vmem:[%s2634_s3 + $0x280] sm:$0xff] }
  0x1e   : > { %v1122_v20 = vld [vmem:[%s2634_s3 + $0x2a0] sm:$0xff] }
  0x1f   : > { %677 = vmatpush1.bf16.msra.mxu0 %v1966_v52  ;;  %720 = vmatpush1.bf16.msra.mxu1 %v1968_v53  ;;  %v372_v52 = vld [vmem:[%s2634_s3 + $0x98] sm:$0xff]  ;;  %v2045_v25 = vcombine.high %v1118_v19, %v1122_v20  ;;  %v1126_v27 = vld [vmem:[%s2634_s3 + $0x2c0] sm:$0xff] }
  0x20   : > { %678 = vmatprep.subr.bf16.mxu0 %v1975_v54  ;;  %721 = vmatprep.subr.bf16.mxu1 %v1977_v55  ;;  %v376_v53 = vld [vmem:[%s2634_s3 + $0xb8] sm:$0xff]  ;;  %v2005_v55 = vcombine.low %v364_v44, %v368_v45  ;;  %v1130_v28 = vld [vmem:[%s2634_s3 + $0x2e0] sm:$0xff]  ;;  %v1116_v44 = vld [vmem:[%s2634_s3 + $0x270] sm:$0xff] }
  0x21   : > { %v2014_v57 = vcombine.high %v372_v52, %v376_v53  ;;  %v2053_v33 = vcombine.high %v1126_v27, %v1130_v28  ;;  %v2129_v45 = vld [vmem:[%s344_s26] sm:$0xff]   ;;  %s349_s26 = scalar_lea.vmem %s2637_s6, %s2248_s29 }
  0x23   : > { %679 = vmatpush1.bf16.msra.mxu0 %v1974_v60  ;;  %722 = vmatpush1.bf16.msra.mxu1 %v1976_v61  ;;  %v380_v60 = vld [vmem:[%s2634_s3 + $0xd8] sm:$0xff] }
  0x24   : > { %680 = vmatprep.subr.bf16.mxu0 %v1983_v62  ;;  %723 = vmatprep.subr.bf16.mxu1 %v1985_v63  ;;  %v384_v61 = vld [vmem:[%s2634_s3 + $0xf8] sm:$0xff]  ;;  %v2011_v62 = vcombine.low %v371_v50, %v375_v51  ;;  %v2013_v63 = vcombine.low %v372_v52, %v376_v53  ;;  %v1120_v52 = vld [vmem:[%s2634_s3 + $0x290] sm:$0xff] }
  0x25   : > { %v2022_v1 = vcombine.high %v380_v60, %v384_v61  ;;  %v1124_v53 = vld [vmem:[%s2634_s3 + $0x2b0] sm:$0xff] }
  0x27   : > { %681 = vmatpush1.bf16.msra.mxu0 %v1982_v4  ;;  %724 = vmatpush1.bf16.msra.mxu1 %v1984_v5  ;;  %v1103_v4 = vld [vmem:[%s2634_s3 + $0x208] sm:$0xff] }
  0x28   : > { %928 = vmatprep.subr.bf16.mxu0 %v1992_v6  ;;  %971 = vmatprep.subr.bf16.mxu1 %v1994_v7  ;;  %v1107_v5 = vld [vmem:[%s2634_s3 + $0x228] sm:$0xff]  ;;  %v2019_v6 = vcombine.low %v379_v58, %v383_v59  ;;  %v2021_v7 = vcombine.low %v380_v60, %v384_v61  ;;  %v2049_v58 = vcombine.high %v1120_v52, %v1124_v53  ;;  %v1128_v60 = vld [vmem:[%s2634_s3 + $0x2d0] sm:$0xff] }
  0x29   : > { %v2031_v10 = vcombine.high %v1103_v4, %v1107_v5  ;;  %v1132_v61 = vld [vmem:[%s2634_s3 + $0x2f0] sm:$0xff] }
  0x2a   : > { %1988 = vmatmul.mubr.msk.bf16.vlgmr.msra.gmra.mrb[4].mxu0 %vm584_vm0, %v2284_v41  ;;  %1989 = vmatmul.mubr.msk.bf16.vlgmr.msra.gmra.mrb[4].mxu1 %vm584_vm0, %v2284_v41  ;;  %v363_v41 = vld [vmem:[%s2634_s3 + $0x50] sm:$0xff] }
  0x2b   : > { %929 = vmatpush1.bf16.msra.mxu0 %v1991_v13  ;;  %972 = vmatpush1.bf16.msra.mxu1 %v1993_v14  ;;  %v2004_v48 = vcombine.high %v363_v41, %v367_v42  ;;  %v2003_v54 = vcombine.low %v363_v41, %v367_v42  ;;  %v1111_v13 = vld [vmem:[%s2634_s3 + $0x248] sm:$0xff]  ;;  %v2033_v41 = vcombine.high %v1104_v35, %v1108_v36 }
  0x2c   : > { %930 = vmatprep.subr.bf16.mxu0 %v2000_v15  ;;  %973 = vmatprep.subr.bf16.mxu1 %v2002_v16  ;;  %v1115_v14 = vld [vmem:[%s2634_s3 + $0x268] sm:$0xff]  ;;  %v2028_v15 = vcombine.low %v1102_v2, %v1106_v3  ;;  %v2030_v16 = vcombine.low %v1103_v4, %v1107_v5  ;;  %v2057_v2 = vcombine.high %v1128_v60, %v1132_v61 }
  0x2d   : > { %960 = vmatprep.mubr.bf16.mxu0 %v2154_v8  ;;  %1003 = vmatprep.mubr.bf16.mxu1 %v2154_v8  ;;  %v2039_v18 = vcombine.high %v1111_v13, %v1115_v14  ;;  %v2056_v4 = vcombine.low %v1128_v60, %v1132_v61 }
  0x2f   : > { %931 = vmatpush1.bf16.msra.mxu0 %v1999_v21  ;;  %974 = vmatpush1.bf16.msra.mxu1 %v2001_v22  ;;  %v1119_v21 = vld [vmem:[%s2634_s3 + $0x288] sm:$0xff] }
  0x30   : > { %932 = vmatprep.subr.bf16.mxu0 %v2008_v23  ;;  %975 = vmatprep.subr.bf16.mxu1 %v2010_v24  ;;  %v1123_v22 = vld [vmem:[%s2634_s3 + $0x2a8] sm:$0xff]  ;;  %v2036_v23 = vcombine.low %v1110_v11, %v1114_v12  ;;  %v2038_v24 = vcombine.low %v1111_v13, %v1115_v14  ;;  %v2572_v13 = vld [vmem:[%s2636_s5] sm:$0xff] }
  0x31   : > { %v2047_v26 = vcombine.high %v1119_v21, %v1123_v22 }
  0x33   : > { %933 = vmatpush1.bf16.msra.mxu0 %v2007_v29  ;;  %976 = vmatpush1.bf16.msra.mxu1 %v2009_v30  ;;  %v1127_v29 = vld [vmem:[%s2634_s3 + $0x2c8] sm:$0xff] }
  0x34   : > { %934 = vmatprep.subr.bf16.mxu0 %v2016_v31  ;;  %977 = vmatprep.subr.bf16.mxu1 %v2018_v32  ;;  %v1131_v30 = vld [vmem:[%s2634_s3 + $0x2e8] sm:$0xff]  ;;  %v2044_v31 = vcombine.low %v1118_v19, %v1122_v20  ;;  %v2046_v32 = vcombine.low %v1119_v21, %v1123_v22 }
  0x35   : > { %v2055_v34 = vcombine.high %v1127_v29, %v1131_v30 }
  0x37   : > { %935 = vmatpush1.bf16.msra.mxu0 %v2015_v37  ;;  %978 = vmatpush1.bf16.msra.mxu1 %v2017_v38  ;;  %v1105_v37 = vld [vmem:[%s2634_s3 + $0x218] sm:$0xff] }
  0x38   : > { %1014 = vmatprep.subr.bf16.mxu0 %v1996_v39  ;;  %1057 = vmatprep.subr.bf16.mxu1 %v1998_v40  ;;  %v1109_v38 = vld [vmem:[%s2634_s3 + $0x238] sm:$0xff]  ;;  %v2052_v39 = vcombine.low %v1126_v27, %v1130_v28  ;;  %v2054_v40 = vcombine.low %v1127_v29, %v1131_v30 }
  0x39   : > { %v2035_v42 = vcombine.high %v1105_v37, %v1109_v38 }
  0x3a   : > { %2023 = vmatmul.mubr.msk.bf16.vlgmr.msra.gmra.mrb[0].mxu0 %vm584_vm0, %v2407_v43  ;;  %2024 = vmatmul.mubr.msk.bf16.vlgmr.msra.gmra.mrb[0].mxu1 %vm584_vm0, %v2407_v43 }
  0x3b   : > { %1015 = vmatpush1.bf16.msra.mxu0 %v1995_v46  ;;  %1058 = vmatpush1.bf16.msra.mxu1 %v1997_v47  ;;  %v1113_v46 = vld [vmem:[%s2634_s3 + $0x258] sm:$0xff] }
  0x3c   : > { %1016 = vmatprep.subr.bf16.mxu0 %v2004_v48  ;;  %1059 = vmatprep.subr.bf16.mxu1 %v2006_v49  ;;  %v1117_v47 = vld [vmem:[%s2634_s3 + $0x278] sm:$0xff]  ;;  %v2032_v48 = vcombine.low %v1104_v35, %v1108_v36  ;;  %v2034_v49 = vcombine.low %v1105_v37, %v1109_v38 }
  0x3d   : > { %1046 = vmatprep.mubr.bf16.mxu0 %v2154_v8  ;;  %1089 = vmatprep.mubr.bf16.mxu1 %v2154_v8  ;;  %v2043_v51 = vcombine.high %v1113_v46, %v1117_v47 }
  0x3f   : > { %1017 = vmatpush1.bf16.msra.mxu0 %v2003_v54  ;;  %1060 = vmatpush1.bf16.msra.mxu1 %v2005_v55  ;;  %v1121_v54 = vld [vmem:[%s2634_s3 + $0x298] sm:$0xff] }
  0x40   : > { %1018 = vmatprep.subr.bf16.mxu0 %v2012_v56  ;;  %1061 = vmatprep.subr.bf16.mxu1 %v2014_v57  ;;  %v1125_v55 = vld [vmem:[%s2634_s3 + $0x2b8] sm:$0xff]  ;;  %v2042_v57 = vcombine.low %v1113_v46, %v1117_v47 }
  0x41   : > { %v2051_v59 = vcombine.high %v1121_v54, %v1125_v55 }
  0x43   : > { %1019 = vmatpush1.bf16.msra.mxu0 %v2011_v62  ;;  %1062 = vmatpush1.bf16.msra.mxu1 %v2013_v63  ;;  %v1129_v62 = vld [vmem:[%s2634_s3 + $0x2d8] sm:$0xff] }
  0x44   : > { %1020 = vmatprep.subr.bf16.mxu0 %v2020_v0  ;;  %1063 = vmatprep.subr.bf16.mxu1 %v2022_v1  ;;  %v1133_v63 = vld [vmem:[%s2634_s3 + $0x2f8] sm:$0xff]  ;;  %v2048_v0 = vcombine.low %v1120_v52, %v1124_v53  ;;  %v2050_v1 = vcombine.low %v1121_v54, %v1125_v55 }
  0x45   : > { %v2059_v3 = vcombine.high %v1129_v62, %v1133_v63  ;;  %v2058_v5 = vcombine.low %v1129_v62, %v1133_v63 }
  0x47   : > { %1021 = vmatpush1.bf16.msra.mxu0 %v2019_v6  ;;  %1064 = vmatpush1.bf16.msra.mxu1 %v2021_v7 }
  0x48   : > { %1302 = vmatprep.subr.bf16.mxu0 %v2029_v9  ;;  %1345 = vmatprep.subr.bf16.mxu1 %v2031_v10  ;;  %v2564_v9 = vld [vmem:[%s2635_s4] sm:$0xff] }
  0x4a   : > { %2025 = vmatmul.mubr.msk.bf16.vlgmr.msra.gmra.mrb[4].mxu0 %vm584_vm0, %v2407_v43  ;;  %2026 = vmatmul.mubr.msk.bf16.vlgmr.msra.gmra.mrb[4].mxu1 %vm584_vm0, %v2407_v43  ;;  %v1112_v43 = vld [vmem:[%s2634_s3 + $0x250] sm:$0xff] }
  0x4b   : > { %1303 = vmatpush1.bf16.msra.mxu0 %v2028_v15  ;;  %1346 = vmatpush1.bf16.msra.mxu1 %v2030_v16  ;;  %v2041_v50 = vcombine.high %v1112_v43, %v1116_v44  ;;  %v2040_v56 = vcombine.low %v1112_v43, %v1116_v44 }
  0x4c   : > { %1304 = vmatprep.subr.bf16.mxu0 %v2037_v17  ;;  %1347 = vmatprep.subr.bf16.mxu1 %v2039_v18 }
  0x4d   : > { %1334 = vmatprep.mubr.bf16.mxu0 %v2154_v8  ;;  %1377 = vmatprep.mubr.bf16.mxu1 %v2154_v8 }
  0x4f   : > { %1305 = vmatpush1.bf16.msra.mxu0 %v2036_v23  ;;  %1348 = vmatpush1.bf16.msra.mxu1 %v2038_v24 }
  0x50   : > { %1306 = vmatprep.subr.bf16.mxu0 %v2045_v25  ;;  %1349 = vmatprep.subr.bf16.mxu1 %v2047_v26 }
  0x53   : > { %1307 = vmatpush1.bf16.msra.mxu0 %v2044_v31  ;;  %1350 = vmatpush1.bf16.msra.mxu1 %v2046_v32 }
  0x54   : > { %1308 = vmatprep.subr.bf16.mxu0 %v2053_v33  ;;  %1351 = vmatprep.subr.bf16.mxu1 %v2055_v34 }
  0x57   : > { %1309 = vmatpush1.bf16.msra.mxu0 %v2052_v39  ;;  %1352 = vmatpush1.bf16.msra.mxu1 %v2054_v40 }
  0x58   : > { %1388 = vmatprep.subr.bf16.mxu0 %v2033_v41  ;;  %1431 = vmatprep.subr.bf16.mxu1 %v2035_v42 }
  0x5a   : > { %2060 = vmatmul.mubr.msk.bf16.vlgmr.msra.gmra.mrb[0].mxu0 %vm584_vm0, %v2129_v45  ;;  %2061 = vmatmul.mubr.msk.bf16.vlgmr.msra.gmra.mrb[0].mxu1 %vm584_vm0, %v2129_v45 }
  0x5b   : > { %1389 = vmatpush1.bf16.msra.mxu0 %v2032_v48  ;;  %1432 = vmatpush1.bf16.msra.mxu1 %v2034_v49 }
  0x5c   : > { %1390 = vmatprep.subr.bf16.mxu0 %v2041_v50  ;;  %1433 = vmatprep.subr.bf16.mxu1 %v2043_v51 }
  0x5d   : > { %1420 = vmatprep.mubr.bf16.mxu0 %v2154_v8  ;;  %1463 = vmatprep.mubr.bf16.mxu1 %v2154_v8  ;;  %v1492_v8 = vlaneseq }
  0x5f   : > { %1391 = vmatpush1.bf16.msra.mxu0 %v2040_v56  ;;  %1434 = vmatpush1.bf16.msra.mxu1 %v2042_v57  ;;  %v2558_v6 = vshrl.u32 %v1492_v8, 7 }
  0x60   : > { %1392 = vmatprep.subr.bf16.mxu0 %v2049_v58  ;;  %1435 = vmatprep.subr.bf16.mxu1 %v2051_v59 }
  0x61   : > { %v1494_v7 = vsub.s32 0, %v2558_v6  ;;  %v1502_v10 = vsub.s32 2, %v2558_v6  ;;  %v1498_v11 = vsub.s32 1, %v2558_v6  ;;  %v1506_v12 = vsub.s32 3, %v2558_v6 }
  0x62   : > { %v1510_v30 = vsub.s32 4, %v2558_v6  ;;  %v1518_v36 = vsub.s32 6, %v2558_v6  ;;  %v1514_v44 = vsub.s32 5, %v2558_v6  ;;  %v1522_v47 = vsub.s32 7, %v2558_v6 }
  0x63   : > { %1393 = vmatpush1.bf16.msra.mxu0 %v2048_v0  ;;  %1436 = vmatpush1.bf16.msra.mxu1 %v2050_v1  ;;  %v1495_v14 = vrot.slane %v2564_v9, %v1494_v7  ;;  %v1503_v15 = vrot.slane %v2564_v9, %v1502_v10  ;;  %v1499_v16 = vrot.slane %v2564_v9, %v1498_v11 }
  0x64   : > { %1394 = vmatprep.subr.bf16.mxu0 %v2057_v2  ;;  %1437 = vmatprep.subr.bf16.mxu1 %v2059_v3  ;;  %v1553_v17 = vrot.slane %v2572_v13, %v1494_v7  ;;  %v1507_v18 = vrot.slane %v2564_v9, %v1506_v12  ;;  %v1561_v20 = vrot.slane %v2572_v13, %v1502_v10 }
  0x65   : > { %v1557_v21 = vrot.slane %v2572_v13, %v1498_v11  ;;  %v1565_v28 = vrot.slane %v2572_v13, %v1506_v12  ;;  %v2586_v46 = vrot.slane %v2564_v9, %v1510_v30  ;;  %v2590_v48 = vrot.slane %v2564_v9, %v1518_v36 }
  0x66   : > { %v1569_v8 = vrot.slane %v2572_v13, %v1510_v30  ;;  %v1515_v7 = vrot.slane %v2564_v9, %v1514_v44  ;;  %v2155_v12 = vmov 1966171168  }
  0x67   : > { %1395 = vmatpush1.bf16.msra.mxu0 %v2056_v4  ;;  %1438 = vmatpush1.bf16.msra.mxu1 %v2058_v5 }
  0x6a   : > { %2062 = vmatmul.mubr.msk.bf16.vlgmr.msra.gmra.mrb[4].mxu0 %vm584_vm0, %v2129_v45  ;;  %2063 = vmatmul.mubr.msk.bf16.vlgmr.msra.gmra.mrb[4].mxu1 %vm584_vm0, %v2129_v45 }
 0x12d   : > { %v1336_v19 = vpop.f32.mrb[0].mxu0  ;;  %v1379_v23 = vpop.f32.mrb[0].mxu1 }
 0x12e   : > { %v1532_v22 = vmul.f32 %v1495_v14, %v1336_v19  ;;  %v1338_v24 = vpop.f32.mrb[1].mxu0  ;;  %v1534_v25 = vmul.f32 %v1503_v15, %v1379_v23  ;;  %v1381_v27 = vpop.f32.mrb[1].mxu1 }
 0x12f   : > { %v1533_v26 = vmul.f32 %v1499_v16, %v1338_v24  ;;  %v1340_v29 = vpop.f32.mrb[2].mxu0  ;;  %v1535_v32 = vmul.f32 %v1507_v18, %v1381_v27  ;;  %v1383_v34 = vpop.f32.mrb[2].mxu1 }
 0x130   : > { %v1590_v31 = vadd.f32 %v1553_v17, %v1532_v22  ;;  %v1540_v33 = vmul.f32 %v1495_v14, %v1340_v29  ;;  %v1342_v35 = vpop.f32.mrb[3].mxu0  ;;  %v1592_v37 = vadd.f32 %v1561_v20, %v1534_v25  ;;  %v1542_v39 = vmul.f32 %v1503_v15, %v1383_v34  ;;  %v1385_v40 = vpop.f32.mrb[3].mxu1 }
 0x131   : > { %v1591_v38 = vadd.f32 %v1557_v21, %v1533_v26  ;;  %v1541_v43 = vmul.f32 %v1499_v16, %v1342_v35  ;;  %v1593_v45 = vadd.f32 %v1565_v28, %v1535_v32  ;;  %v1543_v55 = vmul.f32 %v1507_v18, %v1385_v40 }
 0x132   : > { %v1622_v41 = vmul.f32 0.2, %v1590_v31  ;;  %v1598_v42 = vadd.f32 %v1553_v17, %v1540_v33  ;;  %vm1606_vm1 = vcmp.ge.f32.partialorder %v1590_v31, 0.0  ;;  %vm1608_vm2 = vcmp.ge.f32.partialorder %v1592_v37, 0.0 }
 0x133   : > { %v1624_v49 = vmul.f32 0.2, %v1592_v37  ;;  %v1623_v50 = vmul.f32 0.2, %v1591_v38  ;;  %v1600_v52 = vadd.f32 %v1561_v20, %v1542_v39  ;;  %vm1607_vm4 = vcmp.ge.f32.partialorder %v1591_v38, 0.0 }
 0x134   : > { %vm1614_vm3 = vcmp.ge.f32.partialorder %v1598_v42, 0.0  ;;  %v1630_v51 = vmul.f32 0.2, %v1598_v42  ;;  %v1638_v53 = vsel %vm1606_vm1, %v1590_v31, %v1622_v41  ;;  %v1599_v54 = vadd.f32 %v1557_v21, %v1541_v43 }
 0x135   : > { %vm1609_vm5 = vcmp.ge.f32.partialorder %v1593_v45, 0.0  ;;  %vm1616_vm6 = vcmp.ge.f32.partialorder %v1600_v52, 0.0  ;;  %v1632_v57 = vmul.f32 0.2, %v1600_v52  ;;  %v1601_v60 = vadd.f32 %v1565_v28, %v1543_v55 }
 0x136   : > { %v1646_v56 = vsel %vm1614_vm3, %v1598_v42, %v1630_v51  ;;  %vm1615_vm7 = vcmp.ge.f32.partialorder %v1599_v54, 0.0  ;;  %v1631_v59 = vmul.f32 0.2, %v1599_v54  ;;  %v1640_v61 = vsel %vm1608_vm2, %v1592_v37, %v1624_v49 }
 0x137   : > { %v1654_v58 = vmax.f32 %v1638_v53, %v1646_v56  ;;  %v1639_v62 = vsel %vm1607_vm4, %v1591_v38, %v1623_v50  ;;  %v1625_v63 = vmul.f32 0.2, %v1593_v45  ;;  %v1648_v0 = vsel %vm1616_vm6, %v1600_v52, %v1632_v57 }
 0x138   : > { %v1668_v2 = vmax.f32 %v1640_v61, %v1648_v0  ;;  %v1647_v3 = vsel %vm1615_vm7, %v1599_v54, %v1631_v59  ;;  %vm1617_vm8 = vcmp.ge.f32.partialorder %v1601_v60, 0.0  ;;  %v1633_v5 = vmul.f32 0.2, %v1601_v60 }
 0x139   : > { %v1655_v1 = vrot.slane %v1654_v58, 4  ;;  %v1661_v4 = vmax.f32 %v1639_v62, %v1647_v3  ;;  %v1727_v14 = vunpack.c.l.s4 %v2155_v12  ;;  %v1577_v15 = vrot.slane %v2572_v13, %v1518_v36 }
 0x13a   : > { %v1669_v11 = vrot.slane %v1668_v2, 4  ;;  %v1641_v16 = vsel %vm1609_vm5, %v1593_v45, %v1625_v63  ;;  %v1649_v18 = vsel %vm1617_vm8, %v1601_v60, %v1633_v5  ;;  %v1573_v20 = vrot.slane %v2572_v13, %v1514_v44 }
 0x13b   : > { %v1656_v10 = vmax.f32 %v1654_v58, %v1655_v1  ;;  %v1662_v17 = vrot.slane %v1661_v4, 4  ;;  %v1675_v23 = vmax.f32 %v1641_v16, %v1649_v18  ;;  %v1523_v31 = vrot.slane %v2564_v9, %v1522_v47 }
 0x13c   : > { %v1670_v22 = vmax.f32 %v1668_v2, %v1669_v11  ;;  %v1728_v40 = vunpack.c.0.s8 %v1727_v14  ;;  %v1581_v50 = vrot.slane %v2572_v13, %v1522_v47 }
 0x13d   : > { %v1422_v19 = vpop.f32.mrb[4].mxu0  ;;  %v1657_v21 = vrot.slane %v1656_v10, 2  ;;  %v1465_v25 = vpop.f32.mrb[4].mxu1  ;;  %v1663_v27 = vmax.f32 %v1661_v4, %v1662_v17  ;;  %v1676_v35 = vrot.slane %v1675_v23, 4 }
 0x13e   : > { %v1536_v24 = vmul.f32 %v2586_v46, %v1422_v19  ;;  %v1424_v26 = vpop.f32.mrb[5].mxu0  ;;  %v1538_v28 = vmul.f32 %v2590_v48, %v1465_v25  ;;  %v1467_v30 = vpop.f32.mrb[5].mxu1  ;;  %v1671_v34 = vrot.slane %v1670_v22, 2  ;;  %v2607_v58 = vsub.s32 %v1728_v40, %v2558_v6 }
 0x13f   : > { %v1537_v29 = vmul.f32 %v1515_v7, %v1424_v26  ;;  %v1426_v32 = vpop.f32.mrb[6].mxu0  ;;  %v1658_v33 = vmax.f32 %v1656_v10, %v1657_v21  ;;  %v1469_v37 = vpop.f32.mrb[6].mxu1  ;;  %v1664_v39 = vrot.slane %v1663_v27, 2  ;;  %v1677_v49 = vmax.f32 %v1675_v23, %v1676_v35 }
 0x140   : > { %v1594_v36 = vadd.f32 %v1569_v8, %v1536_v24  ;;  %v1428_v38 = vpop.f32.mrb[7].mxu0  ;;  %v1596_v41 = vadd.f32 %v1577_v15, %v1538_v28  ;;  %v1471_v43 = vpop.f32.mrb[7].mxu1  ;;  %v1672_v45 = vmax.f32 %v1670_v22, %v1671_v34  ;;  %v1539_v55 = vmul.f32 %v1523_v31, %v1467_v30 }
 0x141   : > { %v1595_v42 = vadd.f32 %v1573_v20, %v1537_v29  ;;  %v1659_v44 = vrot.slane %v1658_v33, 1  ;;  %v1665_v9 = vmax.f32 %v1663_v27, %v1664_v39  ;;  %v1678_v54 = vrot.slane %v1677_v49, 2 }
 0x142   : > { %vm1610_vm9 = vcmp.ge.f32.partialorder %v1594_v36, 0.0  ;;  %v1626_v51 = vmul.f32 0.2, %v1594_v36  ;;  %v1628_v52 = vmul.f32 0.2, %v1596_v41  ;;  %v1673_v53 = vrot.slane %v1672_v45, 1 }
 0x143   : > { %vm1612_vm10 = vcmp.ge.f32.partialorder %v1596_v41, 0.0  ;;  %v1660_v56 = vmax.f32 %v1658_v33, %v1659_v44  ;;  %v1666_v57 = vrot.slane %v1665_v9, 1  ;;  %vm1611_vm11 = vcmp.ge.f32.partialorder %v1595_v42, 0.0 }
 0x144   : > { %v1679_v59 = vmax.f32 %v1677_v49, %v1678_v54  ;;  %v1642_v60 = vsel %vm1610_vm9, %v1594_v36, %v1626_v51  ;;  %v1627_v61 = vmul.f32 0.2, %v1595_v42  ;;  %v1544_v62 = vmul.f32 %v2586_v46, %v1426_v32 }
 0x145   : > { %v1667_v13 = vmax.f32 %v1665_v9, %v1666_v57  ;;  %v1644_v47 = vsel %vm1612_vm10, %v1596_v41, %v1628_v52  ;;  %v1546_v63 = vmul.f32 %v2590_v48, %v1469_v37  ;;  %v1545_v0 = vmul.f32 %v1515_v7, %v1428_v38 }
 0x146   : > { %v1674_v1 = vmax.f32 %v1672_v45, %v1673_v53  ;;  %v1680_v2 = vrot.slane %v1679_v59, 1  ;;  %v1597_v3 = vadd.f32 %v1581_v50, %v1539_v55  ;;  %v1602_v4 = vadd.f32 %v1569_v8, %v1544_v62 }
 0x147   : > { %v1722_v5 = vcombine.low %v1660_v56, %v1667_v13  ;;  %v1604_v10 = vadd.f32 %v1577_v15, %v1546_v63  ;;  %v1603_v11 = vadd.f32 %v1573_v20, %v1545_v0  ;;  %v1547_v6 = vmul.f32 %v1523_v31, %v1471_v43 }
 0x148   : > { %v1681_v12 = vmax.f32 %v1679_v59, %v1680_v2  ;;  %v1643_v14 = vsel %vm1611_vm11, %v1595_v42, %v1627_v61  ;;  %vm1618_vm12 = vcmp.ge.f32.partialorder %v1602_v4, 0.0  ;;  %v1634_v16 = vmul.f32 0.2, %v1602_v4 }
 0x149   : > { %v1732_v46 = vrot.slane %v1722_v5, %v2607_v58  ;;  %vm1620_vm13 = vcmp.ge.f32.partialorder %v1604_v10, 0.0  ;;  %v1636_v17 = vmul.f32 0.2, %v1604_v10  ;;  %vm1619_vm14 = vcmp.ge.f32.partialorder %v1603_v11, 0.0 }
 0x14a   : > { %v1723_v48 = vcombine.low %v1674_v1, %v1681_v12  ;;  %v1650_v7 = vsel %vm1618_vm12, %v1602_v4, %v1634_v16  ;;  %v1635_v18 = vmul.f32 0.2, %v1603_v11  ;;  %v1605_v19 = vadd.f32 %v1581_v50, %v1547_v6 }
 0x14b   : > { %vm1613_vm15 = vcmp.ge.f32.partialorder %v1597_v3, 0.0  ;;  %v1629_v8 = vmul.f32 0.2, %v1597_v3  ;;  %v1682_v21 = vmax.f32 %v1642_v60, %v1650_v7  ;;  %v1652_v15 = vsel %vm1620_vm13, %v1604_v10, %v1636_v17 }
 0x14c   : > { %v1739_v20 = vrot.slane %v1723_v48, %v2607_v58  ;;  %v1696_v22 = vmax.f32 %v1644_v47, %v1652_v15  ;;  %v1651_v23 = vsel %vm1619_vm14, %v1603_v11, %v1635_v18  ;;  %vm1621_vm0 = vcmp.ge.f32.partialorder %v1605_v19, 0.0 }
 0x14d   : > { %v1683_v24 = vrot.slane %v1682_v21, 4  ;;  %v1689_v25 = vmax.f32 %v1643_v14, %v1651_v23  ;;  %v1637_v26 = vmul.f32 0.2, %v1605_v19  ;;  %v1645_v29 = vsel %vm1613_vm15, %v1597_v3, %v1629_v8 }
 0x14e   : > { %v1754_v27 = vcombine.low %v1732_v46, %v1739_v20  ;;  %v1697_v28 = vrot.slane %v1696_v22, 4 }
 0x14f   : > { %v1684_v30 = vmax.f32 %v1682_v21, %v1683_v24  ;;  %v1690_v31 = vrot.slane %v1689_v25, 4  ;;  %v1653_v32 = vsel %vm1621_vm0, %v1605_v19, %v1637_v26 }
 0x150   : > { %v1698_v33 = vmax.f32 %v1696_v22, %v1697_v28  ;;  %v1703_v34 = vmax.f32 %v1645_v29, %v1653_v32  ;;  %v1762_v62 = vrot.slane %v1754_v27, %v2607_v58 }
 0x151   : > { %v1685_v35 = vrot.slane %v1684_v30, 2  ;;  %v1691_v36 = vmax.f32 %v1689_v25, %v1690_v31 }
 0x152   : > { %v1699_v37 = vrot.slane %v1698_v33, 2  ;;  %v1704_v38 = vrot.slane %v1703_v34, 4 }
 0x153   : > { %v1686_v39 = vmax.f32 %v1684_v30, %v1685_v35  ;;  %v1692_v40 = vrot.slane %v1691_v36, 2 }
 0x154   : > { %v1700_v41 = vmax.f32 %v1698_v33, %v1699_v37  ;;  %v1705_v42 = vmax.f32 %v1703_v34, %v1704_v38 }
 0x155   : > { %v1687_v43 = vrot.slane %v1686_v39, 1  ;;  %v1693_v44 = vmax.f32 %v1691_v36, %v1692_v40 }
 0x156   : > { %v1701_v45 = vrot.slane %v1700_v41, 1  ;;  %v1706_v49 = vrot.slane %v1705_v42, 2 }
 0x157   : > { %v1688_v50 = vmax.f32 %v1686_v39, %v1687_v43  ;;  %v1694_v9 = vrot.slane %v1693_v44, 1 }
 0x158   : > { %v1707_v51 = vmax.f32 %v1705_v42, %v1706_v49  ;;  %v1702_v53 = vmax.f32 %v1700_v41, %v1701_v45 }
 0x159   : > { %v1695_v52 = vmax.f32 %v1693_v44, %v1694_v9 }
 0x15a   : > { %v1708_v54 = vrot.slane %v1707_v51, 1 }
 0x15b   : > { %v1724_v55 = vcombine.low %v1688_v50, %v1695_v52 }
 0x15c   : > { %v1709_v56 = vmax.f32 %v1707_v51, %v1708_v54 }
 0x15d   : > { %v1746_v57 = vrot.slane %v1724_v55, %v2607_v58 }
 0x15e   : > { %v1725_v59 = vcombine.low %v1702_v53, %v1709_v56 }
 0x160   : > { %v1753_v60 = vrot.slane %v1725_v59, %v2607_v58 }
 0x162   : > { %v1755_v61 = vcombine.low %v1746_v57, %v1753_v60 }
 0x164   : > { %v1769_v13 = vrot.slane %v1755_v61, %v2607_v58 }
 0x166   : > { %v1770_v47 = vcombine.low %v1762_v62, %v1769_v13 }
 0x168   : > { %1772 = vst [vmem:[%s349_s26] sm:$0xff] %v1770_v47 }
 0x169 PF: > { %s16_s23 = sadd.s32 1, %s2152_s23   ;;  %s2638_s21 = smov %s2148_s22 }
 0x16a   : > { %p13_p5 = scmp.ge.s32.totalorder %s16_s23, 4   ;;  %s2639_s22 = smov %s2641_s24 }
 0x16c   :  { %15 = sbr.rel (!%p13_p5) target bundleno = 2 (0x2), region = 88 }

// kernel: dgcnn_semseg_forward.15
= control target key start
LH: loop header
LB: loop body
LE: loop exit
PB: predicated region body
PF: predicated region fallthrough
CT: control target
= control target key end

     0   :  { %s5107_s17 = smov 0   ;;  %s5109_s18 = smov 0   ;;  %s6474_s0 = inlined_call_operand.vmem [shape: f32[2,1,1024], index: 0, kind: input, shape index: {}]   ;;  %s6475_s1 = inlined_call_operand.vmem [shape: bf16[2,16,64], index: 1, kind: input, shape index: {}]   ;;  %s6476_s2 = inlined_call_operand.vmem [shape: bf16[2,16,64], index: 2, kind: input, shape index: {}]   ;;  %s6477_s3 = inlined_call_operand.vmem [shape: bf16[2,16,64], index: 3, kind: input, shape index: {}]   ;;  %s6478_s4 = inlined_call_operand.vmem [shape: bf16[1216,512], index: 4, kind: input, shape index: {}]   ;;  %s6479_s5 = inlined_call_operand.vmem [shape: f32[1,512], index: 5, kind: input, shape index: {}]   ;;  %s6480_s6 = inlined_call_operand.vmem [shape: f32[1,512], index: 6, kind: input, shape index: {}]   ;;  %s6481_s7 = inlined_call_operand.vmem [shape: bf16[512,256], index: 7, kind: input, shape index: {}]   ;;  %s6482_s8 = inlined_call_operand.vmem [shape: f32[1,256], index: 8, kind: input, shape index: {}]   ;;  %s6483_s9 = inlined_call_operand.vmem [shape: f32[1,256], index: 9, kind: input, shape index: {}]   ;;  %s6484_s10 = inlined_call_operand.vmem [shape: bf16[256,128], index: 10, kind: input, shape index: {}]   ;;  %s6485_s11 = inlined_call_operand.vmem [shape: f32[2,16,128], index: 11, kind: output, shape index: {}]  }
   0x1   :  { %s5111_s19 = smov 0  }
   0x2 LB: > { %s33_s20 = sadd.s32 1, %s5040_s18  ;;  %p3953_p0 = scmp.ge.s32.totalorder %s5044_s19, 1  ;;  %s5044_s19 = sphi %s5111_s19, %s21_s19   ;;  %s5040_s18 = sphi %s5109_s18, %s6487_s18   ;;  %s5036_s17 = sphi %s5107_s17, %s6486_s17  }
   0x3   : > { %p35_p1 = scmp.ge.s32.totalorder %s33_s20, 2  ;;  %p401_p2 = scmp.lt.s32.totalorder %s5044_s19, 3 }
   0x5   : > { %s6489_s20 = smov (%p35_p1, %s33_s20), 0  ;;  %p402_p3 = pnand %p3953_p0, %p401_p2 }
   0x6   : > { %v4451_v0 = vld [vmem:[%s6478_s4 + $0x4] ss:$16 sps:$4 sm:$0xff] (!%p402_p3)   ;;  %v4455_v2 = vld [vmem:[%s6478_s4] ss:$16 sps:$4 sm:$0xff] (!%p402_p3)   ;;  %p471_p4 = scmp.lt.s32.totalorder (!%p402_p3), %s5036_s17, 1  ;;  %v518_v36 = vlaneseq (!%p402_p3)  ;;  %vm2551_vm0 = vcmask (!%p402_p3), 523264  }
   0x7   : > { %405 = sbr.rel (%p402_p3) target bundleno = 1031 (0x407), region = 64  ;;  %v4453_v1 = vld [vmem:[%s6478_s4 + $0x204] ss:$16 sps:$4 sm:$0xff] (!%p402_p3)   ;;  %2102 = vmatprep.subr.bf16.mxu1 (!%p402_p3), %v4451_v0  ;;  %v4456_v3 = vld [vmem:[%s6478_s4 + $0x200] ss:$16 sps:$4 sm:$0xff] (!%p402_p3)  }
   0x8   : > { %2143 = vmatprep.subr.bf16.mxu0 (!%p402_p3), %v4453_v1  ;;  %v4457_v4 = vld [vmem:[%s6478_s4 + $0x24] ss:$16 sps:$4 sm:$0xff] (!%p402_p3)   ;;  %2103 = vmatpush1.bf16.msra.mxu1 (!%p402_p3), %v4455_v2  ;;  %v4461_v6 = vld [vmem:[%s6478_s4 + $0x20] ss:$16 sps:$4 sm:$0xff] (!%p402_p3)   ;;  %v5248_v40 = vshrl.u32 (!%p402_p3), %v518_v36, 7 }
   0x9   : > { %2144 = vmatpush1.bf16.msra.mxu0 (!%p402_p3), %v4456_v3  ;;  %v4459_v5 = vld [vmem:[%s6478_s4 + $0x224] ss:$16 sps:$4 sm:$0xff] (!%p402_p3)   ;;  %2104 = vmatprep.subr.bf16.mxu1 (!%p402_p3), %v4457_v4  ;;  %v4462_v7 = vld [vmem:[%s6478_s4 + $0x220] ss:$16 sps:$4 sm:$0xff] (!%p402_p3)  }
   0xa   : > { %2145 = vmatprep.subr.bf16.mxu0 (!%p402_p3), %v4459_v5  ;;  %v4463_v8 = vld [vmem:[%s6478_s4 + $0x44] ss:$16 sps:$4 sm:$0xff] (!%p402_p3)   ;;  %v4467_v10 = vld [vmem:[%s6478_s4 + $0x40] ss:$16 sps:$4 sm:$0xff] (!%p402_p3)   ;;  %v5273_v46 = vsub.s32 (!%p402_p3), 1, %v5248_v40  ;;  %v5276_v47 = vsub.s32 (!%p402_p3), 3, %v5248_v40 }
   0xb   : > { %v4465_v9 = vld [vmem:[%s6478_s4 + $0x244] ss:$16 sps:$4 sm:$0xff] (!%p402_p3)   ;;  %v4468_v11 = vld [vmem:[%s6478_s4 + $0x240] ss:$16 sps:$4 sm:$0xff] (!%p402_p3)   ;;  %v536_v49 = vsub.s32 (!%p402_p3), 4, %v5248_v40 }
   0xc   : > { %2105 = vmatpush1.bf16.msra.mxu1 (!%p402_p3), %v4461_v6  ;;  %v4469_v12 = vld [vmem:[%s6478_s4 + $0x64] ss:$16 sps:$4 sm:$0xff] (!%p402_p3)   ;;  %v4473_v14 = vld [vmem:[%s6478_s4 + $0x60] ss:$16 sps:$4 sm:$0xff] (!%p402_p3)   ;;  %v5335_v6 = vsub.s32 (!%p402_p3), 0, %v5248_v40 }
   0xd   : > { %2146 = vmatpush1.bf16.msra.mxu0 (!%p402_p3), %v4462_v7  ;;  %2106 = vmatprep.subr.bf16.mxu1 (!%p402_p3), %v4463_v8  ;;  %v4471_v13 = vld [vmem:[%s6478_s4 + $0x264] ss:$16 sps:$4 sm:$0xff] (!%p402_p3)   ;;  %v4474_v15 = vld [vmem:[%s6478_s4 + $0x260] ss:$16 sps:$4 sm:$0xff] (!%p402_p3)   ;;  %v5338_v7 = vsub.s32 (!%p402_p3), 2, %v5248_v40 }
   0xe   : > { %2147 = vmatprep.subr.bf16.mxu0 %v4465_v9  ;;  %v4475_v16 = vld [vmem:[%s6478_s4 + $0x84] ss:$16 sps:$4 sm:$0xff]   ;;  %v4479_v18 = vld [vmem:[%s6478_s4 + $0x80] ss:$16 sps:$4 sm:$0xff]   ;;  %s6491_s17 = smov (!%p471_p4, %s5036_s17), 1 }
   0xf   : > { %v4477_v17 = vld [vmem:[%s6478_s4 + $0x284] ss:$16 sps:$4 sm:$0xff]   ;;  %v4480_v19 = vld [vmem:[%s6478_s4 + $0x280] ss:$16 sps:$4 sm:$0xff]   ;;  %s5257_s28 = sshll.u32 %s6491_s17, 3  ;;  %s4361_s14 = sshll.u32 %s6491_s17, 4 }
  0x10   : > { %2107 = vmatpush1.bf16.msra.mxu1 %v4467_v10  ;;  %v4481_v20 = vld [vmem:[%s6478_s4 + $0xa4] ss:$16 sps:$4 sm:$0xff]   ;;  %v4485_v22 = vld [vmem:[%s6478_s4 + $0xa0] ss:$16 sps:$4 sm:$0xff]   ;;  %s474_s22 = scalar_lea.vmem %s6474_s0, %s5257_s28  ;;  %s493_s30 = scalar_lea.vmem %s6476_s2, %s5257_s28 }
  0x11   : > { %2148 = vmatpush1.bf16.msra.mxu0 %v4468_v11  ;;  %2108 = vmatprep.subr.bf16.mxu1 %v4469_v12  ;;  %v4483_v21 = vld [vmem:[%s6478_s4 + $0x2a4] ss:$16 sps:$4 sm:$0xff]   ;;  %v4486_v23 = vld [vmem:[%s6478_s4 + $0x2a0] ss:$16 sps:$4 sm:$0xff]   ;;  %v540_v11 = vsub.s32 5, %v5248_v40  ;;  %s483_s27 = scalar_lea.vmem %s6475_s1, %s5257_s28  ;;  %s503_s25 = scalar_lea.vmem %s6477_s3, %s5257_s28 }
  0x12   : > { %2149 = vmatprep.subr.bf16.mxu0 %v4471_v13  ;;  %v4487_v24 = vld [vmem:[%s6478_s4 + $0xc4] ss:$16 sps:$4 sm:$0xff]   ;;  %v4491_v26 = vld [vmem:[%s6478_s4 + $0xc0] ss:$16 sps:$4 sm:$0xff]   ;;  %s513_s21 = scalar_lea.vmem %s6485_s11, %s4361_s14 }
  0x13   : > { %v4489_v25 = vld [vmem:[%s6478_s4 + $0x2c4] ss:$16 sps:$4 sm:$0xff]   ;;  %v4492_v27 = vld [vmem:[%s6478_s4 + $0x2c0] ss:$16 sps:$4 sm:$0xff]  }
  0x14   : > { %2109 = vmatpush1.bf16.msra.mxu1 %v4473_v14  ;;  %v4493_v28 = vld [vmem:[%s6478_s4 + $0xe4] ss:$16 sps:$4 sm:$0xff]   ;;  %v4497_v30 = vld [vmem:[%s6478_s4 + $0xe0] ss:$16 sps:$4 sm:$0xff]  }
  0x15   : > { %2150 = vmatpush1.bf16.msra.mxu0 %v4474_v15  ;;  %2110 = vmatprep.subr.bf16.mxu1 %v4475_v16  ;;  %v4495_v29 = vld [vmem:[%s6478_s4 + $0x2e4] ss:$16 sps:$4 sm:$0xff]   ;;  %v4498_v31 = vld [vmem:[%s6478_s4 + $0x2e0] ss:$16 sps:$4 sm:$0xff]   ;;  %v548_v16 = vsub.s32 7, %v5248_v40 }
  0x16   : > { %2151 = vmatprep.subr.bf16.mxu0 %v4477_v17  ;;  %v4499_v32 = vld [vmem:[%s6478_s4 + $0x104] ss:$16 sps:$4 sm:$0xff]   ;;  %v4503_v34 = vld [vmem:[%s6478_s4 + $0x100] ss:$16 sps:$4 sm:$0xff]  }
  0x17   : > { %v4501_v33 = vld [vmem:[%s6478_s4 + $0x304] ss:$16 sps:$4 sm:$0xff]   ;;  %v4504_v35 = vld [vmem:[%s6478_s4 + $0x300] ss:$16 sps:$4 sm:$0xff]  }
  0x18   : > { %2111 = vmatpush1.bf16.msra.mxu1 %v4479_v18  ;;  %v4505_v37 = vld [vmem:[%s6478_s4 + $0x124] ss:$16 sps:$4 sm:$0xff]   ;;  %v4509_v39 = vld [vmem:[%s6478_s4 + $0x120] ss:$16 sps:$4 sm:$0xff]   ;;  %v4552_v18 = vld [vmem:[%s6478_s4 + $0xc] ss:$16 sps:$4 sm:$0xff]  }
  0x19   : > { %2152 = vmatpush1.bf16.msra.mxu0 %v4480_v19  ;;  %2112 = vmatprep.subr.bf16.mxu1 %v4481_v20  ;;  %v4507_v38 = vld [vmem:[%s6478_s4 + $0x324] ss:$16 sps:$4 sm:$0xff]   ;;  %v4510_v41 = vld [vmem:[%s6478_s4 + $0x320] ss:$16 sps:$4 sm:$0xff]   ;;  %v544_v19 = vsub.s32 6, %v5248_v40 }
  0x1a   : > { %2153 = vmatprep.subr.bf16.mxu0 %v4483_v21  ;;  %v4511_v42 = vld [vmem:[%s6478_s4 + $0x144] ss:$16 sps:$4 sm:$0xff]   ;;  %v4515_v44 = vld [vmem:[%s6478_s4 + $0x140] ss:$16 sps:$4 sm:$0xff]  }
  0x1b   : > { %v4513_v43 = vld [vmem:[%s6478_s4 + $0x344] ss:$16 sps:$4 sm:$0xff]   ;;  %v4516_v45 = vld [vmem:[%s6478_s4 + $0x340] ss:$16 sps:$4 sm:$0xff]  }
  0x1c   : > { %2113 = vmatpush1.bf16.msra.mxu1 %v4485_v22  ;;  %v4517_v48 = vld [vmem:[%s6478_s4 + $0x164] ss:$16 sps:$4 sm:$0xff]   ;;  %v4521_v52 = vld [vmem:[%s6478_s4 + $0x160] ss:$16 sps:$4 sm:$0xff]  }
  0x1d   : > { %2154 = vmatpush1.bf16.msra.mxu0 %v4486_v23  ;;  %2114 = vmatprep.subr.bf16.mxu1 %v4487_v24  ;;  %v4519_v50 = vld [vmem:[%s6478_s4 + $0x364] ss:$16 sps:$4 sm:$0xff]   ;;  %v4522_v55 = vld [vmem:[%s6478_s4 + $0x360] ss:$16 sps:$4 sm:$0xff]  }
  0x1e   : > { %2155 = vmatprep.subr.bf16.mxu0 %v4489_v25  ;;  %v516_v51 = vld [vmem:[%s474_s22] sm:$0xff] }
  0x1f   : > { %v525_v53 = vrot.slane %v516_v51, %v5273_v46  ;;  %v533_v54 = vrot.slane %v516_v51, %v5276_v47  ;;  %v5293_v56 = vrot.slane %v516_v51, %v536_v49  ;;  %v4523_v57 = vld [vmem:[%s6478_s4 + $0x184] ss:$16 sps:$4 sm:$0xff]   ;;  %v4527_v61 = vld [vmem:[%s6478_s4 + $0x180] ss:$16 sps:$4 sm:$0xff]   ;;  %v521_v13 = vrot.slane %v516_v51, %v5335_v6  ;;  %v4580_v49 = vld [vmem:[%s6478_s4 + $0xa8] ss:$16 sps:$4 sm:$0xff]  }
  0x20   : > { %2115 = vmatpush1.bf16.msra.mxu1 %v4491_v26  ;;  %v4525_v58 = vld [vmem:[%s6478_s4 + $0x384] ss:$16 sps:$4 sm:$0xff]   ;;  %v4528_v62 = vld [vmem:[%s6478_s4 + $0x380] ss:$16 sps:$4 sm:$0xff]   ;;  %v529_v14 = vrot.slane %v516_v51, %v5338_v7  ;;  %v541_v20 = vrot.slane %v516_v51, %v540_v11  ;;  %v5366_v21 = vrot.slane %v516_v51, %v548_v16  ;;  %v5375_v25 = vrot.slane %v516_v51, %v544_v19  ;;  %v4550_v26 = vld [vmem:[%s6478_s4 + $0x8] ss:$16 sps:$4 sm:$0xff]  }
  0x21   : > { %2156 = vmatpush1.bf16.msra.mxu0 %v4492_v27  ;;  %2116 = vmatprep.subr.bf16.mxu1 %v4493_v28  ;;  %v5301_v59 = vpack.c.bf16 %v525_v53, %v525_v53  ;;  %v5303_v60 = vpack.c.bf16 %v533_v54, %v533_v54  ;;  %v4529_v63 = vld [vmem:[%s6478_s4 + $0x1a4] ss:$16 sps:$4 sm:$0xff]   ;;  %v4533_v1 = vld [vmem:[%s6478_s4 + $0x1a0] ss:$16 sps:$4 sm:$0xff]   ;;  %v5368_v22 = vpack.c.bf16 %v521_v13, %v521_v13  ;;  %v4558_v28 = vld [vmem:[%s6478_s4 + $0x2c] ss:$16 sps:$4 sm:$0xff]  }
  0x22   : > { %2157 = vmatprep.subr.bf16.mxu0 %v4495_v29  ;;  %v4531_v0 = vld [vmem:[%s6478_s4 + $0x3a4] ss:$16 sps:$4 sm:$0xff]   ;;  %v4534_v2 = vld [vmem:[%s6478_s4 + $0x3a0] ss:$16 sps:$4 sm:$0xff]   ;;  %v5373_v24 = vpack.c.bf16 %v529_v14, %v529_v14  ;;  %v5386_v29 = vpack.c.bf16 %v541_v20, %v541_v20  ;;  %v4588_v51 = vld [vmem:[%s6478_s4 + $0xcc] ss:$16 sps:$4 sm:$0xff]  }
  0x23   : > { %2134 = vmatprep.mubr.bf16.mxu1 %v5301_v59  ;;  %2175 = vmatprep.mubr.bf16.mxu0 %v5303_v60  ;;  %v4535_v3 = vld [vmem:[%s6478_s4 + $0x1c4] ss:$16 sps:$4 sm:$0xff]   ;;  %v4539_v5 = vld [vmem:[%s6478_s4 + $0x1c0] ss:$16 sps:$4 sm:$0xff]   ;;  %v4586_v53 = vld [vmem:[%s6478_s4 + $0xc8] ss:$16 sps:$4 sm:$0xff]  }
  0x24   : > { %2117 = vmatpush1.bf16.msra.mxu1 %v4497_v30  ;;  %v4537_v4 = vld [vmem:[%s6478_s4 + $0x3c4] ss:$16 sps:$4 sm:$0xff]   ;;  %v4540_v8 = vld [vmem:[%s6478_s4 + $0x3c0] ss:$16 sps:$4 sm:$0xff]   ;;  %v4618_v11 = vld [vmem:[%s6478_s4 + $0x16c] ss:$16 sps:$4 sm:$0xff]  }
  0x25   : > { %2158 = vmatpush1.bf16.msra.mxu0 %v4498_v31  ;;  %2118 = vmatprep.subr.bf16.mxu1 %v4499_v32  ;;  %v4541_v9 = vld [vmem:[%s6478_s4 + $0x1e4] ss:$16 sps:$4 sm:$0xff]   ;;  %v4545_v12 = vld [vmem:[%s6478_s4 + $0x1e0] ss:$16 sps:$4 sm:$0xff]   ;;  %v4556_v31 = vld [vmem:[%s6478_s4 + $0x28] ss:$16 sps:$4 sm:$0xff]  }
  0x26   : > { %2159 = vmatprep.subr.bf16.mxu0 %v4501_v33  ;;  %v4543_v10 = vld [vmem:[%s6478_s4 + $0x3e4] ss:$16 sps:$4 sm:$0xff]   ;;  %v4546_v15 = vld [vmem:[%s6478_s4 + $0x3e0] ss:$16 sps:$4 sm:$0xff]   ;;  %v4564_v33 = vld [vmem:[%s6478_s4 + $0x4c] ss:$16 sps:$4 sm:$0xff]  }
  0x27   : > { %v4549_v17 = vld [vmem:[%s6478_s4 + $0x404] ss:$16 sps:$4 sm:$0xff]   ;;  %v4547_v23 = vld [vmem:[%s6478_s4 + $0x400] ss:$16 sps:$4 sm:$0xff]   ;;  %v4616_v13 = vld [vmem:[%s6478_s4 + $0x168] ss:$16 sps:$4 sm:$0xff]  }
  0x28   : > { %2119 = vmatpush1.bf16.msra.mxu1 %v4503_v34  ;;  %v4555_v27 = vld [vmem:[%s6478_s4 + $0x424] ss:$16 sps:$4 sm:$0xff]   ;;  %v4553_v30 = vld [vmem:[%s6478_s4 + $0x420] ss:$16 sps:$4 sm:$0xff]   ;;  %v4630_v19 = vld [vmem:[%s6478_s4 + $0x1ac] ss:$16 sps:$4 sm:$0xff]  }
  0x29   : > { %2160 = vmatpush1.bf16.msra.mxu0 %v4504_v35  ;;  %2120 = vmatprep.subr.bf16.mxu1 %v4505_v37  ;;  %v4561_v32 = vld [vmem:[%s6478_s4 + $0x444] ss:$16 sps:$4 sm:$0xff]   ;;  %v4559_v34 = vld [vmem:[%s6478_s4 + $0x440] ss:$16 sps:$4 sm:$0xff]   ;;  %v4562_v35 = vld [vmem:[%s6478_s4 + $0x48] ss:$16 sps:$4 sm:$0xff]  }
  0x2a   : > { %2161 = vmatprep.subr.bf16.mxu0 %v4507_v38  ;;  %v4567_v36 = vld [vmem:[%s6478_s4 + $0x464] ss:$16 sps:$4 sm:$0xff]   ;;  %v4570_v37 = vld [vmem:[%s6478_s4 + $0x6c] ss:$16 sps:$4 sm:$0xff]   ;;  %v4565_v38 = vld [vmem:[%s6478_s4 + $0x460] ss:$16 sps:$4 sm:$0xff]  }
  0x2b   : > { %v4573_v40 = vld [vmem:[%s6478_s4 + $0x484] ss:$16 sps:$4 sm:$0xff]   ;;  %v4619_v16 = vld [vmem:[%s6478_s4 + $0x580] ss:$16 sps:$4 sm:$0xff]  }
  0x2c   : > { %2121 = vmatpush1.bf16.msra.mxu1 %v4509_v39  ;;  %v4568_v39 = vld [vmem:[%s6478_s4 + $0x68] ss:$16 sps:$4 sm:$0xff]   ;;  %v4591_v54 = vld [vmem:[%s6478_s4 + $0x4e4] ss:$16 sps:$4 sm:$0xff]   ;;  %v4625_v20 = vld [vmem:[%s6478_s4 + $0x5a0] ss:$16 sps:$4 sm:$0xff]  }
  0x2d   : > { %2162 = vmatpush1.bf16.msra.mxu0 %v4510_v41  ;;  %2122 = vmatprep.subr.bf16.mxu1 %v4511_v42  ;;  %v4576_v41 = vld [vmem:[%s6478_s4 + $0x8c] ss:$16 sps:$4 sm:$0xff]   ;;  %v4571_v42 = vld [vmem:[%s6478_s4 + $0x480] ss:$16 sps:$4 sm:$0xff]   ;;  %v4621_v14 = vld [vmem:[%s6478_s4 + $0x584] ss:$16 sps:$4 sm:$0xff]  }
  0x2e   : > { %2163 = vmatprep.subr.bf16.mxu0 %v4513_v43  ;;  %v4574_v43 = vld [vmem:[%s6478_s4 + $0x88] ss:$16 sps:$4 sm:$0xff]  }
  0x30   : > { %2123 = vmatpush1.bf16.msra.mxu1 %v4515_v44  ;;  %v4579_v44 = vld [vmem:[%s6478_s4 + $0x4a4] ss:$16 sps:$4 sm:$0xff]  }
  0x31   : > { %2164 = vmatpush1.bf16.msra.mxu0 %v4516_v45  ;;  %2124 = vmatprep.subr.bf16.mxu1 %v4517_v48  ;;  %v4582_v45 = vld [vmem:[%s6478_s4 + $0xac] ss:$16 sps:$4 sm:$0xff]   ;;  %v4577_v48 = vld [vmem:[%s6478_s4 + $0x4a0] ss:$16 sps:$4 sm:$0xff]  }
  0x32   : > { %2165 = vmatprep.subr.bf16.mxu0 %v4519_v50  ;;  %v4585_v50 = vld [vmem:[%s6478_s4 + $0x4c4] ss:$16 sps:$4 sm:$0xff]  }
  0x34   : > { %2125 = vmatpush1.bf16.msra.mxu1 %v4521_v52  ;;  %v4583_v52 = vld [vmem:[%s6478_s4 + $0x4c0] ss:$16 sps:$4 sm:$0xff]  }
  0x35   : > { %2166 = vmatpush1.bf16.msra.mxu0 %v4522_v55  ;;  %2126 = vmatprep.subr.bf16.mxu1 %v4523_v57  ;;  %v4594_v55 = vld [vmem:[%s6478_s4 + $0xec] ss:$16 sps:$4 sm:$0xff]   ;;  %v4589_v57 = vld [vmem:[%s6478_s4 + $0x4e0] ss:$16 sps:$4 sm:$0xff]  }
  0x36   : > { %2167 = vmatprep.subr.bf16.mxu0 %v4525_v58  ;;  %v4592_v58 = vld [vmem:[%s6478_s4 + $0xe8] ss:$16 sps:$4 sm:$0xff]  }
  0x38   : > { %2127 = vmatpush1.bf16.msra.mxu1 %v4527_v61  ;;  %v4600_v61 = vld [vmem:[%s6478_s4 + $0x10c] ss:$16 sps:$4 sm:$0xff]  }
  0x39   : > { %2168 = vmatpush1.bf16.msra.mxu0 %v4528_v62  ;;  %2128 = vmatprep.subr.bf16.mxu1 %v4529_v63  ;;  %v4595_v62 = vld [vmem:[%s6478_s4 + $0x500] ss:$16 sps:$4 sm:$0xff]   ;;  %v4598_v63 = vld [vmem:[%s6478_s4 + $0x108] ss:$16 sps:$4 sm:$0xff]  }
  0x3a   : > { %2169 = vmatprep.subr.bf16.mxu0 %v4531_v0  ;;  %v4603_v0 = vld [vmem:[%s6478_s4 + $0x524] ss:$16 sps:$4 sm:$0xff]  }
  0x3c   : > { %2129 = vmatpush1.bf16.msra.mxu1 %v4533_v1  ;;  %v4606_v1 = vld [vmem:[%s6478_s4 + $0x12c] ss:$16 sps:$4 sm:$0xff]  }
  0x3d   : > { %2170 = vmatpush1.bf16.msra.mxu0 %v4534_v2  ;;  %2130 = vmatprep.subr.bf16.mxu1 %v4535_v3  ;;  %v4601_v2 = vld [vmem:[%s6478_s4 + $0x520] ss:$16 sps:$4 sm:$0xff]   ;;  %v4604_v3 = vld [vmem:[%s6478_s4 + $0x128] ss:$16 sps:$4 sm:$0xff]  }
  0x3e   : > { %2171 = vmatprep.subr.bf16.mxu0 %v4537_v4  ;;  %v4609_v4 = vld [vmem:[%s6478_s4 + $0x544] ss:$16 sps:$4 sm:$0xff]  }
  0x40   : > { %2131 = vmatpush1.bf16.msra.mxu1 %v4539_v5  ;;  %v4612_v5 = vld [vmem:[%s6478_s4 + $0x14c] ss:$16 sps:$4 sm:$0xff]  }
  0x41   : > { %2172 = vmatpush1.bf16.msra.mxu0 %v4540_v8  ;;  %2132 = vmatprep.subr.bf16.mxu1 %v4541_v9  ;;  %v4607_v8 = vld [vmem:[%s6478_s4 + $0x540] ss:$16 sps:$4 sm:$0xff]   ;;  %v4610_v9 = vld [vmem:[%s6478_s4 + $0x148] ss:$16 sps:$4 sm:$0xff]  }
  0x42   : > { %2173 = vmatprep.subr.bf16.mxu0 %v4543_v10  ;;  %v4615_v10 = vld [vmem:[%s6478_s4 + $0x564] ss:$16 sps:$4 sm:$0xff]  }
  0x44   : > { %2133 = vmatpush1.bf16.msra.mxu1 %v4545_v12  ;;  %v4613_v12 = vld [vmem:[%s6478_s4 + $0x560] ss:$16 sps:$4 sm:$0xff]  }
  0x45   : > { %2174 = vmatpush1.bf16.msra.mxu0 %v4546_v15  ;;  %2266 = vmatprep.subr.bf16.mxu1 %v4552_v18  ;;  %v4624_v15 = vld [vmem:[%s6478_s4 + $0x18c] ss:$16 sps:$4 sm:$0xff]   ;;  %v4627_v18 = vld [vmem:[%s6478_s4 + $0x5a4] ss:$16 sps:$4 sm:$0xff]  }
  0x46   : > { %2184 = vmatprep.subr.bf16.mxu0 %v4549_v17  ;;  %v4622_v17 = vld [vmem:[%s6478_s4 + $0x188] ss:$16 sps:$4 sm:$0xff]  }
  0x47   : > { %2135 = vmatmul.mubr.bf16.vlgmr.msra.gmra.mrb[0].mxu1 %v5368_v22 }
  0x48   : > { %2176 = vmatmul.mubr.bf16.vlgmr.msra.gmra.mrb[0].mxu0 %v5373_v24  ;;  %2267 = vmatpush1.bf16.msra.mxu1 %v4550_v26  ;;  %v4633_v26 = vld [vmem:[%s6478_s4 + $0x5c4] ss:$16 sps:$4 sm:$0xff]  }
  0x49   : > { %2185 = vmatpush1.bf16.msra.mxu0 %v4547_v23  ;;  %2268 = vmatprep.subr.bf16.mxu1 %v4558_v28  ;;  %v4628_v23 = vld [vmem:[%s6478_s4 + $0x1a8] ss:$16 sps:$4 sm:$0xff]   ;;  %v4631_v28 = vld [vmem:[%s6478_s4 + $0x5c0] ss:$16 sps:$4 sm:$0xff]  }
  0x4a   : > { %2186 = vmatprep.subr.bf16.mxu0 %v4555_v27  ;;  %2216 = vmatprep.mubr.bf16.mxu0 %v5386_v29  ;;  %v4636_v27 = vld [vmem:[%s6478_s4 + $0x1cc] ss:$16 sps:$4 sm:$0xff]  }
  0x4b   : > { %2298 = vmatprep.mubr.bf16.mxu1 %v5301_v59  ;;  %v4597_v59 = vld [vmem:[%s6478_s4 + $0x504] ss:$16 sps:$4 sm:$0xff]  }
  0x4c   : > { %2269 = vmatpush1.bf16.msra.mxu1 %v4556_v31  ;;  %v4639_v31 = vld [vmem:[%s6478_s4 + $0x5e4] ss:$16 sps:$4 sm:$0xff]  }
  0x4d   : > { %2187 = vmatpush1.bf16.msra.mxu0 %v4553_v30  ;;  %2270 = vmatprep.subr.bf16.mxu1 %v4564_v33  ;;  %v4634_v30 = vld [vmem:[%s6478_s4 + $0x1c8] ss:$16 sps:$4 sm:$0xff]   ;;  %v4637_v33 = vld [vmem:[%s6478_s4 + $0x5e0] ss:$16 sps:$4 sm:$0xff]  }
  0x4e   : > { %2188 = vmatprep.subr.bf16.mxu0 %v4561_v32  ;;  %v4642_v32 = vld [vmem:[%s6478_s4 + $0x1ec] ss:$16 sps:$4 sm:$0xff]  }
  0x50   : > { %2271 = vmatpush1.bf16.msra.mxu1 %v4562_v35  ;;  %v4645_v35 = vld [vmem:[%s6478_s4 + $0x604] ss:$16 sps:$4 sm:$0xff]  }
  0x51   : > { %2189 = vmatpush1.bf16.msra.mxu0 %v4559_v34  ;;  %2272 = vmatprep.subr.bf16.mxu1 %v4570_v37  ;;  %v4640_v34 = vld [vmem:[%s6478_s4 + $0x1e8] ss:$16 sps:$4 sm:$0xff]   ;;  %v4643_v37 = vld [vmem:[%s6478_s4 + $0x600] ss:$16 sps:$4 sm:$0xff]  }
  0x52   : > { %2190 = vmatprep.subr.bf16.mxu0 %v4567_v36  ;;  %v4648_v36 = vld [vmem:[%s6478_s4 + $0x20c] ss:$16 sps:$4 sm:$0xff]  }
  0x54   : > { %2273 = vmatpush1.bf16.msra.mxu1 %v4568_v39  ;;  %v4646_v39 = vld [vmem:[%s6478_s4 + $0x208] ss:$16 sps:$4 sm:$0xff]  }
  0x55   : > { %2191 = vmatpush1.bf16.msra.mxu0 %v4565_v38  ;;  %2274 = vmatprep.subr.bf16.mxu1 %v4576_v41  ;;  %v5577_v38 = vpack.c.bf16 %v5293_v56, %v5293_v56  ;;  %v4654_v41 = vld [vmem:[%s6478_s4 + $0x22c] ss:$16 sps:$4 sm:$0xff]   ;;  %v5590_v56 = vpack.c.bf16 %v5366_v21, %v5366_v21  ;;  %v4657_v21 = vld [vmem:[%s6478_s4 + $0x644] ss:$16 sps:$4 sm:$0xff]  }
  0x56   : > { %2192 = vmatprep.subr.bf16.mxu0 %v4573_v40  ;;  %v4651_v40 = vld [vmem:[%s6478_s4 + $0x624] ss:$16 sps:$4 sm:$0xff]  }
  0x58   : > { %2275 = vmatpush1.bf16.msra.mxu1 %v4574_v43  ;;  %v4652_v43 = vld [vmem:[%s6478_s4 + $0x228] ss:$16 sps:$4 sm:$0xff]  }
  0x59   : > { %2193 = vmatpush1.bf16.msra.mxu0 %v4571_v42  ;;  %2276 = vmatprep.subr.bf16.mxu1 %v4582_v45  ;;  %v4649_v42 = vld [vmem:[%s6478_s4 + $0x620] ss:$16 sps:$4 sm:$0xff]   ;;  %v4658_v45 = vld [vmem:[%s6478_s4 + $0x248] ss:$16 sps:$4 sm:$0xff]  }
  0x5a   : > { %2194 = vmatprep.subr.bf16.mxu0 %v4579_v44  ;;  %v4655_v44 = vld [vmem:[%s6478_s4 + $0x640] ss:$16 sps:$4 sm:$0xff]  }
  0x5c   : > { %2277 = vmatpush1.bf16.msra.mxu1 %v4580_v49  ;;  %v4661_v49 = vld [vmem:[%s6478_s4 + $0x660] ss:$16 sps:$4 sm:$0xff]  }
  0x5d   : > { %2195 = vmatpush1.bf16.msra.mxu0 %v4577_v48  ;;  %2278 = vmatprep.subr.bf16.mxu1 %v4588_v51  ;;  %v4663_v48 = vld [vmem:[%s6478_s4 + $0x664] ss:$16 sps:$4 sm:$0xff]  }
  0x5e   : > { %2196 = vmatprep.subr.bf16.mxu0 %v4585_v50  ;;  %v4664_v50 = vld [vmem:[%s6478_s4 + $0x268] ss:$16 sps:$4 sm:$0xff]   ;;  %v4669_v51 = vld [vmem:[%s6478_s4 + $0x684] ss:$16 sps:$4 sm:$0xff]  }
  0x60   : > { %2279 = vmatpush1.bf16.msra.mxu1 %v4586_v53  ;;  %v4667_v53 = vld [vmem:[%s6478_s4 + $0x680] ss:$16 sps:$4 sm:$0xff]  }
  0x61   : > { %2197 = vmatpush1.bf16.msra.mxu0 %v4583_v52  ;;  %2280 = vmatprep.subr.bf16.mxu1 %v4594_v55  ;;  %v4672_v52 = vld [vmem:[%s6478_s4 + $0x28c] ss:$16 sps:$4 sm:$0xff]   ;;  %v4675_v55 = vld [vmem:[%s6478_s4 + $0x6a4] ss:$16 sps:$4 sm:$0xff]  }
  0x62   : > { %2198 = vmatprep.subr.bf16.mxu0 %v4591_v54  ;;  %v4670_v54 = vld [vmem:[%s6478_s4 + $0x288] ss:$16 sps:$4 sm:$0xff]  }
  0x64   : > { %2281 = vmatpush1.bf16.msra.mxu1 %v4592_v58  ;;  %v4673_v58 = vld [vmem:[%s6478_s4 + $0x6a0] ss:$16 sps:$4 sm:$0xff]  }
  0x65   : > { %2199 = vmatpush1.bf16.msra.mxu0 %v4589_v57  ;;  %2282 = vmatprep.subr.bf16.mxu1 %v4600_v61  ;;  %v4678_v57 = vld [vmem:[%s6478_s4 + $0x2ac] ss:$16 sps:$4 sm:$0xff]   ;;  %v4681_v61 = vld [vmem:[%s6478_s4 + $0x6c4] ss:$16 sps:$4 sm:$0xff]  }
  0x66   : > { %2200 = vmatprep.subr.bf16.mxu0 %v4597_v59  ;;  %v4676_v59 = vld [vmem:[%s6478_s4 + $0x2a8] ss:$16 sps:$4 sm:$0xff]  }
  0x68   : > { %2283 = vmatpush1.bf16.msra.mxu1 %v4598_v63  ;;  %v4679_v63 = vld [vmem:[%s6478_s4 + $0x6c0] ss:$16 sps:$4 sm:$0xff]  }
  0x69   : > { %2201 = vmatpush1.bf16.msra.mxu0 %v4595_v62  ;;  %2284 = vmatprep.subr.bf16.mxu1 %v4606_v1  ;;  %v4684_v62 = vld [vmem:[%s6478_s4 + $0x2cc] ss:$16 sps:$4 sm:$0xff]   ;;  %v4687_v1 = vld [vmem:[%s6478_s4 + $0x6e4] ss:$16 sps:$4 sm:$0xff]  }
  0x6a   : > { %2202 = vmatprep.subr.bf16.mxu0 %v4603_v0  ;;  %v4682_v0 = vld [vmem:[%s6478_s4 + $0x2c8] ss:$16 sps:$4 sm:$0xff]  }
  0x6c   : > { %2285 = vmatpush1.bf16.msra.mxu1 %v4604_v3  ;;  %v4685_v3 = vld [vmem:[%s6478_s4 + $0x6e0] ss:$16 sps:$4 sm:$0xff]  }
  0x6d   : > { %2203 = vmatpush1.bf16.msra.mxu0 %v4601_v2  ;;  %2286 = vmatprep.subr.bf16.mxu1 %v4612_v5  ;;  %v4690_v2 = vld [vmem:[%s6478_s4 + $0x2ec] ss:$16 sps:$4 sm:$0xff]   ;;  %v4693_v5 = vld [vmem:[%s6478_s4 + $0x704] ss:$16 sps:$4 sm:$0xff]  }
  0x6e   : > { %2204 = vmatprep.subr.bf16.mxu0 %v4609_v4  ;;  %v4688_v4 = vld [vmem:[%s6478_s4 + $0x2e8] ss:$16 sps:$4 sm:$0xff]  }
  0x70   : > { %2287 = vmatpush1.bf16.msra.mxu1 %v4610_v9  ;;  %v4691_v9 = vld [vmem:[%s6478_s4 + $0x700] ss:$16 sps:$4 sm:$0xff]  }
  0x71   : > { %2205 = vmatpush1.bf16.msra.mxu0 %v4607_v8  ;;  %2288 = vmatprep.subr.bf16.mxu1 %v4618_v11  ;;  %v4696_v8 = vld [vmem:[%s6478_s4 + $0x30c] ss:$16 sps:$4 sm:$0xff]   ;;  %v4699_v11 = vld [vmem:[%s6478_s4 + $0x724] ss:$16 sps:$4 sm:$0xff]  }
  0x72   : > { %2206 = vmatprep.subr.bf16.mxu0 %v4615_v10  ;;  %v4694_v10 = vld [vmem:[%s6478_s4 + $0x308] ss:$16 sps:$4 sm:$0xff]  }
  0x74   : > { %2289 = vmatpush1.bf16.msra.mxu1 %v4616_v13  ;;  %v4697_v13 = vld [vmem:[%s6478_s4 + $0x720] ss:$16 sps:$4 sm:$0xff]  }
  0x75   : > { %2207 = vmatpush1.bf16.msra.mxu0 %v4613_v12  ;;  %2290 = vmatprep.subr.bf16.mxu1 %v4624_v15  ;;  %v4702_v12 = vld [vmem:[%s6478_s4 + $0x32c] ss:$16 sps:$4 sm:$0xff]   ;;  %v4705_v15 = vld [vmem:[%s6478_s4 + $0x744] ss:$16 sps:$4 sm:$0xff]  }
  0x76   : > { %2208 = vmatprep.subr.bf16.mxu0 %v4621_v14  ;;  %v4700_v14 = vld [vmem:[%s6478_s4 + $0x328] ss:$16 sps:$4 sm:$0xff]  }
  0x78   : > { %2291 = vmatpush1.bf16.msra.mxu1 %v4622_v17  ;;  %v4703_v17 = vld [vmem:[%s6478_s4 + $0x740] ss:$16 sps:$4 sm:$0xff]  }
  0x79   : > { %2209 = vmatpush1.bf16.msra.mxu0 %v4619_v16  ;;  %2292 = vmatprep.subr.bf16.mxu1 %v4630_v19  ;;  %v4708_v16 = vld [vmem:[%s6478_s4 + $0x34c] ss:$16 sps:$4 sm:$0xff]   ;;  %v4711_v19 = vld [vmem:[%s6478_s4 + $0x764] ss:$16 sps:$4 sm:$0xff]  }
  0x7a   : > { %2210 = vmatprep.subr.bf16.mxu0 %v4627_v18  ;;  %v4706_v18 = vld [vmem:[%s6478_s4 + $0x348] ss:$16 sps:$4 sm:$0xff]  }
  0x7c   : > { %2293 = vmatpush1.bf16.msra.mxu1 %v4628_v23  ;;  %v4709_v23 = vld [vmem:[%s6478_s4 + $0x760] ss:$16 sps:$4 sm:$0xff]  }
  0x7d   : > { %2211 = vmatpush1.bf16.msra.mxu0 %v4625_v20  ;;  %2294 = vmatprep.subr.bf16.mxu1 %v4636_v27  ;;  %v4714_v20 = vld [vmem:[%s6478_s4 + $0x36c] ss:$16 sps:$4 sm:$0xff]   ;;  %v4717_v27 = vld [vmem:[%s6478_s4 + $0x784] ss:$16 sps:$4 sm:$0xff]  }
  0x7e   : > { %2212 = vmatprep.subr.bf16.mxu0 %v4633_v26  ;;  %v4712_v26 = vld [vmem:[%s6478_s4 + $0x368] ss:$16 sps:$4 sm:$0xff]  }
  0x80   : > { %2295 = vmatpush1.bf16.msra.mxu1 %v4634_v30  ;;  %v4715_v30 = vld [vmem:[%s6478_s4 + $0x780] ss:$16 sps:$4 sm:$0xff]  }
  0x81   : > { %2213 = vmatpush1.bf16.msra.mxu0 %v4631_v28  ;;  %2296 = vmatprep.subr.bf16.mxu1 %v4642_v32  ;;  %v4720_v28 = vld [vmem:[%s6478_s4 + $0x38c] ss:$16 sps:$4 sm:$0xff]   ;;  %v4723_v32 = vld [vmem:[%s6478_s4 + $0x7a4] ss:$16 sps:$4 sm:$0xff]  }
  0x82   : > { %2214 = vmatprep.subr.bf16.mxu0 %v4639_v31  ;;  %v4718_v31 = vld [vmem:[%s6478_s4 + $0x388] ss:$16 sps:$4 sm:$0xff]  }
  0x84   : > { %2297 = vmatpush1.bf16.msra.mxu1 %v4640_v34  ;;  %v4721_v34 = vld [vmem:[%s6478_s4 + $0x7a0] ss:$16 sps:$4 sm:$0xff]  }
  0x85   : > { %2215 = vmatpush1.bf16.msra.mxu0 %v4637_v33  ;;  %2307 = vmatprep.subr.bf16.mxu1 %v4648_v36  ;;  %v4726_v33 = vld [vmem:[%s6478_s4 + $0x3ac] ss:$16 sps:$4 sm:$0xff]   ;;  %v4729_v36 = vld [vmem:[%s6478_s4 + $0x7c4] ss:$16 sps:$4 sm:$0xff]  }
  0x86   : > { %2225 = vmatprep.subr.bf16.mxu0 %v4645_v35  ;;  %v4724_v35 = vld [vmem:[%s6478_s4 + $0x3a8] ss:$16 sps:$4 sm:$0xff]  }
  0x87   : > { %2299 = vmatmul.mubr.bf16.vlgmr.msra.gmra.mrb[4].mxu1 %v5368_v22  ;;  %v4660_v22 = vld [vmem:[%s6478_s4 + $0x24c] ss:$16 sps:$4 sm:$0xff]  }
  0x88   : > { %2217 = vmatmul.mubr.bf16.vlgmr.msra.gmra.mrb[0].mxu0 %v5577_v38  ;;  %2308 = vmatpush1.bf16.msra.mxu1 %v4646_v39  ;;  %v4727_v39 = vld [vmem:[%s6478_s4 + $0x7c0] ss:$16 sps:$4 sm:$0xff]  }
  0x89   : > { %2226 = vmatpush1.bf16.msra.mxu0 %v4643_v37  ;;  %2309 = vmatprep.subr.bf16.mxu1 %v4654_v41  ;;  %v4732_v37 = vld [vmem:[%s6478_s4 + $0x3cc] ss:$16 sps:$4 sm:$0xff]   ;;  %v4735_v41 = vld [vmem:[%s6478_s4 + $0x7e4] ss:$16 sps:$4 sm:$0xff]  }
  0x8a   : > { %2227 = vmatprep.subr.bf16.mxu0 %v4651_v40  ;;  %2257 = vmatprep.mubr.bf16.mxu0 %v5590_v56  ;;  %v4730_v40 = vld [vmem:[%s6478_s4 + $0x3c8] ss:$16 sps:$4 sm:$0xff]  }
  0x8b   : > { %2339 = vmatprep.mubr.bf16.mxu1 %v5303_v60  ;;  %v4666_v60 = vld [vmem:[%s6478_s4 + $0x26c] ss:$16 sps:$4 sm:$0xff]  }
  0x8c   : > { %2310 = vmatpush1.bf16.msra.mxu1 %v4652_v43  ;;  %v4733_v43 = vld [vmem:[%s6478_s4 + $0x7e0] ss:$16 sps:$4 sm:$0xff]  }
  0x8d   : > { %2228 = vmatpush1.bf16.msra.mxu0 %v4649_v42  ;;  %2311 = vmatprep.subr.bf16.mxu1 %v4660_v22  ;;  %v4738_v42 = vld [vmem:[%s6478_s4 + $0x3ec] ss:$16 sps:$4 sm:$0xff]  }
  0x8e   : > { %2229 = vmatprep.subr.bf16.mxu0 %v4657_v21  ;;  %v4736_v21 = vld [vmem:[%s6478_s4 + $0x3e8] ss:$16 sps:$4 sm:$0xff]   ;;  %v4741_v22 = vld [vmem:[%s6478_s4 + $0x40c] ss:$16 sps:$4 sm:$0xff]  }
  0x90   : > { %2312 = vmatpush1.bf16.msra.mxu1 %v4658_v45  ;;  %v5790_v45 = vpack.c.bf16 %v5375_v25, %v5375_v25  ;;  %v4750_v25 = vld [vmem:[%s6478_s4 + $0x8a4] ss:$16 sps:$4 sm:$0xff]  }
  0x91   : > { %2230 = vmatpush1.bf16.msra.mxu0 %v4655_v44  ;;  %2313 = vmatprep.subr.bf16.mxu1 %v4666_v60  ;;  %v4744_v44 = vld [vmem:[%s6478_s4 + $0x884] ss:$16 sps:$4 sm:$0xff]   ;;  %v4742_v60 = vld [vmem:[%s6478_s4 + $0x880] ss:$16 sps:$4 sm:$0xff]  }
  0x92   : > { %2231 = vmatprep.subr.bf16.mxu0 %v4663_v48  ;;  %v4739_v48 = vld [vmem:[%s6478_s4 + $0x408] ss:$16 sps:$4 sm:$0xff]  }
  0x94   : > { %2314 = vmatpush1.bf16.msra.mxu1 %v4664_v50  ;;  %v4745_v50 = vld [vmem:[%s6478_s4 + $0x428] ss:$16 sps:$4 sm:$0xff]  }
  0x95   : > { %2232 = vmatpush1.bf16.msra.mxu0 %v4661_v49  ;;  %2315 = vmatprep.subr.bf16.mxu1 %v4672_v52  ;;  %v4747_v49 = vld [vmem:[%s6478_s4 + $0x42c] ss:$16 sps:$4 sm:$0xff]  }
  0x96   : > { %2233 = vmatprep.subr.bf16.mxu0 %v4669_v51  ;;  %v4748_v51 = vld [vmem:[%s6478_s4 + $0x8a0] ss:$16 sps:$4 sm:$0xff]   ;;  %v4753_v52 = vld [vmem:[%s6478_s4 + $0x44c] ss:$16 sps:$4 sm:$0xff]  }
  0x98   : > { %2316 = vmatpush1.bf16.msra.mxu1 %v4670_v54  ;;  %v4754_v54 = vld [vmem:[%s6478_s4 + $0x8c0] ss:$16 sps:$4 sm:$0xff]  }
  0x99   : > { %2234 = vmatpush1.bf16.msra.mxu0 %v4667_v53  ;;  %2317 = vmatprep.subr.bf16.mxu1 %v4678_v57  ;;  %v4751_v53 = vld [vmem:[%s6478_s4 + $0x448] ss:$16 sps:$4 sm:$0xff]   ;;  %v4759_v57 = vld [vmem:[%s6478_s4 + $0x46c] ss:$16 sps:$4 sm:$0xff]  }
  0x9a   : > { %2235 = vmatprep.subr.bf16.mxu0 %v4675_v55  ;;  %v5046_v55 = vmov 0  }
  0x9c   : > { %2318 = vmatpush1.bf16.msra.mxu1 %v4676_v59  ;;  %v4757_v59 = vld [vmem:[%s6478_s4 + $0x468] ss:$16 sps:$4 sm:$0xff]  }
  0x9d   : > { %2236 = vmatpush1.bf16.msra.mxu0 %v4673_v58  ;;  %2319 = vmatprep.subr.bf16.mxu1 %v4684_v62  ;;  %v4762_v58 = vld [vmem:[%s6478_s4 + $0x8e4] ss:$16 sps:$4 sm:$0xff]   ;;  %v4768_v62 = vld [vmem:[%s6478_s4 + $0x88c] ss:$16 sps:$4 sm:$0xff]  }
  0x9e   : > { %2237 = vmatprep.subr.bf16.mxu0 %v4681_v61  ;;  %v4765_v61 = vld [vmem:[%s6478_s4 + $0x48c] ss:$16 sps:$4 sm:$0xff]  }
  0xa0   : > { %2320 = vmatpush1.bf16.msra.mxu1 %v4682_v0  ;;  %v4763_v0 = vld [vmem:[%s6478_s4 + $0x488] ss:$16 sps:$4 sm:$0xff]  }
  0xa1   : > { %2238 = vmatpush1.bf16.msra.mxu0 %v4679_v63  ;;  %2321 = vmatprep.subr.bf16.mxu1 %v4690_v2  ;;  %v4769_v63 = vld [vmem:[%s493_s30] sm:$0xff]   ;;  %v4772_v2 = vld [vmem:[%s6478_s4 + $0x4ac] ss:$16 sps:$4 sm:$0xff]  }
  0xa2   : > { %2239 = vmatprep.subr.bf16.mxu0 %v4687_v1  ;;  %v4766_v1 = vld [vmem:[%s6478_s4 + $0x888] ss:$16 sps:$4 sm:$0xff]  }
  0xa4   : > { %2322 = vmatpush1.bf16.msra.mxu1 %v4688_v4  ;;  %v4770_v4 = vld [vmem:[%s6478_s4 + $0x4a8] ss:$16 sps:$4 sm:$0xff]  }
  0xa5   : > { %2240 = vmatpush1.bf16.msra.mxu0 %v4685_v3  ;;  %2323 = vmatprep.subr.bf16.mxu1 %v4696_v8  ;;  %v4775_v3 = vld [vmem:[%s6478_s4 + $0x8ac] ss:$16 sps:$4 sm:$0xff]  }
  0xa6   : > { %2241 = vmatprep.subr.bf16.mxu0 %v4693_v5  ;;  %v4773_v5 = vld [vmem:[%s6478_s4 + $0x8a8] ss:$16 sps:$4 sm:$0xff]   ;;  %v4778_v8 = vld [vmem:[%s6478_s4 + $0x4cc] ss:$16 sps:$4 sm:$0xff]  }
  0xa8   : > { %2324 = vmatpush1.bf16.msra.mxu1 %v4694_v10  ;;  %v4776_v10 = vld [vmem:[%s6478_s4 + $0x4c8] ss:$16 sps:$4 sm:$0xff]  }
  0xa9   : > { %2242 = vmatpush1.bf16.msra.mxu0 %v4691_v9  ;;  %2325 = vmatprep.subr.bf16.mxu1 %v4702_v12  ;;  %v4781_v9 = vld [vmem:[%s6478_s4 + $0x8cc] ss:$16 sps:$4 sm:$0xff]  }
  0xaa   : > { %2243 = vmatprep.subr.bf16.mxu0 %v4699_v11  ;;  %v4779_v11 = vld [vmem:[%s6478_s4 + $0x8c8] ss:$16 sps:$4 sm:$0xff]   ;;  %v4784_v12 = vld [vmem:[%s6478_s4 + $0x4ec] ss:$16 sps:$4 sm:$0xff]  }
  0xac   : > { %2326 = vmatpush1.bf16.msra.mxu1 %v4700_v14  ;;  %v4782_v14 = vld [vmem:[%s6478_s4 + $0x4e8] ss:$16 sps:$4 sm:$0xff]  }
  0xad   : > { %2244 = vmatpush1.bf16.msra.mxu0 %v4697_v13  ;;  %2327 = vmatprep.subr.bf16.mxu1 %v4708_v16  ;;  %v4787_v13 = vld [vmem:[%s6478_s4 + $0x8ec] ss:$16 sps:$4 sm:$0xff]  }
  0xae   : > { %2245 = vmatprep.subr.bf16.mxu0 %v4705_v15  ;;  %v4785_v15 = vld [vmem:[%s6478_s4 + $0x8e8] ss:$16 sps:$4 sm:$0xff]   ;;  %v4790_v16 = vld [vmem:[%s6478_s4 + $0x50c] ss:$16 sps:$4 sm:$0xff]  }
  0xb0   : > { %2328 = vmatpush1.bf16.msra.mxu1 %v4706_v18  ;;  %v4788_v18 = vld [vmem:[%s6478_s4 + $0x508] ss:$16 sps:$4 sm:$0xff]  }
  0xb1   : > { %2246 = vmatpush1.bf16.msra.mxu0 %v4703_v17  ;;  %2329 = vmatprep.subr.bf16.mxu1 %v4714_v20  ;;  %v4793_v17 = vld [vmem:[%s6478_s4 + $0x804] ss:$16 sps:$4 sm:$0xff]   ;;  %v4796_v20 = vld [vmem:[%s6478_s4 + $0x52c] ss:$16 sps:$4 sm:$0xff]  }
  0xb2   : > { %2247 = vmatprep.subr.bf16.mxu0 %v4711_v19  ;;  %v4791_v19 = vld [vmem:[%s6478_s4 + $0x800] ss:$16 sps:$4 sm:$0xff]  }
  0xb4   : > { %2330 = vmatpush1.bf16.msra.mxu1 %v4712_v26  ;;  %v4794_v26 = vld [vmem:[%s6478_s4 + $0x528] ss:$16 sps:$4 sm:$0xff]  }
  0xb5   : > { %2248 = vmatpush1.bf16.msra.mxu0 %v4709_v23  ;;  %2331 = vmatprep.subr.bf16.mxu1 %v4720_v28  ;;  %v4799_v23 = vld [vmem:[%s6478_s4 + $0x824] ss:$16 sps:$4 sm:$0xff]   ;;  %v4802_v28 = vld [vmem:[%s6478_s4 + $0x54c] ss:$16 sps:$4 sm:$0xff]  }
  0xb6   : > { %2249 = vmatprep.subr.bf16.mxu0 %v4717_v27  ;;  %v4797_v27 = vld [vmem:[%s6478_s4 + $0x820] ss:$16 sps:$4 sm:$0xff]  }
  0xb8   : > { %2332 = vmatpush1.bf16.msra.mxu1 %v4718_v31  ;;  %v4800_v31 = vld [vmem:[%s6478_s4 + $0x548] ss:$16 sps:$4 sm:$0xff]  }
  0xb9   : > { %2250 = vmatpush1.bf16.msra.mxu0 %v4715_v30  ;;  %2333 = vmatprep.subr.bf16.mxu1 %v4726_v33  ;;  %v4805_v30 = vld [vmem:[%s6478_s4 + $0x844] ss:$16 sps:$4 sm:$0xff]   ;;  %v4808_v33 = vld [vmem:[%s6478_s4 + $0x56c] ss:$16 sps:$4 sm:$0xff]  }
  0xba   : > { %2251 = vmatprep.subr.bf16.mxu0 %v4723_v32  ;;  %v4803_v32 = vld [vmem:[%s6478_s4 + $0x840] ss:$16 sps:$4 sm:$0xff]  }
  0xbc   : > { %2334 = vmatpush1.bf16.msra.mxu1 %v4724_v35  ;;  %v4806_v35 = vld [vmem:[%s6478_s4 + $0x568] ss:$16 sps:$4 sm:$0xff]  }
  0xbd   : > { %2252 = vmatpush1.bf16.msra.mxu0 %v4721_v34  ;;  %2335 = vmatprep.subr.bf16.mxu1 %v4732_v37  ;;  %v4811_v34 = vld [vmem:[%s6478_s4 + $0x864] ss:$16 sps:$4 sm:$0xff]   ;;  %v4814_v37 = vld [vmem:[%s6478_s4 + $0x58c] ss:$16 sps:$4 sm:$0xff]  }
  0xbe   : > { %2253 = vmatprep.subr.bf16.mxu0 %v4729_v36  ;;  %v4809_v36 = vld [vmem:[%s6478_s4 + $0x860] ss:$16 sps:$4 sm:$0xff]  }
  0xc0   : > { %2336 = vmatpush1.bf16.msra.mxu1 %v4730_v40  ;;  %v5954_v40 = vld [vmem:[%s483_s27] sm:$0xff]  }
  0xc1   : > { %2254 = vmatpush1.bf16.msra.mxu0 %v4727_v39  ;;  %2337 = vmatprep.subr.bf16.mxu1 %v4738_v42  ;;  %v4817_v39 = vld [vmem:[%s6478_s4 + $0x904] ss:$16 sps:$4 sm:$0xff]   ;;  %v4815_v42 = vld [vmem:[%s6478_s4 + $0x900] ss:$16 sps:$4 sm:$0xff]  }
  0xc2   : > { %2255 = vmatprep.subr.bf16.mxu0 %v4735_v41  ;;  %v4812_v41 = vld [vmem:[%s6478_s4 + $0x588] ss:$16 sps:$4 sm:$0xff]  }
  0xc4   : > { %2338 = vmatpush1.bf16.msra.mxu1 %v4736_v21  ;;  %v4824_v21 = vld [vmem:[%s6478_s4 + $0x924] ss:$16 sps:$4 sm:$0xff]  }
  0xc5   : > { %2256 = vmatpush1.bf16.msra.mxu0 %v4733_v43  ;;  %2348 = vmatprep.subr.bf16.mxu1 %v4741_v22  ;;  %v4821_v43 = vld [vmem:[%s6478_s4 + $0x5ac] ss:$16 sps:$4 sm:$0xff]   ;;  %v4819_v22 = vld [vmem:[%s6478_s4 + $0x5a8] ss:$16 sps:$4 sm:$0xff]  }
  0xc6   : > { %2555 = vmatprep.subr.bf16.mxu0 %v4744_v44  ;;  %v4822_v44 = vld [vmem:[%s6478_s4 + $0x920] ss:$16 sps:$4 sm:$0xff]  }
  0xc7   : > { %2340 = vmatmul.mubr.bf16.vlgmr.msra.gmra.mrb[4].mxu1 %v5373_v24  ;;  %v4756_v24 = vld [vmem:[%s6478_s4 + $0x8c4] ss:$16 sps:$4 sm:$0xff]  }
  0xc8   : > { %2258 = vmatmul.mubr.bf16.vlgmr.msra.gmra.mrb[0].mxu0 %v5790_v45  ;;  %2349 = vmatpush1.bf16.msra.mxu1 %v4739_v48  ;;  %v4827_v48 = vld [vmem:[%s6478_s4 + $0x5cc] ss:$16 sps:$4 sm:$0xff]  }
  0xc9   : > { %2556 = vmatpush1.bf16.msra.mxu0 %v4742_v60  ;;  %2350 = vmatprep.subr.bf16.mxu1 %v4747_v49  ;;  %v4830_v60 = vld [vmem:[%s6478_s4 + $0x944] ss:$16 sps:$4 sm:$0xff]   ;;  %v4825_v49 = vld [vmem:[%s6478_s4 + $0x5c8] ss:$16 sps:$4 sm:$0xff]  }
  0xca   : > { %2557 = vmatprep.subr.bf16.mxu0 %v4750_v25  ;;  %2587 = vmatprep.mubr.bf16.mxu0 %v5046_v55  ;;  %v4828_v25 = vld [vmem:[%s6478_s4 + $0x940] ss:$16 sps:$4 sm:$0xff]  }
  0xcb   : > { %2380 = vmatprep.mubr.bf16.mxu1 %v5386_v29  ;;  %v4760_v29 = vld [vmem:[%s6478_s4 + $0x8e0] ss:$16 sps:$4 sm:$0xff]  }
  0xcc   : > { %2351 = vmatpush1.bf16.msra.mxu1 %v4745_v50  ;;  %v4833_v50 = vld [vmem:[%s6478_s4 + $0x5ec] ss:$16 sps:$4 sm:$0xff]  }
  0xcd   : > { %2558 = vmatpush1.bf16.msra.mxu0 %v4748_v51  ;;  %2352 = vmatprep.subr.bf16.mxu1 %v4753_v52  ;;  %v4836_v51 = vld [vmem:[%s6478_s4 + $0x964] ss:$16 sps:$4 sm:$0xff]   ;;  %v4831_v52 = vld [vmem:[%s6478_s4 + $0x5e8] ss:$16 sps:$4 sm:$0xff]  }
  0xce   : > { %2559 = vmatprep.subr.bf16.mxu0 %v4756_v24  ;;  %v4834_v24 = vld [vmem:[%s6478_s4 + $0x960] ss:$16 sps:$4 sm:$0xff]  }
  0xd0   : > { %2353 = vmatpush1.bf16.msra.mxu1 %v4751_v53  ;;  %v4839_v53 = vld [vmem:[%s6478_s4 + $0x60c] ss:$16 sps:$4 sm:$0xff]  }
  0xd1   : > { %2560 = vmatpush1.bf16.msra.mxu0 %v4754_v54  ;;  %2354 = vmatprep.subr.bf16.mxu1 %v4759_v57  ;;  %v6009_v54 = vld [vmem:[%s503_s25] sm:$0xff]   ;;  %v4837_v57 = vld [vmem:[%s6478_s4 + $0x608] ss:$16 sps:$4 sm:$0xff]  }
  0xd2   : > { %2561 = vmatprep.subr.bf16.mxu0 %v4762_v58  ;;  %v4843_v58 = vld [vmem:[%s6478_s4 + $0x62c] ss:$16 sps:$4 sm:$0xff]  }
  0xd4   : > { %2355 = vmatpush1.bf16.msra.mxu1 %v4757_v59  ;;  %v4841_v59 = vld [vmem:[%s6478_s4 + $0x628] ss:$16 sps:$4 sm:$0xff]  }
  0xd5   : > { %2562 = vmatpush1.bf16.msra.mxu0 %v4760_v29  ;;  %2356 = vmatprep.subr.bf16.mxu1 %v4765_v61  ;;  %v4846_v29 = vld [vmem:[%s6478_s4 + $0x64c] ss:$16 sps:$4 sm:$0xff]   ;;  %v4844_v61 = vld [vmem:[%s6478_s4 + $0x648] ss:$16 sps:$4 sm:$0xff]  }
  0xd6   : > { %2598 = vmatprep.subr.bf16.mxu0 %v4768_v62  ;;  %v4852_v62 = vld [vmem:[%s6478_s4 + $0x68c] ss:$16 sps:$4 sm:$0xff]  }
  0xd8   : > { %4236 = vmatmul.mubr.msk.bf16.vlgmr.msra.gmra.mrb[4].mxu0 %vm2551_vm0, %v4769_v63  ;;  %2357 = vmatpush1.bf16.msra.mxu1 %v4763_v0  ;;  %v4855_v0 = vld [vmem:[%s6478_s4 + $0x6ac] ss:$16 sps:$4 sm:$0xff]  }
  0xd9   : > { %2599 = vmatpush1.bf16.msra.mxu0 %v4766_v1  ;;  %2358 = vmatprep.subr.bf16.mxu1 %v4772_v2  ;;  %v4853_v1 = vld [vmem:[%s6478_s4 + $0x6a8] ss:$16 sps:$4 sm:$0xff]   ;;  %v4858_v2 = vld [vmem:[%s6478_s4 + $0x6cc] ss:$16 sps:$4 sm:$0xff]  }
  0xda   : > { %2600 = vmatprep.subr.bf16.mxu0 %v4775_v3  ;;  %2630 = vmatprep.mubr.bf16.mxu0 %v5046_v55 }
  0xdc   : > { %2359 = vmatpush1.bf16.msra.mxu1 %v4770_v4 }
  0xdd   : > { %2601 = vmatpush1.bf16.msra.mxu0 %v4773_v5  ;;  %2360 = vmatprep.subr.bf16.mxu1 %v4778_v8  ;;  %v4856_v8 = vld [vmem:[%s6478_s4 + $0x6c8] ss:$16 sps:$4 sm:$0xff]  }
  0xde   : > { %2602 = vmatprep.subr.bf16.mxu0 %v4781_v9  ;;  %v4861_v9 = vld [vmem:[%s6478_s4 + $0x6ec] ss:$16 sps:$4 sm:$0xff]  }
  0xe0   : > { %2361 = vmatpush1.bf16.msra.mxu1 %v4776_v10 }
  0xe1   : > { %2603 = vmatpush1.bf16.msra.mxu0 %v4779_v11  ;;  %2362 = vmatprep.subr.bf16.mxu1 %v4784_v12  ;;  %v4910_v11 = vld [vmem:[%s6481_s7] ss:$8 sps:$4 sm:$0xff]   ;;  %v4912_v12 = vld [vmem:[%s6481_s7 + $0x4] ss:$8 sps:$4 sm:$0xff]  }
  0xe2   : > { %2604 = vmatprep.subr.bf16.mxu0 %v4787_v13  ;;  %v4915_v13 = vld [vmem:[%s6481_s7 + $0x14] ss:$8 sps:$4 sm:$0xff]  }
  0xe4   : > { %2363 = vmatpush1.bf16.msra.mxu1 %v4782_v14  ;;  %v4859_v14 = vld [vmem:[%s6478_s4 + $0x6e8] ss:$16 sps:$4 sm:$0xff]  }
  0xe5   : > { %2605 = vmatpush1.bf16.msra.mxu0 %v4785_v15  ;;  %2364 = vmatprep.subr.bf16.mxu1 %v4790_v16  ;;  %v4913_v15 = vld [vmem:[%s6481_s7 + $0x10] ss:$8 sps:$4 sm:$0xff]   ;;  %v4864_v16 = vld [vmem:[%s6478_s4 + $0x70c] ss:$16 sps:$4 sm:$0xff]  }
  0xe6   : > { %2729 = vmatprep.subr.bf16.mxu0 %v4793_v17  ;;  %v4918_v17 = vld [vmem:[%s6481_s7 + $0x24] ss:$8 sps:$4 sm:$0xff]  }
  0xe8   : > { %4237 = vmatmul.mubr.msk.bf16.vlgmr.msra.gmra.mrb[8].mxu0 %vm2551_vm0, %v4769_v63  ;;  %2365 = vmatpush1.bf16.msra.mxu1 %v4788_v18  ;;  %v4850_v63 = vld [vmem:[%s6478_s4 + $0x688] ss:$16 sps:$4 sm:$0xff]  }
  0xe9   : > { %2730 = vmatpush1.bf16.msra.mxu0 %v4791_v19  ;;  %2366 = vmatprep.subr.bf16.mxu1 %v4796_v20  ;;  %v4862_v18 = vld [vmem:[%s6478_s4 + $0x708] ss:$16 sps:$4 sm:$0xff]   ;;  %v4867_v20 = vld [vmem:[%s6478_s4 + $0x72c] ss:$16 sps:$4 sm:$0xff]  }
  0xea   : > { %2731 = vmatprep.subr.bf16.mxu0 %v4799_v23  ;;  %2761 = vmatprep.mubr.bf16.mxu0 %v5046_v55  ;;  %v4916_v19 = vld [vmem:[%s6481_s7 + $0x20] ss:$8 sps:$4 sm:$0xff]   ;;  %v4921_v23 = vld [vmem:[%s6481_s7 + $0x34] ss:$8 sps:$4 sm:$0xff]  }
  0xec   : > { %2367 = vmatpush1.bf16.msra.mxu1 %v4794_v26  ;;  %v4865_v26 = vld [vmem:[%s6478_s4 + $0x728] ss:$16 sps:$4 sm:$0xff]  }
  0xed   : > { %2732 = vmatpush1.bf16.msra.mxu0 %v4797_v27  ;;  %2368 = vmatprep.subr.bf16.mxu1 %v4802_v28  ;;  %v4919_v27 = vld [vmem:[%s6481_s7 + $0x30] ss:$8 sps:$4 sm:$0xff]   ;;  %v4870_v28 = vld [vmem:[%s6478_s4 + $0x74c] ss:$16 sps:$4 sm:$0xff]  }
  0xee   : > { %2733 = vmatprep.subr.bf16.mxu0 %v4805_v30  ;;  %v4924_v30 = vld [vmem:[%s6481_s7 + $0x44] ss:$8 sps:$4 sm:$0xff]  }
  0xf0   : > { %2369 = vmatpush1.bf16.msra.mxu1 %v4800_v31  ;;  %v4868_v31 = vld [vmem:[%s6478_s4 + $0x748] ss:$16 sps:$4 sm:$0xff]  }
  0xf1   : > { %2734 = vmatpush1.bf16.msra.mxu0 %v4803_v32  ;;  %2370 = vmatprep.subr.bf16.mxu1 %v4808_v33  ;;  %v4922_v32 = vld [vmem:[%s6481_s7 + $0x40] ss:$8 sps:$4 sm:$0xff]   ;;  %v4873_v33 = vld [vmem:[%s6478_s4 + $0x76c] ss:$16 sps:$4 sm:$0xff]  }
  0xf2   : > { %2735 = vmatprep.subr.bf16.mxu0 %v4811_v34  ;;  %v4927_v34 = vld [vmem:[%s6481_s7 + $0x54] ss:$8 sps:$4 sm:$0xff]  }
  0xf4   : > { %2371 = vmatpush1.bf16.msra.mxu1 %v4806_v35  ;;  %v4871_v35 = vld [vmem:[%s6478_s4 + $0x768] ss:$16 sps:$4 sm:$0xff]  }
  0xf5   : > { %2736 = vmatpush1.bf16.msra.mxu0 %v4809_v36  ;;  %2372 = vmatprep.subr.bf16.mxu1 %v4814_v37  ;;  %v4925_v36 = vld [vmem:[%s6481_s7 + $0x50] ss:$8 sps:$4 sm:$0xff]   ;;  %v4876_v37 = vld [vmem:[%s6478_s4 + $0x78c] ss:$16 sps:$4 sm:$0xff]  }
  0xf6   : > { %2921 = vmatprep.subr.bf16.mxu0 %v4817_v39  ;;  %v4930_v39 = vld [vmem:[%s6481_s7 + $0x64] ss:$8 sps:$4 sm:$0xff]  }
  0xf8   : > { %4255 = vmatmul.mubr.msk.bf16.vlgmr.msra.gmra.mrb[4].mxu0 %vm2551_vm0, %v5954_v40  ;;  %2373 = vmatpush1.bf16.msra.mxu1 %v4812_v41  ;;  %v4874_v41 = vld [vmem:[%s6478_s4 + $0x788] ss:$16 sps:$4 sm:$0xff]  }
  0xf9   : > { %2922 = vmatpush1.bf16.msra.mxu0 %v4815_v42  ;;  %2374 = vmatprep.subr.bf16.mxu1 %v4821_v43  ;;  %v4928_v42 = vld [vmem:[%s6481_s7 + $0x60] ss:$8 sps:$4 sm:$0xff]   ;;  %v4879_v43 = vld [vmem:[%s6478_s4 + $0x7ac] ss:$16 sps:$4 sm:$0xff]  }
  0xfa   : > { %2923 = vmatprep.subr.bf16.mxu0 %v4824_v21  ;;  %2953 = vmatprep.mubr.bf16.mxu0 %v5046_v55  ;;  %v4933_v21 = vld [vmem:[%s6481_s7 + $0x74] ss:$8 sps:$4 sm:$0xff]  }
  0xfc   : > { %2375 = vmatpush1.bf16.msra.mxu1 %v4819_v22  ;;  %v4877_v22 = vld [vmem:[%s6478_s4 + $0x7a8] ss:$16 sps:$4 sm:$0xff]  }
  0xfd   : > { %2924 = vmatpush1.bf16.msra.mxu0 %v4822_v44  ;;  %2376 = vmatprep.subr.bf16.mxu1 %v4827_v48  ;;  %v4931_v44 = vld [vmem:[%s6481_s7 + $0x70] ss:$8 sps:$4 sm:$0xff]   ;;  %v4882_v48 = vld [vmem:[%s6478_s4 + $0x7cc] ss:$16 sps:$4 sm:$0xff]  }
  0xfe   : > { %2925 = vmatprep.subr.bf16.mxu0 %v4830_v60  ;;  %v4936_v60 = vld [vmem:[%s6481_s7 + $0x84] ss:$8 sps:$4 sm:$0xff]  }
 0x100   : > { %2377 = vmatpush1.bf16.msra.mxu1 %v4825_v49  ;;  %v4880_v49 = vld [vmem:[%s6478_s4 + $0x7c8] ss:$16 sps:$4 sm:$0xff]  }
 0x101   : > { %2926 = vmatpush1.bf16.msra.mxu0 %v4828_v25  ;;  %2378 = vmatprep.subr.bf16.mxu1 %v4833_v50  ;;  %v4934_v25 = vld [vmem:[%s6481_s7 + $0x80] ss:$8 sps:$4 sm:$0xff]   ;;  %v4885_v50 = vld [vmem:[%s6478_s4 + $0x7ec] ss:$16 sps:$4 sm:$0xff]  }
 0x102   : > { %2927 = vmatprep.subr.bf16.mxu0 %v4836_v51  ;;  %v4939_v51 = vld [vmem:[%s6481_s7 + $0x94] ss:$8 sps:$4 sm:$0xff]  }
 0x104   : > { %2379 = vmatpush1.bf16.msra.mxu1 %v4831_v52  ;;  %v4883_v52 = vld [vmem:[%s6478_s4 + $0x7e8] ss:$16 sps:$4 sm:$0xff]  }
 0x105   : > { %2928 = vmatpush1.bf16.msra.mxu0 %v4834_v24  ;;  %2389 = vmatprep.subr.bf16.mxu1 %v4839_v53  ;;  %v4937_v24 = vld [vmem:[%s6481_s7 + $0x90] ss:$8 sps:$4 sm:$0xff]   ;;  %v4888_v53 = vld [vmem:[%s6478_s4 + $0x80c] ss:$16 sps:$4 sm:$0xff]  }
 0x106   : > { %3511 = vmatprep.subr.bf16.mxu0 %v4912_v12  ;;  %v4909_v12 = vld [vmem:[%s6478_s4 + $0x96c] ss:$16 sps:$4 sm:$0xff]  }
 0x107   : > { %2381 = vmatmul.mubr.bf16.vlgmr.msra.gmra.mrb[4].mxu1 %v5577_v38  ;;  %v4849_v38 = vld [vmem:[%s6478_s4 + $0x66c] ss:$16 sps:$4 sm:$0xff]  }
 0x108   : > { %4274 = vmatmul.mubr.msk.bf16.vlgmr.msra.gmra.mrb[4].mxu0 %vm2551_vm0, %v6009_v54  ;;  %2390 = vmatpush1.bf16.msra.mxu1 %v4837_v57  ;;  %v4942_v57 = vld [vmem:[%s6481_s7 + $0xa4] ss:$8 sps:$4 sm:$0xff]  }
 0x109   : > { %2421 = vmatprep.mubr.bf16.mxu1 %v5590_v56  ;;  %2391 = vmatprep.subr.bf16.mxu1 %v4843_v58  ;;  %v4847_v56 = vld [vmem:[%s6478_s4 + $0x668] ss:$16 sps:$4 sm:$0xff]  }
 0x10a   : > { %3512 = vmatpush1.bf16.msra.mxu0 %v4910_v11  ;;  %v4886_v58 = vld [vmem:[%s6478_s4 + $0x808] ss:$16 sps:$4 sm:$0xff]   ;;  %v4951_v11 = vld [vmem:[%s6481_s7 + $0xd4] ss:$8 sps:$4 sm:$0xff]  }
 0x10b   : > { %3513 = vmatprep.subr.bf16.mxu0 %v4915_v13  ;;  %v4949_v13 = vld [vmem:[%s6481_s7 + $0xd0] ss:$8 sps:$4 sm:$0xff]  }
 0x10c   : > { %2392 = vmatpush1.bf16.msra.mxu1 %v4841_v59  ;;  %v4891_v59 = vld [vmem:[%s6478_s4 + $0x82c] ss:$16 sps:$4 sm:$0xff]  }
 0x10d   : > { %2393 = vmatprep.subr.bf16.mxu1 %v4846_v29  ;;  %v4940_v29 = vld [vmem:[%s6481_s7 + $0xa0] ss:$8 sps:$4 sm:$0xff]  }
 0x10e   : > { %3514 = vmatpush1.bf16.msra.mxu0 %v4913_v15  ;;  %v4954_v15 = vld [vmem:[%s6481_s7 + $0xe4] ss:$8 sps:$4 sm:$0xff]  }
 0x10f   : > { %3515 = vmatprep.subr.bf16.mxu0 %v4918_v17  ;;  %v4955_v17 = vld [vmem:[%s6481_s7 + $0xf0] ss:$8 sps:$4 sm:$0xff]  }
 0x110   : > { %2394 = vmatpush1.bf16.msra.mxu1 %v4844_v61  ;;  %v4945_v61 = vld [vmem:[%s6481_s7 + $0xb4] ss:$8 sps:$4 sm:$0xff]  }
 0x111   : > { %2395 = vmatprep.subr.bf16.mxu1 %v4849_v38  ;;  %v4889_v38 = vld [vmem:[%s6478_s4 + $0x828] ss:$16 sps:$4 sm:$0xff]  }
 0x112   : > { %3516 = vmatpush1.bf16.msra.mxu0 %v4916_v19  ;;  %v4960_v19 = vld [vmem:[%s6481_s7 + $0x104] ss:$8 sps:$4 sm:$0xff]  }
 0x113   : > { %3517 = vmatprep.subr.bf16.mxu0 %v4921_v23 }
 0x114   : > { %2396 = vmatpush1.bf16.msra.mxu1 %v4847_v56  ;;  %v4894_v56 = vld [vmem:[%s6478_s4 + $0x84c] ss:$16 sps:$4 sm:$0xff]  }
 0x115   : > { %2397 = vmatprep.subr.bf16.mxu1 %v4852_v62  ;;  %v4943_v62 = vld [vmem:[%s6481_s7 + $0xb0] ss:$8 sps:$4 sm:$0xff]  }
 0x116   : > { %3518 = vmatpush1.bf16.msra.mxu0 %v4919_v27 }
 0x117   : > { %3519 = vmatprep.subr.bf16.mxu0 %v4924_v30 }
 0x118   : > { %2398 = vmatpush1.bf16.msra.mxu1 %v4850_v63  ;;  %v4897_v63 = vld [vmem:[%s6478_s4 + $0x86c] ss:$16 sps:$4 sm:$0xff]  }
 0x119   : > { %2399 = vmatprep.subr.bf16.mxu1 %v4855_v0  ;;  %v4895_v0 = vld [vmem:[%s6478_s4 + $0x868] ss:$16 sps:$4 sm:$0xff]  }
 0x11a   : > { %v6051_v3 = vpop.f32.mrb[0].mxu1  ;;  %3520 = vmatpush1.bf16.msra.mxu0 %v4922_v32 }
 0x11b   : > { %v6053_v4 = vpop.f32.mrb[1].mxu1  ;;  %3521 = vmatprep.subr.bf16.mxu0 %v4927_v34  ;;  %v5006_v34 = vld [vmem:[%s6484_s10 + $0x40] sm:$0xff]  }
 0x11c   : > { %v2140_v5 = vpop.f32.mrb[2].mxu1  ;;  %2400 = vmatpush1.bf16.msra.mxu1 %v4853_v1  ;;  %v4900_v1 = vld [vmem:[%s6478_s4 + $0x90c] ss:$16 sps:$4 sm:$0xff]  }
 0x11d   : > { %v2141_v10 = vpop.f32.mrb[3].mxu1  ;;  %2401 = vmatprep.subr.bf16.mxu1 %v4858_v2  ;;  %v4898_v2 = vld [vmem:[%s6478_s4 + $0x908] ss:$16 sps:$4 sm:$0xff]   ;;  %v4903_v5 = vld [vmem:[%s6478_s4 + $0x92c] ss:$16 sps:$4 sm:$0xff]  }
 0x11e   : > { %3522 = vmatpush1.bf16.msra.mxu0 %v4925_v36  ;;  %v4906_v10 = vld [vmem:[%s6478_s4 + $0x94c] ss:$16 sps:$4 sm:$0xff]   ;;  %v5010_v36 = vld [vmem:[%s6484_s10 + $0x50] sm:$0xff]  }
 0x11f   : > { %3523 = vmatprep.subr.bf16.mxu0 %v4930_v39  ;;  %v5012_v39 = vld [vmem:[%s6484_s10 + $0x58] sm:$0xff]  }
 0x120   : > { %2402 = vmatpush1.bf16.msra.mxu1 %v4856_v8  ;;  %v4901_v8 = vld [vmem:[%s6478_s4 + $0x928] ss:$16 sps:$4 sm:$0xff]  }
 0x121   : > { %2403 = vmatprep.subr.bf16.mxu1 %v4861_v9  ;;  %v4948_v9 = vld [vmem:[%s6481_s7 + $0xc4] ss:$8 sps:$4 sm:$0xff]  }
 0x122   : > { %3524 = vmatpush1.bf16.msra.mxu0 %v4928_v42  ;;  %v5013_v42 = vld [vmem:[%s6484_s10 + $0x18] sm:$0xff]  }
 0x123   : > { %3525 = vmatprep.subr.bf16.mxu0 %v4933_v21  ;;  %v5014_v21 = vld [vmem:[%s6484_s10 + $0x60] sm:$0xff]  }
 0x124   : > { %2404 = vmatpush1.bf16.msra.mxu1 %v4859_v14  ;;  %v4907_v14 = vld [vmem:[%s6478_s4 + $0x968] ss:$16 sps:$4 sm:$0xff]  }
 0x125   : > { %2405 = vmatprep.subr.bf16.mxu1 %v4864_v16  ;;  %v4952_v16 = vld [vmem:[%s6481_s7 + $0xe0] ss:$8 sps:$4 sm:$0xff]  }
 0x126   : > { %3526 = vmatpush1.bf16.msra.mxu0 %v4931_v44 }
 0x127   : > { %3527 = vmatprep.subr.bf16.mxu0 %v4936_v60 }
 0x128   : > { %2406 = vmatpush1.bf16.msra.mxu1 %v4862_v18  ;;  %v4957_v18 = vld [vmem:[%s6481_s7 + $0xf4] ss:$8 sps:$4 sm:$0xff]  }
 0x129   : > { %2407 = vmatprep.subr.bf16.mxu1 %v4867_v20 }
 0x12a   : > { %3528 = vmatpush1.bf16.msra.mxu0 %v4934_v25 }
 0x12b   : > { %3529 = vmatprep.subr.bf16.mxu0 %v4939_v51 }
 0x12c   : > { %2408 = vmatpush1.bf16.msra.mxu1 %v4865_v26 }
 0x12d   : > { %2409 = vmatprep.subr.bf16.mxu1 %v4870_v28 }
 0x12e   : > { %3530 = vmatpush1.bf16.msra.mxu0 %v4937_v24 }
 0x12f   : > { %3531 = vmatprep.subr.bf16.mxu0 %v4942_v57 }
 0x130   : > { %2410 = vmatpush1.bf16.msra.mxu1 %v4868_v31 }
 0x131   : > { %2411 = vmatprep.subr.bf16.mxu1 %v4873_v33 }
 0x132   : > { %3532 = vmatpush1.bf16.msra.mxu0 %v4940_v29 }
 0x133   : > { %3533 = vmatprep.subr.bf16.mxu0 %v4945_v61 }
 0x134   : > { %2412 = vmatpush1.bf16.msra.mxu1 %v4871_v35  ;;  %v5009_v35 = vld [vmem:[%s6484_s10 + $0x8] sm:$0xff]  }
 0x135   : > { %2413 = vmatprep.subr.bf16.mxu1 %v4876_v37  ;;  %v5011_v37 = vld [vmem:[%s6484_s10 + $0x10] sm:$0xff]  }
 0x136   : > { %3534 = vmatpush1.bf16.msra.mxu0 %v4943_v62 }
 0x137   : > { %3535 = vmatprep.subr.bf16.mxu0 %v4948_v9 }
 0x138   : > { %2414 = vmatpush1.bf16.msra.mxu1 %v4874_v41  ;;  %v6300_v41 = vld [vmem:[%s6479_s5] sm:$0xf] }
 0x139   : > { %2415 = vmatprep.subr.bf16.mxu1 %v4879_v43  ;;  %v6308_v43 = vld [vmem:[%s6480_s6] sm:$0xf]  ;;  %v3044_v44 = vrot.slane %v6300_v41, %v5335_v6 }
 0x13c   : > { %2416 = vmatpush1.bf16.msra.mxu1 %v4877_v22 }
 0x13d   : > { %2417 = vmatprep.subr.bf16.mxu1 %v4882_v48 }
 0x140   : > { %2418 = vmatpush1.bf16.msra.mxu1 %v4880_v49  ;;  %v3048_v49 = vrot.slane %v6300_v41, %v5273_v46 }
 0x141   : > { %2419 = vmatprep.subr.bf16.mxu1 %v4885_v50  ;;  %v3074_v50 = vrot.slane %v6308_v43, %v5335_v6 }
 0x144   : > { %2420 = vmatpush1.bf16.msra.mxu1 %v4883_v52  ;;  %v5015_v52 = vld [vmem:[%s6484_s10 + $0x20] sm:$0xff]  }
 0x145   : > { %2772 = vmatprep.subr.bf16.mxu1 %v4888_v53  ;;  %v3078_v53 = vrot.slane %v6308_v43, %v5273_v46 }
 0x147   : > { %2422 = vmatmul.mubr.bf16.vlgmr.msra.gmra.mrb[4].mxu1 %v5790_v45  ;;  %v4892_v45 = vld [vmem:[%s6478_s4 + $0x848] ss:$16 sps:$4 sm:$0xff]  }
 0x148   : > { %2773 = vmatpush1.bf16.msra.mxu1 %v4886_v58  ;;  %2804 = vmatprep.mubr.bf16.mxu1 %v5046_v55 }
 0x149   : > { %2774 = vmatprep.subr.bf16.mxu1 %v4891_v59 }
 0x14c   : > { %2775 = vmatpush1.bf16.msra.mxu1 %v4889_v38 }
 0x14d   : > { %2776 = vmatprep.subr.bf16.mxu1 %v4894_v56 }
 0x150   : > { %2777 = vmatpush1.bf16.msra.mxu1 %v4892_v45 }
 0x151   : > { %2778 = vmatprep.subr.bf16.mxu1 %v4897_v63 }
 0x154   : > { %2779 = vmatpush1.bf16.msra.mxu1 %v4895_v0 }
 0x155   : > { %2964 = vmatprep.subr.bf16.mxu1 %v4900_v1 }
 0x157   : > { %4256 = vmatmul.mubr.msk.bf16.vlgmr.msra.gmra.mrb[8].mxu1 %vm2551_vm0, %v5954_v40  ;;  %v4946_v40 = vld [vmem:[%s6481_s7 + $0xc0] ss:$8 sps:$4 sm:$0xff]  }
 0x158   : > { %2965 = vmatpush1.bf16.msra.mxu1 %v4898_v2  ;;  %2996 = vmatprep.mubr.bf16.mxu1 %v5046_v55  ;;  %v4904_v55 = vld [vmem:[%s6478_s4 + $0x948] ss:$16 sps:$4 sm:$0xff]  }
 0x159   : > { %2966 = vmatprep.subr.bf16.mxu1 %v4903_v5  ;;  %3536 = vmatpush1.bf16.msra.mxu0 %v4946_v40 }
 0x15a   : > { %3537 = vmatprep.subr.bf16.mxu0 %v4951_v11 }
 0x15c   : > { %2967 = vmatpush1.bf16.msra.mxu1 %v4901_v8 }
 0x15d   : > { %2968 = vmatprep.subr.bf16.mxu1 %v4906_v10  ;;  %3538 = vmatpush1.bf16.msra.mxu0 %v4949_v13 }
 0x15e   : > { %3539 = vmatprep.subr.bf16.mxu0 %v4954_v15  ;;  %v4963_v15 = vld [vmem:[%s6481_s7 + $0x114] ss:$8 sps:$4 sm:$0xff]  }
 0x160   : > { %2969 = vmatpush1.bf16.msra.mxu1 %v4904_v55 }
 0x161   : > { %2970 = vmatprep.subr.bf16.mxu1 %v4909_v12  ;;  %3540 = vmatpush1.bf16.msra.mxu0 %v4952_v16  ;;  %v4961_v16 = vld [vmem:[%s6481_s7 + $0x110] ss:$8 sps:$4 sm:$0xff]  }
 0x162   : > { %3541 = vmatprep.subr.bf16.mxu0 %v4957_v18  ;;  %v4964_v18 = vld [vmem:[%s6481_s7 + $0x120] ss:$8 sps:$4 sm:$0xff]  }
 0x164   : > { %2971 = vmatpush1.bf16.msra.mxu1 %v4907_v14  ;;  %v4958_v14 = vld [vmem:[%s6481_s7 + $0x100] ss:$8 sps:$4 sm:$0xff]  }
 0x165   : > { %3542 = vmatpush1.bf16.msra.mxu0 %v4955_v17  ;;  %4362 = vmatprep.subr.bf16.mxu1 %v5006_v34  ;;  %v4966_v17 = vld [vmem:[%s6481_s7 + $0x124] ss:$8 sps:$4 sm:$0xff]   ;;  %v4976_v34 = vld [vmem:[%s6481_s7 + $0x160] ss:$8 sps:$4 sm:$0xff]  }
 0x166   : > { %3554 = vmatprep.subr.bf16.mxu0 %v4960_v19  ;;  %v4969_v19 = vld [vmem:[%s6481_s7 + $0x134] ss:$8 sps:$4 sm:$0xff]  }
 0x167   : > { %4275 = vmatmul.mubr.msk.bf16.vlgmr.msra.gmra.mrb[8].mxu1 %vm2551_vm0, %v6009_v54 }
 0x19b   : > { %v2259_v20 = vpop.f32.mrb[0].mxu0 }
 0x19c   : > { %v4384_v23 = vadd.f32 %v2259_v20, %v6051_v3  ;;  %v2261_v26 = vpop.f32.mrb[1].mxu0  ;;  %v5007_v3 = vld [vmem:[%s6484_s10] sm:$0xff]   ;;  %v4967_v20 = vld [vmem:[%s6481_s7 + $0x130] ss:$8 sps:$4 sm:$0xff]  }
 0x19d   : > { %v4385_v27 = vadd.f32 %v2261_v26, %v6053_v4  ;;  %v2263_v28 = vpop.f32.mrb[2].mxu0  ;;  %v5008_v4 = vld [vmem:[%s6484_s10 + $0x48] sm:$0xff]   ;;  %4363 = vmatpush3.bf16.msra.mxu1 %v5007_v3  ;;  %v4981_v3 = vld [vmem:[%s6481_s7 + $0x174] ss:$8 sps:$4 sm:$0xff]  }
 0x19e   : > { %v2264_v30 = vpop.f32.mrb[3].mxu0  ;;  %4364 = vmatprep.subr.bf16.mxu1 %v5008_v4  ;;  %v3018_v22 = vrot.slane %v4384_v23, %v5335_v6  ;;  %v4972_v23 = vld [vmem:[%s6481_s7 + $0x144] ss:$8 sps:$4 sm:$0xff]   ;;  %v4970_v26 = vld [vmem:[%s6481_s7 + $0x140] ss:$8 sps:$4 sm:$0xff]  }
 0x19f   : > { %v3022_v60 = vrot.slane %v4385_v27, %v5335_v6  ;;  %v4975_v27 = vld [vmem:[%s6481_s7 + $0x154] ss:$8 sps:$4 sm:$0xff]   ;;  %v4973_v28 = vld [vmem:[%s6481_s7 + $0x150] ss:$8 sps:$4 sm:$0xff]   ;;  %v4978_v30 = vld [vmem:[%s6481_s7 + $0x164] ss:$8 sps:$4 sm:$0xff]  }
 0x1a0   : > { %v4979_v4 = vld [vmem:[%s6481_s7 + $0x170] ss:$8 sps:$4 sm:$0xff]  }
 0x1a1   : > { %4365 = vmatpush3.bf16.msra.mxu1 %v5009_v35  ;;  %v4984_v35 = vld [vmem:[%s6481_s7 + $0x184] ss:$8 sps:$4 sm:$0xff]  }
 0x1a2   : > { %4366 = vmatprep.subr.bf16.mxu1 %v5010_v36  ;;  %v4982_v36 = vld [vmem:[%s6481_s7 + $0x180] ss:$8 sps:$4 sm:$0xff]  }
 0x1a5   : > { %4367 = vmatpush3.bf16.msra.mxu1 %v5011_v37  ;;  %v4987_v37 = vld [vmem:[%s6481_s7 + $0x194] ss:$8 sps:$4 sm:$0xff]  }
 0x1a6   : > { %4368 = vmatprep.subr.bf16.mxu1 %v5012_v39  ;;  %v4985_v39 = vld [vmem:[%s6481_s7 + $0x190] ss:$8 sps:$4 sm:$0xff]  }
 0x1a9   : > { %4369 = vmatpush3.bf16.msra.mxu1 %v5013_v42  ;;  %v4990_v42 = vld [vmem:[%s6481_s7 + $0x1a4] ss:$8 sps:$4 sm:$0xff]  }
 0x1aa   : > { %4370 = vmatprep.subr.bf16.mxu1 %v5014_v21  ;;  %v4988_v21 = vld [vmem:[%s6481_s7 + $0x1a0] ss:$8 sps:$4 sm:$0xff]  }
 0x1ad   : > { %4371 = vmatpush3.bf16.msra.mxu1 %v5015_v52 }
 0x1bb   : > { %v6268_v31 = vpop.f32.mrb[8].mxu0 }
 0x1bc   : > { %v6270_v32 = vpop.f32.mrb[9].mxu0 }
 0x1bd   : > { %v6272_v33 = vpop.f32.mrb[10].mxu0 }
 0x1be   : > { %v6274_v54 = vpop.f32.mrb[11].mxu0 }
 0x1db   : > { %v2955_v48 = vpop.f32.mrb[4].mxu0 }
 0x1dc   : > { %v3031_v25 = vadd.f32 %v3018_v22, %v2955_v48  ;;  %v2957_v51 = vpop.f32.mrb[5].mxu0  ;;  %v4996_v48 = vld [vmem:[%s6481_s7 + $0x1c4] ss:$8 sps:$4 sm:$0xff]  }
 0x1dd   : > { %v3032_v24 = vadd.f32 %v3022_v60, %v2957_v51  ;;  %v2959_v57 = vpop.f32.mrb[6].mxu0  ;;  %v4997_v51 = vld [vmem:[%s6481_s7 + $0x1d0] ss:$8 sps:$4 sm:$0xff]  }
 0x1de   : > { %v3061_v58 = vmul.f32 %v3044_v44, %v3031_v25  ;;  %v3035_v59 = vadd.f32 %v3018_v22, %v2959_v57  ;;  %v2961_v29 = vpop.f32.mrb[7].mxu0  ;;  %v4993_v22 = vld [vmem:[%s6481_s7 + $0x1b4] ss:$8 sps:$4 sm:$0xff]   ;;  %v5000_v57 = vld [vmem:[%s6481_s7 + $0x1e0] ss:$8 sps:$4 sm:$0xff]  }
 0x1df   : > { %v3062_v61 = vmul.f32 %v3048_v49, %v3032_v24  ;;  %v3036_v38 = vadd.f32 %v3022_v60, %v2961_v29  ;;  %v4994_v60 = vld [vmem:[%s6481_s7 + $0x1c0] ss:$8 sps:$4 sm:$0xff]   ;;  %v5002_v24 = vld [vmem:[%s6481_s7 + $0x1e4] ss:$8 sps:$4 sm:$0xff]  }
 0x1e0   : > { %v3091_v56 = vadd.f32 %v3074_v50, %v3061_v58  ;;  %v3065_v62 = vmul.f32 %v3044_v44, %v3035_v59  ;;  %v4991_v44 = vld [vmem:[%s6481_s7 + $0x1b0] ss:$8 sps:$4 sm:$0xff]   ;;  %v5005_v58 = vld [vmem:[%s6481_s7 + $0x1f4] ss:$8 sps:$4 sm:$0xff]  }
 0x1e1   : > { %v3092_v45 = vadd.f32 %v3078_v53, %v3062_v61  ;;  %v3066_v63 = vmul.f32 %v3048_v49, %v3036_v38  ;;  %v4999_v49 = vld [vmem:[%s6481_s7 + $0x1d4] ss:$8 sps:$4 sm:$0xff]   ;;  %v5003_v59 = vld [vmem:[%s6481_s7 + $0x1f0] ss:$8 sps:$4 sm:$0xff]  }
 0x1e2   : > { %v3107_v0 = vmul.f32 0.2, %v3091_v56  ;;  %v3095_v1 = vadd.f32 %v3074_v50, %v3065_v62  ;;  %vm3099_vm1 = vcmp.ge.f32.partialorder %v3091_v56, 0.0 }
 0x1e3   : > { %v3108_v2 = vmul.f32 0.2, %v3092_v45  ;;  %v3096_v5 = vadd.f32 %v3078_v53, %v3066_v63  ;;  %vm3100_vm3 = vcmp.ge.f32.partialorder %v3092_v45, 0.0 }
 0x1e4   : > { %vm3103_vm2 = vcmp.ge.f32.partialorder %v3095_v1, 0.0  ;;  %v3111_v8 = vmul.f32 0.2, %v3095_v1  ;;  %v3115_v10 = vsel %vm3099_vm1, %v3091_v56, %v3107_v0  ;;  %v3052_v56 = vrot.slane %v6300_v41, %v5338_v7 }
 0x1e5   : > { %v3112_v9 = vmul.f32 0.2, %v3096_v5  ;;  %vm3104_vm4 = vcmp.ge.f32.partialorder %v3096_v5, 0.0  ;;  %v3116_v55 = vsel %vm3100_vm3, %v3092_v45, %v3108_v2  ;;  %v3056_v0 = vrot.slane %v6300_v41, %v5276_v47 }
 0x1e6   : > { %v3119_v40 = vsel %vm3103_vm2, %v3095_v1, %v3111_v8 }
 0x1e7   : > { %v3120_v11 = vsel %vm3104_vm4, %v3096_v5, %v3112_v9  ;;  %v3123_v12 = vpack.c.bf16 %v3119_v40, %v3115_v10  ;;  %v3082_v5 = vrot.slane %v6308_v43, %v5338_v7  ;;  %v3086_v10 = vrot.slane %v6308_v43, %v5276_v47 }
 0x1e8   : > { %v3124_v13 = vpack.c.bf16 %v3120_v11, %v3116_v55 }
 0x1ea   : > { %3543 = vmatprep.mubr.bf16.mxu0 %v3124_v13 }
 0x1eb   : > { %3544 = vmatmul.mubr.bf16.vlgmr.msra.gmra.mrb[12].mxu0 %v3123_v12 }
 0x1ec   : > { %3555 = vmatpush1.bf16.msra.mxu0 %v4958_v14 }
 0x1ed   : > { %3556 = vmatprep.subr.bf16.mxu0 %v4963_v15 }
 0x1f0   : > { %3557 = vmatpush1.bf16.msra.mxu0 %v4961_v16 }
 0x1f1   : > { %3558 = vmatprep.subr.bf16.mxu0 %v4966_v17 }
 0x1f4   : > { %3559 = vmatpush1.bf16.msra.mxu0 %v4964_v18 }
 0x1f5   : > { %3560 = vmatprep.subr.bf16.mxu0 %v4969_v19 }
 0x1f8   : > { %3561 = vmatpush1.bf16.msra.mxu0 %v4967_v20 }
 0x1f9   : > { %3562 = vmatprep.subr.bf16.mxu0 %v4972_v23 }
 0x1fc   : > { %3563 = vmatpush1.bf16.msra.mxu0 %v4970_v26 }
 0x1fd   : > { %3564 = vmatprep.subr.bf16.mxu0 %v4975_v27  ;;  %v5016_v27 = vld [vmem:[%s6484_s10 + $0x68] sm:$0xff]  }
 0x1fe   : > { %4372 = vmatprep.subr.bf16.mxu1 %v5016_v27 }
 0x200   : > { %3565 = vmatpush1.bf16.msra.mxu0 %v4973_v28  ;;  %v5017_v28 = vld [vmem:[%s6484_s10 + $0x28] sm:$0xff]  }
 0x201   : > { %3566 = vmatprep.subr.bf16.mxu0 %v4978_v30  ;;  %4373 = vmatpush3.bf16.msra.mxu1 %v5017_v28  ;;  %v5018_v30 = vld [vmem:[%s6484_s10 + $0x70] sm:$0xff]  }
 0x202   : > { %4374 = vmatprep.subr.bf16.mxu1 %v5018_v30 }
 0x204   : > { %3567 = vmatpush1.bf16.msra.mxu0 %v4976_v34  ;;  %v5019_v34 = vld [vmem:[%s6484_s10 + $0x30] sm:$0xff]  }
 0x205   : > { %3568 = vmatprep.subr.bf16.mxu0 %v4981_v3  ;;  %4375 = vmatpush3.bf16.msra.mxu1 %v5019_v34  ;;  %v5020_v3 = vld [vmem:[%s6484_s10 + $0x78] sm:$0xff]  }
 0x206   : > { %4376 = vmatprep.subr.bf16.mxu1 %v5020_v3 }
 0x208   : > { %3569 = vmatpush1.bf16.msra.mxu0 %v4979_v4  ;;  %v5021_v4 = vld [vmem:[%s6484_s10 + $0x38] sm:$0xff]  }
 0x209   : > { %3570 = vmatprep.subr.bf16.mxu0 %v4984_v35  ;;  %4377 = vmatpush3.bf16.msra.mxu1 %v5021_v4  ;;  %v3597_v35 = vld [vmem:[%s6482_s8] sm:$0x3] }
 0x20c   : > { %3571 = vmatpush1.bf16.msra.mxu0 %v4982_v36  ;;  %v3613_v36 = vld [vmem:[%s6483_s9] sm:$0x3] }
 0x20d   : > { %3572 = vmatprep.subr.bf16.mxu0 %v4987_v37  ;;  %v3602_v37 = vrot.slane %v3597_v35, %v5335_v6 }
 0x210   : > { %3573 = vmatpush1.bf16.msra.mxu0 %v4985_v39  ;;  %v3606_v39 = vrot.slane %v3597_v35, %v5273_v46 }
 0x211   : > { %3574 = vmatprep.subr.bf16.mxu0 %v4990_v42  ;;  %v3618_v42 = vrot.slane %v3613_v36, %v5335_v6 }
 0x214   : > { %3575 = vmatpush1.bf16.msra.mxu0 %v4988_v21 }
 0x215   : > { %3576 = vmatprep.subr.bf16.mxu0 %v4993_v22  ;;  %v3622_v22 = vrot.slane %v3613_v36, %v5273_v46 }
 0x218   : > { %3577 = vmatpush1.bf16.msra.mxu0 %v4991_v44 }
 0x219   : > { %3578 = vmatprep.subr.bf16.mxu0 %v4996_v48 }
 0x21a   : > { %v2423_v25 = vpop.f32.mrb[4].mxu1 }
 0x21b   : > { %v2425_v50 = vpop.f32.mrb[5].mxu1  ;;  %v3026_v61 = vrot.slane %v2423_v25, %v5335_v6 }
 0x21c   : > { %3579 = vmatpush1.bf16.msra.mxu0 %v4994_v60  ;;  %v2427_v52 = vpop.f32.mrb[6].mxu1  ;;  %v3030_v45 = vrot.slane %v2425_v50, %v5335_v6 }
 0x21d   : > { %3580 = vmatprep.subr.bf16.mxu0 %v4999_v49  ;;  %v2428_v53 = vpop.f32.mrb[7].mxu1 }
 0x220   : > { %3581 = vmatpush1.bf16.msra.mxu0 %v4997_v51 }
 0x221   : > { %3582 = vmatprep.subr.bf16.mxu0 %v5002_v24 }
 0x224   : > { %3583 = vmatpush1.bf16.msra.mxu0 %v5000_v57 }
 0x225   : > { %3584 = vmatprep.subr.bf16.mxu0 %v5005_v58 }
 0x228   : > { %3585 = vmatpush1.bf16.msra.mxu0 %v5003_v59 }
 0x23a   : > { %v2998_v29 = vpop.f32.mrb[8].mxu1 }
 0x23b   : > { %v4386_v38 = vadd.f32 %v2998_v29, %v6268_v31  ;;  %v3000_v62 = vpop.f32.mrb[9].mxu1 }
 0x23c   : > { %v4387_v63 = vadd.f32 %v3000_v62, %v6270_v32  ;;  %v3002_v1 = vpop.f32.mrb[10].mxu1 }
 0x23d   : > { %v3033_v2 = vadd.f32 %v4386_v38, %v3026_v61  ;;  %v4388_v8 = vadd.f32 %v3002_v1, %v6272_v33  ;;  %v3004_v9 = vpop.f32.mrb[11].mxu1 }
 0x23e   : > { %v3034_v31 = vadd.f32 %v4387_v63, %v3030_v45  ;;  %v4389_v40 = vadd.f32 %v3004_v9, %v6274_v54 }
 0x23f   : > { %v3063_v55 = vmul.f32 %v3052_v56, %v3033_v2  ;;  %v3037_v11 = vadd.f32 %v4388_v8, %v3026_v61 }
 0x240   : > { %v3064_v32 = vmul.f32 %v3056_v0, %v3034_v31  ;;  %v3038_v12 = vadd.f32 %v4389_v40, %v3030_v45 }
 0x241   : > { %v3093_v13 = vadd.f32 %v3082_v5, %v3063_v55  ;;  %v3067_v41 = vmul.f32 %v3052_v56, %v3037_v11 }
 0x242   : > { %v3094_v14 = vadd.f32 %v3086_v10, %v3064_v32  ;;  %v3068_v15 = vmul.f32 %v3056_v0, %v3038_v12 }
 0x243   : > { %v3109_v16 = vmul.f32 0.2, %v3093_v13  ;;  %v3097_v17 = vadd.f32 %v3082_v5, %v3067_v41  ;;  %vm3101_vm5 = vcmp.ge.f32.partialorder %v3093_v13, 0.0 }
 0x244   : > { %v3098_v7 = vadd.f32 %v3086_v10, %v3068_v15  ;;  %v3110_v18 = vmul.f32 0.2, %v3094_v14  ;;  %vm3102_vm6 = vcmp.ge.f32.partialorder %v3094_v14, 0.0 }
 0x245   : > { %v3113_v33 = vmul.f32 0.2, %v3097_v17  ;;  %vm3105_vm7 = vcmp.ge.f32.partialorder %v3097_v17, 0.0  ;;  %v3117_v43 = vsel %vm3101_vm5, %v3093_v13, %v3109_v16 }
 0x246   : > { %vm3106_vm8 = vcmp.ge.f32.partialorder %v3098_v7, 0.0  ;;  %v3114_v47 = vmul.f32 0.2, %v3098_v7  ;;  %v3118_v19 = vsel %vm3102_vm6, %v3094_v14, %v3110_v18 }
 0x247   : > { %v3121_v54 = vsel %vm3105_vm7, %v3097_v17, %v3113_v33 }
 0x248   : > { %v3122_v20 = vsel %vm3106_vm8, %v3098_v7, %v3114_v47  ;;  %v3125_v23 = vpack.c.bf16 %v3121_v54, %v3117_v43 }
 0x249   : > { %v3126_v26 = vpack.c.bf16 %v3122_v20, %v3118_v19 }
 0x24b   : > { %3586 = vmatprep.mubr.bf16.mxu0 %v3126_v26 }
 0x24c   : > { %3587 = vmatmul.mubr.bf16.vlgmr.msra.gmra.mrb[12].mxu0 %v3125_v23 }
 0x31f   : > { %v3588_v21 = vpop.f32.mrb[12].mxu0 }
 0x320   : > { %v3609_v44 = vmul.f32 %v3602_v37, %v3588_v21  ;;  %v3590_v48 = vpop.f32.mrb[13].mxu0 }
 0x321   : > { %v3610_v60 = vmul.f32 %v3606_v39, %v3590_v48  ;;  %v3592_v49 = vpop.f32.mrb[14].mxu0 }
 0x322   : > { %v3625_v25 = vadd.f32 %v3618_v42, %v3609_v44  ;;  %v3611_v50 = vmul.f32 %v3602_v37, %v3592_v49  ;;  %v3594_v51 = vpop.f32.mrb[15].mxu0 }
 0x323   : > { %v3626_v52 = vadd.f32 %v3622_v22, %v3610_v60  ;;  %v3612_v24 = vmul.f32 %v3606_v39, %v3594_v51 }
 0x324   : > { %v3633_v53 = vmul.f32 0.2, %v3625_v25  ;;  %v3627_v57 = vadd.f32 %v3618_v42, %v3611_v50  ;;  %vm3629_vm9 = vcmp.ge.f32.partialorder %v3625_v25, 0.0 }
 0x325   : > { %v3634_v58 = vmul.f32 0.2, %v3626_v52  ;;  %v3628_v59 = vadd.f32 %v3622_v22, %v3612_v24  ;;  %vm3630_vm10 = vcmp.ge.f32.partialorder %v3626_v52, 0.0 }
 0x326   : > { %vm3631_vm11 = vcmp.ge.f32.partialorder %v3627_v57, 0.0  ;;  %v3635_v6 = vmul.f32 0.2, %v3627_v57  ;;  %v3637_v29 = vsel %vm3629_vm9, %v3625_v25, %v3633_v53 }
 0x327   : > { %vm3632_vm12 = vcmp.ge.f32.partialorder %v3628_v59, 0.0  ;;  %v3636_v46 = vmul.f32 0.2, %v3628_v59  ;;  %v3638_v38 = vsel %vm3630_vm10, %v3626_v52, %v3634_v58 }
 0x328   : > { %v3639_v61 = vsel %vm3631_vm11, %v3627_v57, %v3635_v6 }
 0x329   : > { %v3640_v56 = vsel %vm3632_vm12, %v3628_v59, %v3636_v46  ;;  %v3641_v62 = vpack.c.bf16 %v3639_v61, %v3637_v29 }
 0x32a   : > { %v3642_v45 = vpack.c.bf16 %v3640_v56, %v3638_v38 }
 0x32c   : > { %3803 = vmatprep.mubr.bf16.mxu1 %v3642_v45 }
 0x32d   : > { %3804 = vmatmul.mubr.bf16.vlgmr.msra.gmra.mrb[12].mxu1 %v3641_v62 }
 0x400   : > { %v4378_v63 = vpop.f32.mrb[12].mxu1 }
 0x401   : > { %v4379_v0 = vpop.f32.mrb[13].mxu1 }
 0x402   : > { %v4380_v1 = vadd.f32 %v4379_v0, %v4378_v63  ;;  %v4381_v2 = vpop.f32.mrb[14].mxu1 }
 0x403   : > { %v4382_v5 = vpop.f32.mrb[15].mxu1 }
 0x404   : > { %3812 = vst [vmem:[%s513_s21] sm:$0xff] %v4380_v1  ;;  %v4383_v8 = vadd.f32 %v4382_v5, %v4381_v2 }
 0x406   : > { %3813 = vst [vmem:[%s513_s21 + $0x8] sm:$0xff] %v4383_v8 }
 0x407 PF: > { %s21_s19 = sadd.s32 1, %s5044_s19   ;;  %s6486_s17 = smov %s5040_s18 }
 0x408   : > { %p18_p5 = scmp.ge.s32.totalorder %s21_s19, 4   ;;  %s6487_s18 = smov %s6489_s20 }
 0x40a   :  { %20 = sbr.rel (!%p18_p5) target bundleno = 2 (0x2), region = 103 }

</bundles_post_ra>
